<compile_context>
chip_gen: v7x
topology: tpu7x:2x2x1
jax: 0.10.0
libtpu: 0.0.40
codegen_flags: <defaults>
</compile_context>

<pallas_src>
import jax
import jax.numpy as jnp
from jax.experimental import pallas as pl
from jax.experimental.pallas import tpu as pltpu

Z_DIM = 100
Z_PAD = 128                 # latent K padded to one full lane width
LAYER_SIZES = [256, 512, 1024]
OUT_DIM = 28 * 28           # 784
OUT_PAD = 7 * 128           # 896 -> lane-dense output stores


def _round_up(n, m):
    return ((n + m - 1) // m) * m


def _leaky_relu(v, slope=0.2):
    return jnp.where(v > 0, v, slope * v)


def generator_kernel(x_ref,
                     w1_ref, b1_ref,
                     w2_ref, b2_ref,
                     w3_ref, b3_ref,
                     w4_ref, b4_ref,
                     out_ref):
    # One (TB, 128) tile of latents per grid step. All weights (~3.2 MB bf16)
    # are resident in VMEM across steps; matmuls run on the MXU in bf16 with
    # f32 accumulation, elementwise math stays in f32.
    h = jnp.dot(x_ref[...], w1_ref[...], preferred_element_type=jnp.float32)
    h = _leaky_relu(h + b1_ref[...])

    h = jnp.dot(h.astype(jnp.bfloat16), w2_ref[...],
                preferred_element_type=jnp.float32)
    h = _leaky_relu(h + b2_ref[...])

    h = jnp.dot(h.astype(jnp.bfloat16), w3_ref[...],
                preferred_element_type=jnp.float32)
    h = _leaky_relu(h + b3_ref[...])

    h = jnp.dot(h.astype(jnp.bfloat16), w4_ref[...],
                preferred_element_type=jnp.float32)
    h = jnp.tanh(h + b4_ref[...])

    out_ref[...] = h.astype(out_ref.dtype)


def init_generator_params(key):
    """Parameter init mirroring weights_init: Linear W ~ N(0, 0.02); biases
    keep the PyTorch default U(-1/sqrt(fan_in), +1/sqrt(fan_in)).

    Weights are zero-padded to lane-aligned shapes and stored in bf16;
    biases stay f32 (padded to the same output width)."""
    dims_in = [Z_DIM] + LAYER_SIZES                 # [100, 256, 512, 1024]
    dims_out = LAYER_SIZES + [OUT_DIM]              # [256, 512, 1024, 784]
    pad_in = [Z_PAD, 256, 512, 1024]
    pad_out = [256, 512, 1024, OUT_PAD]

    params = []
    for d_in, d_out, p_in, p_out in zip(dims_in, dims_out, pad_in, pad_out):
        key, kw, kb = jax.random.split(key, 3)
        w = 0.02 * jax.random.normal(kw, (d_in, d_out), dtype=jnp.float32)
        bound = 1.0 / jnp.sqrt(jnp.float32(d_in))
        b = jax.random.uniform(kb, (1, d_out), dtype=jnp.float32,
                               minval=-bound, maxval=bound)
        w_p = jnp.zeros((p_in, p_out), jnp.float32).at[:d_in, :d_out].set(w)
        b_p = jnp.zeros((1, p_out), jnp.float32).at[:, :d_out].set(b)
        params.append((w_p.astype(jnp.bfloat16), b_p))
    return params


def generator_forward(x, params, *, batch_tile=256):
    """x: (B, 100) float32  ->  (B, 1, 28, 28) float32 (NCHW)."""
    B = x.shape[0]
    TB = min(batch_tile, _round_up(B, 8))      # sublane-aligned batch tile
    B_pad = _round_up(B, TB)
    grid_steps = B_pad // TB

    # Zero-pad latents to (B_pad, 128) and cast to bf16 for the MXU.
    x_p = jnp.zeros((B_pad, Z_PAD), jnp.bfloat16)
    x_p = x_p.at[:B, :Z_DIM].set(x.astype(jnp.bfloat16))

    def resident(shape):
        # Same block every grid step -> stays loaded in VMEM.
        return pl.BlockSpec(shape, lambda i: (0, 0))

    in_specs = [pl.BlockSpec((TB, Z_PAD), lambda i: (i, 0))]
    flat_args = [x_p]
    for w, b in params:
        flat_args += [w, b]
        in_specs += [resident(w.shape), resident(b.shape)]

    flops = 2 * B_pad * sum(int(w.shape[0]) * int(w.shape[1]) for w, _ in params)
    bytes_accessed = (x_p.size * 2
                      + sum(w.size * 2 + b.size * 4 for w, b in params)
                      + B_pad * OUT_PAD * 4)

    out = pl.pallas_call(
        generator_kernel,
        out_shape=jax.ShapeDtypeStruct((B_pad, OUT_PAD), jnp.float32),
        grid=(grid_steps,),
        in_specs=in_specs,
        out_specs=pl.BlockSpec((TB, OUT_PAD), lambda i: (i, 0)),
        compiler_params=pltpu.CompilerParams(
            dimension_semantics=("parallel",),
            vmem_limit_bytes=24 << 20),
        cost_estimate=pl.CostEstimate(
            flops=flops,
            transcendentals=B_pad * OUT_PAD,
            bytes_accessed=bytes_accessed),
    )(*flat_args)

    # Drop the padded rows/columns, then reshape to NCHW like the PyTorch module.
    return out[:B, :OUT_DIM].reshape(B, 1, 28, 28)


if __name__ == "__main__":
    key = jax.random.PRNGKey(0)
    key, kx = jax.random.split(key)

    batch = 2
    x = jax.random.normal(kx, (batch, Z_DIM), dtype=jnp.float32)

    params = init_generator_params(key)

    y = generator_forward(x, params)
    y = jax.block_until_ready(y)

    assert y.shape == (batch, 1, 28, 28), y.shape
    assert y.dtype == jnp.float32
    # tanh output must lie in [-1, 1]
    assert bool(jnp.all(jnp.abs(y) <= 1.0 + 1e-6))

    # Pure-JAX reference of the same (bf16-weight) math.
    def ref_forward(x, params):
        B = x.shape[0]
        h = jnp.zeros((B, Z_PAD), jnp.float32).at[:, :Z_DIM].set(x)
        for i, (w, b) in enumerate(params):
            h = jnp.dot(h.astype(jnp.bfloat16), w,
                        preferred_element_type=jnp.float32) + b
            h = jnp.where(h > 0, h, 0.2 * h) if i < len(params) - 1 else jnp.tanh(h)
        return h[:, :OUT_DIM].reshape(B, 1, 28, 28)

    y_ref = ref_forward(x, params)
    assert bool(jnp.allclose(y, y_ref, atol=1e-2, rtol=1e-2)), (
        float(jnp.max(jnp.abs(y - y_ref))))

    print("KERNEL_OK")
</pallas_src>

<mosaic_0001>
module attributes {stable_mosaic.version = 11 : i64} {
  func.func @generator_kernel(%arg0: i32, %arg1: memref<8x128xbf16, #tpu.memory_space<vmem>>, %arg2: memref<128x256xbf16, #tpu.memory_space<vmem>>, %arg3: memref<1x256xf32, #tpu.memory_space<vmem>>, %arg4: memref<256x512xbf16, #tpu.memory_space<vmem>>, %arg5: memref<1x512xf32, #tpu.memory_space<vmem>>, %arg6: memref<512x1024xbf16, #tpu.memory_space<vmem>>, %arg7: memref<1x1024xf32, #tpu.memory_space<vmem>>, %arg8: memref<1024x896xbf16, #tpu.memory_space<vmem>>, %arg9: memref<1x896xf32, #tpu.memory_space<vmem>>, %arg10: memref<8x896xf32, #tpu.memory_space<vmem>>) attributes {dimension_semantics = [#tpu.dimension_semantics<parallel>], iteration_bounds = array<i64: 1>, scalar_prefetch = 0 : i64, scratch_operands = 0 : i64, tpu.core_type = #tpu.core_type<tc>, window_params = [{transform_indices = @transform_0, window_bounds = array<i64: 8, 128>}, {pipeline_mode = #tpu.pipeline_mode<synchronous>, transform_indices = @transform_1, window_bounds = array<i64: 128, 256>}, {pipeline_mode = #tpu.pipeline_mode<synchronous>, transform_indices = @transform_2, window_bounds = array<i64: 1, 256>}, {pipeline_mode = #tpu.pipeline_mode<synchronous>, transform_indices = @transform_3, window_bounds = array<i64: 256, 512>}, {pipeline_mode = #tpu.pipeline_mode<synchronous>, transform_indices = @transform_4, window_bounds = array<i64: 1, 512>}, {pipeline_mode = #tpu.pipeline_mode<synchronous>, transform_indices = @transform_5, window_bounds = array<i64: 512, 1024>}, {pipeline_mode = #tpu.pipeline_mode<synchronous>, transform_indices = @transform_6, window_bounds = array<i64: 1, 1024>}, {pipeline_mode = #tpu.pipeline_mode<synchronous>, transform_indices = @transform_7, window_bounds = array<i64: 1024, 896>}, {pipeline_mode = #tpu.pipeline_mode<synchronous>, transform_indices = @transform_8, window_bounds = array<i64: 1, 896>}, {transform_indices = @transform_9, window_bounds = array<i64: 8, 896>}]} {
    %c0 = arith.constant 0 : index
    %c0_0 = arith.constant 0 : index
    %0 = vector.load %arg1[%c0, %c0_0] : memref<8x128xbf16, #tpu.memory_space<vmem>>, vector<8x128xbf16>
    %c0_1 = arith.constant 0 : index
    %c0_2 = arith.constant 0 : index
    %1 = vector.load %arg2[%c0_1, %c0_2] : memref<128x256xbf16, #tpu.memory_space<vmem>>, vector<128x256xbf16>
    %cst = arith.constant dense<0.000000e+00> : vector<8x256xf32>
    %2 = tpu.matmul %0, %1, %cst {dimension_numbers = #tpu.dot_dimension_numbers<[1], [0], [0], [1], [0, 0, 1, 1], [], []>} : vector<8x128xbf16>, vector<128x256xbf16>, vector<8x256xf32> -> vector<8x256xf32>
    %c0_3 = arith.constant 0 : index
    %c0_4 = arith.constant 0 : index
    %3 = vector.load %arg3[%c0_3, %c0_4] : memref<1x256xf32, #tpu.memory_space<vmem>>, vector<1x256xf32>
    %4 = vector.broadcast %3 : vector<1x256xf32> to vector<8x256xf32>
    %5 = arith.addf %2, %4 : vector<8x256xf32>
    %cst_5 = arith.constant 0.000000e+00 : f32
    %6 = vector.broadcast %cst_5 : f32 to vector<8x256xf32>
    %7 = arith.cmpf ogt, %5, %6 : vector<8x256xf32>
    %cst_6 = arith.constant 2.000000e-01 : f32
    %8 = vector.broadcast %cst_6 : f32 to vector<8x256xf32>
    %9 = arith.mulf %8, %5 : vector<8x256xf32>
    %10 = arith.select %7, %5, %9 : vector<8x256xi1>, vector<8x256xf32>
    %11 = arith.truncf %10 : vector<8x256xf32> to vector<8x256xbf16>
    %c0_7 = arith.constant 0 : index
    %c0_8 = arith.constant 0 : index
    %12 = vector.load %arg4[%c0_7, %c0_8] : memref<256x512xbf16, #tpu.memory_space<vmem>>, vector<256x512xbf16>
    %cst_9 = arith.constant dense<0.000000e+00> : vector<8x512xf32>
    %13 = tpu.matmul %11, %12, %cst_9 {dimension_numbers = #tpu.dot_dimension_numbers<[1], [0], [0], [1], [0, 0, 1, 1], [], []>} : vector<8x256xbf16>, vector<256x512xbf16>, vector<8x512xf32> -> vector<8x512xf32>
    %c0_10 = arith.constant 0 : index
    %c0_11 = arith.constant 0 : index
    %14 = vector.load %arg5[%c0_10, %c0_11] : memref<1x512xf32, #tpu.memory_space<vmem>>, vector<1x512xf32>
    %15 = vector.broadcast %14 : vector<1x512xf32> to vector<8x512xf32>
    %16 = arith.addf %13, %15 : vector<8x512xf32>
    %cst_12 = arith.constant 0.000000e+00 : f32
    %17 = vector.broadcast %cst_12 : f32 to vector<8x512xf32>
    %18 = arith.cmpf ogt, %16, %17 : vector<8x512xf32>
    %cst_13 = arith.constant 2.000000e-01 : f32
    %19 = vector.broadcast %cst_13 : f32 to vector<8x512xf32>
    %20 = arith.mulf %19, %16 : vector<8x512xf32>
    %21 = arith.select %18, %16, %20 : vector<8x512xi1>, vector<8x512xf32>
    %22 = arith.truncf %21 : vector<8x512xf32> to vector<8x512xbf16>
    %c0_14 = arith.constant 0 : index
    %c0_15 = arith.constant 0 : index
    %23 = vector.load %arg6[%c0_14, %c0_15] : memref<512x1024xbf16, #tpu.memory_space<vmem>>, vector<512x1024xbf16>
    %cst_16 = arith.constant dense<0.000000e+00> : vector<8x1024xf32>
    %24 = tpu.matmul %22, %23, %cst_16 {dimension_numbers = #tpu.dot_dimension_numbers<[1], [0], [0], [1], [0, 0, 1, 1], [], []>} : vector<8x512xbf16>, vector<512x1024xbf16>, vector<8x1024xf32> -> vector<8x1024xf32>
    %c0_17 = arith.constant 0 : index
    %c0_18 = arith.constant 0 : index
    %25 = vector.load %arg7[%c0_17, %c0_18] : memref<1x1024xf32, #tpu.memory_space<vmem>>, vector<1x1024xf32>
    %26 = vector.broadcast %25 : vector<1x1024xf32> to vector<8x1024xf32>
    %27 = arith.addf %24, %26 : vector<8x1024xf32>
    %cst_19 = arith.constant 0.000000e+00 : f32
    %28 = vector.broadcast %cst_19 : f32 to vector<8x1024xf32>
    %29 = arith.cmpf ogt, %27, %28 : vector<8x1024xf32>
    %cst_20 = arith.constant 2.000000e-01 : f32
    %30 = vector.broadcast %cst_20 : f32 to vector<8x1024xf32>
    %31 = arith.mulf %30, %27 : vector<8x1024xf32>
    %32 = arith.select %29, %27, %31 : vector<8x1024xi1>, vector<8x1024xf32>
    %33 = arith.truncf %32 : vector<8x1024xf32> to vector<8x1024xbf16>
    %c0_21 = arith.constant 0 : index
    %c0_22 = arith.constant 0 : index
    %34 = vector.load %arg8[%c0_21, %c0_22] : memref<1024x896xbf16, #tpu.memory_space<vmem>>, vector<1024x896xbf16>
    %cst_23 = arith.constant dense<0.000000e+00> : vector<8x896xf32>
    %35 = tpu.matmul %33, %34, %cst_23 {dimension_numbers = #tpu.dot_dimension_numbers<[1], [0], [0], [1], [0, 0, 1, 1], [], []>} : vector<8x1024xbf16>, vector<1024x896xbf16>, vector<8x896xf32> -> vector<8x896xf32>
    %c0_24 = arith.constant 0 : index
    %c0_25 = arith.constant 0 : index
    %36 = vector.load %arg9[%c0_24, %c0_25] : memref<1x896xf32, #tpu.memory_space<vmem>>, vector<1x896xf32>
    %37 = vector.broadcast %36 : vector<1x896xf32> to vector<8x896xf32>
    %38 = arith.addf %35, %37 : vector<8x896xf32>
    %39 = math.tanh %38 : vector<8x896xf32>
    %c0_26 = arith.constant 0 : index
    %c0_27 = arith.constant 0 : index
    %40 = vector.load %arg10[%c0_26, %c0_27] : memref<8x896xf32, #tpu.memory_space<vmem>>, vector<8x896xf32>
    tpu.vector_store %arg10[%c0_26, %c0_27], %39 {strides = array<i32>} : memref<8x896xf32, #tpu.memory_space<vmem>>, vector<8x896xf32>,
    return
  }
  func.func @transform_0(%arg0: i32) -> (i32, i32) {
    %c0_i32 = arith.constant 0 : i32
    %c0_i32_0 = arith.constant 0 : i32
    return %arg0, %c0_i32 : i32, i32
  }
  func.func @transform_1(%arg0: i32) -> (i32, i32) {
    %c0_i32 = arith.constant 0 : i32
    %c0_i32_0 = arith.constant 0 : i32
    %c0_i32_1 = arith.constant 0 : i32
    return %c0_i32, %c0_i32_0 : i32, i32
  }
  func.func @transform_2(%arg0: i32) -> (i32, i32) {
    %c0_i32 = arith.constant 0 : i32
    %c0_i32_0 = arith.constant 0 : i32
    %c0_i32_1 = arith.constant 0 : i32
    return %c0_i32, %c0_i32_0 : i32, i32
  }
  func.func @transform_3(%arg0: i32) -> (i32, i32) {
    %c0_i32 = arith.constant 0 : i32
    %c0_i32_0 = arith.constant 0 : i32
    %c0_i32_1 = arith.constant 0 : i32
    return %c0_i32, %c0_i32_0 : i32, i32
  }
  func.func @transform_4(%arg0: i32) -> (i32, i32) {
    %c0_i32 = arith.constant 0 : i32
    %c0_i32_0 = arith.constant 0 : i32
    %c0_i32_1 = arith.constant 0 : i32
    return %c0_i32, %c0_i32_0 : i32, i32
  }
  func.func @transform_5(%arg0: i32) -> (i32, i32) {
    %c0_i32 = arith.constant 0 : i32
    %c0_i32_0 = arith.constant 0 : i32
    %c0_i32_1 = arith.constant 0 : i32
    return %c0_i32, %c0_i32_0 : i32, i32
  }
  func.func @transform_6(%arg0: i32) -> (i32, i32) {
    %c0_i32 = arith.constant 0 : i32
    %c0_i32_0 = arith.constant 0 : i32
    %c0_i32_1 = arith.constant 0 : i32
    return %c0_i32, %c0_i32_0 : i32, i32
  }
  func.func @transform_7(%arg0: i32) -> (i32, i32) {
    %c0_i32 = arith.constant 0 : i32
    %c0_i32_0 = arith.constant 0 : i32
    %c0_i32_1 = arith.constant 0 : i32
    return %c0_i32, %c0_i32_0 : i32, i32
  }
  func.func @transform_8(%arg0: i32) -> (i32, i32) {
    %c0_i32 = arith.constant 0 : i32
    %c0_i32_0 = arith.constant 0 : i32
    %c0_i32_1 = arith.constant 0 : i32
    return %c0_i32, %c0_i32_0 : i32, i32
  }
  func.func @transform_9(%arg0: i32) -> (i32, i32) {
    %c0_i32 = arith.constant 0 : i32
    %c0_i32_0 = arith.constant 0 : i32
    return %arg0, %c0_i32 : i32, i32
  }
}

</mosaic_0001>

<bundles_post_ra>
// kernel: tpu_custom_call.1
= control target key start
LH: loop header
LB: loop body
LE: loop exit
PB: predicated region body
PF: predicated region fallthrough
CT: control target
= control target key end

     0   :  { %14 = vsyncpa [#allocation3], 0  ;;  %s8609_s0 = inlined_call_operand.hbm [shape: bf16[8,128], index: 0, kind: input, shape index: {}]   ;;  %s8610_s1 = inlined_call_operand.hbm [shape: bf16[128,256], index: 1, kind: input, shape index: {}]   ;;  %s8611_s2 = inlined_call_operand.hbm [shape: f32[1,256], index: 2, kind: input, shape index: {}]   ;;  %s8612_s3 = inlined_call_operand.hbm [shape: bf16[256,512], index: 3, kind: input, shape index: {}]   ;;  %s8613_s4 = inlined_call_operand.hbm [shape: f32[1,512], index: 4, kind: input, shape index: {}]   ;;  %s8614_s5 = inlined_call_operand.hbm [shape: bf16[512,1024], index: 5, kind: input, shape index: {}]   ;;  %s8615_s6 = inlined_call_operand.hbm [shape: f32[1,1024], index: 6, kind: input, shape index: {}]   ;;  %s8616_s7 = inlined_call_operand.hbm [shape: bf16[1024,896], index: 7, kind: input, shape index: {}]   ;;  %s8617_s8 = inlined_call_operand.hbm [shape: f32[1,896], index: 8, kind: input, shape index: {}]   ;;  %s8618_s9 = inlined_call_operand.hbm [shape: f32[8,896], index: 9, kind: output, shape index: {}]  }
   0x1   :  { %15 = vsyncpa [#allocation6], 0 }
   0x2   :  { %16 = vsyncpa [#allocation9], 0 }
   0x3   :  { %17 = vsyncpa [#allocation12], 0 }
   0x4   :  { %18 = vsyncpa [#allocation15], 0 }
   0x5   :  { %19 = vsyncpa [#allocation4], 0  ;;  %s8247_s30 = smov [#allocation5]   ;;  %s8015_s13 = scalar_lea.hbm %s8610_s1, 2048 }
   0x6   :  { %s35_s10 = sshll.u32 %s8247_s30, 4  ;;  %p8016_p0 = scmp.ne.s32.totalorder %s8610_s1, %s8015_s13  ;;  %s36_s10 = int_to_ptr.vmem [resolvable:$true] %s35_s10 }
   0x7   :  { %p8019_p1 = scmp.lt.u32.totalorder %s8015_s13, %s8610_s1 }
   0x9   :  { %p8021_p2 = pnand %p8019_p1, %p8016_p0 }
   0xb   :  { %8024 = shalt.err (!%p8021_p2)
}
   0xc   :  { %s8025_s18 = scalar_lea.vmem %s36_s10, 2048  ;;  %p8030_p4 = scmp.lt.s32.totalorder %s36_s10, %s36_s10 }
   0xd   :  { %p8026_p3 = scmp.ne.s32.totalorder %s36_s10, %s8025_s18  ;;  %p8031_p5 = scmp.lt.s32.totalorder %s8025_s18, %s8025_s18 }
   0xf   :  { %p8032_p6 = por %p8031_p5, %p8030_p4 }
  0x11   :  { %p8033_p7 = pnand %p8032_p6, %p8026_p3 }
  0x13   :  { %8036 = shalt.err (!%p8033_p7)
}
  0x14   :  { %s8248_s19 = smov 128   ;;  %s8249_s20 = smov 8  }
  0x15   :  { %41 = dma.hbm_to_vmem [thread:$0]  %s8610_s1, 2048, %s36_s10, [#allocation6], %s8248_s19, %s8248_s19, %s8249_s20  }
  0x16   :  { %s8250_s23 = smov [#allocation8]   ;;  %s8037_s27 = scalar_lea.hbm %s8612_s3, 8192 }
  0x17   :  { %s57_s24 = sshll.u32 %s8250_s23, 4  ;;  %p8038_p8 = scmp.ne.s32.totalorder %s8612_s3, %s8037_s27  ;;  %s58_s24 = int_to_ptr.vmem [resolvable:$true] %s57_s24 }
  0x18   :  { %p8041_p9 = scmp.lt.u32.totalorder %s8037_s27, %s8612_s3 }
  0x1a   :  { %p8043_p10 = pnand %p8041_p9, %p8038_p8 }
  0x1c   :  { %8046 = shalt.err (!%p8043_p10)
}
  0x1d   :  { %s8047_s12 = scalar_lea.vmem %s58_s24, 8192  ;;  %p8052_p12 = scmp.lt.s32.totalorder %s58_s24, %s58_s24 }
  0x1e   :  { %p8048_p11 = scmp.ne.s32.totalorder %s58_s24, %s8047_s12  ;;  %p8053_p13 = scmp.lt.s32.totalorder %s8047_s12, %s8047_s12 }
  0x20   :  { %p8054_p0 = por %p8053_p13, %p8052_p12 }
  0x22   :  { %p8055_p1 = pnand %p8054_p0, %p8048_p11 }
  0x24   :  { %8058 = shalt.err (!%p8055_p1)
}
  0x25   :  { %s8251_s1 = smov 256   ;;  %s8252_s10 = smov 16  }
  0x26   :  { %63 = dma.hbm_to_vmem [thread:$0]  %s8612_s3, 8192, %s58_s24, [#allocation9], %s8251_s1, %s8251_s1, %s8252_s10  }
  0x27   :  { %s8253_s15 = smov [#allocation11]   ;;  %s8059_s19 = scalar_lea.hbm %s8614_s5, 32768 }
  0x28   :  { %s79_s16 = sshll.u32 %s8253_s15, 4  ;;  %p8060_p2 = scmp.ne.s32.totalorder %s8614_s5, %s8059_s19  ;;  %s80_s16 = int_to_ptr.vmem [resolvable:$true] %s79_s16 }
  0x29   :  { %p8063_p3 = scmp.lt.u32.totalorder %s8059_s19, %s8614_s5 }
  0x2b   :  { %p8065_p4 = pnand %p8063_p3, %p8060_p2 }
  0x2d   :  { %8068 = shalt.err (!%p8065_p4)
}
  0x2e   :  { %s8069_s25 = scalar_lea.vmem %s80_s16, 32768  ;;  %p8074_p6 = scmp.lt.s32.totalorder %s80_s16, %s80_s16 }
  0x2f   :  { %p8070_p5 = scmp.ne.s32.totalorder %s80_s16, %s8069_s25  ;;  %p8075_p7 = scmp.lt.s32.totalorder %s8069_s25, %s8069_s25 }
  0x31   :  { %p8076_p8 = por %p8075_p7, %p8074_p6 }
  0x33   :  { %p8077_p9 = pnand %p8076_p8, %p8070_p5 }
  0x35   :  { %8080 = shalt.err (!%p8077_p9)
}
  0x36   :  { %s8254_s3 = smov 512   ;;  %s8255_s24 = smov 32  }
  0x37   :  { %85 = dma.hbm_to_vmem [thread:$0]  %s8614_s5, 32768, %s80_s16, [#allocation12], %s8254_s3, %s8254_s3, %s8255_s24  }
  0x38   :  { %s8256_s28 = smov [#allocation14]   ;;  %s8081_s12 = scalar_lea.hbm %s8616_s7, 57344 }
  0x39   :  { %s101_s29 = sshll.u32 %s8256_s28, 4  ;;  %p8082_p10 = scmp.ne.s32.totalorder %s8616_s7, %s8081_s12  ;;  %s102_s29 = int_to_ptr.vmem [resolvable:$true] %s101_s29 }
  0x3a   :  { %p8085_p11 = scmp.lt.u32.totalorder %s8081_s12, %s8616_s7 }
  0x3c   :  { %p8087_p12 = pnand %p8085_p11, %p8082_p10 }
  0x3e   :  { %8090 = shalt.err (!%p8087_p12)
}
  0x3f   :  { %s8091_s15 = scalar_lea.vmem %s102_s29, 57344  ;;  %p8096_p0 = scmp.lt.s32.totalorder %s102_s29, %s102_s29 }
  0x40   :  { %p8092_p13 = scmp.ne.s32.totalorder %s102_s29, %s8091_s15  ;;  %p8097_p1 = scmp.lt.s32.totalorder %s8091_s15, %s8091_s15 }
  0x42   :  { %p8098_p2 = por %p8097_p1, %p8096_p0 }
  0x44   :  { %p8099_p3 = pnand %p8098_p2, %p8092_p13 }
  0x46   :  { %8102 = shalt.err (!%p8099_p3)
}
  0x47   :  { %s8257_s5 = smov 448   ;;  %s8258_s16 = smov 28  }
  0x48   :  { %107 = dma.hbm_to_vmem [thread:$0]  %s8616_s7, 57344, %s102_s29, [#allocation15], %s8257_s5, %s8257_s5, %s8258_s16  }
  0x49   :  { %s8259_s19 = smov [#allocation2]   ;;  %s8260_s21 = smov [#allocation7]  }
  0x4a   :  { %s26_s20 = sshll.u32 %s8259_s19, 4  ;;  %s48_s22 = sshll.u32 %s8260_s21, 4  ;;  %s27_s20 = int_to_ptr.vmem [resolvable:$true] %s26_s20  ;;  %s49_s22 = int_to_ptr.vmem [resolvable:$true] %s48_s22 }
  0x4b   :  { %s8103_s3 = scalar_lea.hbm %s8609_s0, 64 }
  0x4c   :  { %p8104_p4 = scmp.ne.s32.totalorder %s8609_s0, %s8103_s3  ;;  %p8107_p5 = scmp.lt.u32.totalorder %s8103_s3, %s8609_s0 }
  0x4e   :  { %p8109_p6 = pnand %p8107_p5, %p8104_p4 }
  0x50   :  { %8112 = shalt.err (!%p8109_p6)
}
  0x51   :  { %s8113_s7 = scalar_lea.vmem %s27_s20, 64  ;;  %p8118_p8 = scmp.lt.s32.totalorder %s27_s20, %s27_s20 }
  0x52   :  { %p8114_p7 = scmp.ne.s32.totalorder %s27_s20, %s8113_s7  ;;  %p8119_p9 = scmp.lt.s32.totalorder %s8113_s7, %s8113_s7 }
  0x54   :  { %p8120_p10 = por %p8119_p9, %p8118_p8 }
  0x56   :  { %p8121_p11 = pnand %p8120_p10, %p8114_p7 }
  0x58   :  { %8124 = shalt.err (!%p8121_p11)
}
  0x59   :  { %29 = dma.hbm_to_vmem [thread:$0]  %s8609_s0, 64, %s27_s20, [#allocation3]  }
  0x5a   :  { %s8125_s1 = scalar_lea.hbm %s8611_s2, 32 }
  0x5b   :  { %p8126_p12 = scmp.ne.s32.totalorder %s8611_s2, %s8125_s1  ;;  %p8129_p13 = scmp.lt.u32.totalorder %s8125_s1, %s8611_s2 }
  0x5d   :  { %p8131_p0 = pnand %p8129_p13, %p8126_p12 }
  0x5f   :  { %8134 = shalt.err (!%p8131_p0)
}
  0x60   :  { %s8135_s5 = scalar_lea.vmem %s49_s22, 32  ;;  %p8140_p2 = scmp.lt.s32.totalorder %s49_s22, %s49_s22 }
  0x61   :  { %p8136_p1 = scmp.ne.s32.totalorder %s49_s22, %s8135_s5  ;;  %p8141_p3 = scmp.lt.s32.totalorder %s8135_s5, %s8135_s5 }
  0x63   :  { %p8142_p4 = por %p8141_p3, %p8140_p2 }
  0x65   :  { %p8143_p5 = pnand %p8142_p4, %p8136_p1 }
  0x67   :  { %8146 = shalt.err (!%p8143_p5)
}
  0x68   :  { %51 = dma.hbm_to_vmem [thread:$0]  %s8611_s2, 32, %s49_s22, [#allocation6]  }
  0x69   :  { %s8261_s17 = smov [#allocation10]   ;;  %s8262_s19 = smov [#allocation13]  }
  0x6a   :  { %s70_s18 = sshll.u32 %s8261_s17, 4  ;;  %s92_s20 = sshll.u32 %s8262_s19, 4  ;;  %s71_s18 = int_to_ptr.vmem [resolvable:$true] %s70_s18  ;;  %s93_s20 = int_to_ptr.vmem [resolvable:$true] %s92_s20 }
  0x6b   :  { %s8147_s25 = scalar_lea.hbm %s8613_s4, 64 }
  0x6c   :  { %p8148_p6 = scmp.ne.s32.totalorder %s8613_s4, %s8147_s25  ;;  %p8151_p7 = scmp.lt.u32.totalorder %s8147_s25, %s8613_s4 }
  0x6e   :  { %p8153_p8 = pnand %p8151_p7, %p8148_p6 }
  0x70   :  { %8156 = shalt.err (!%p8153_p8)
}
  0x71   :  { %s8157_s2 = scalar_lea.vmem %s71_s18, 64  ;;  %p8162_p10 = scmp.lt.s32.totalorder %s71_s18, %s71_s18 }
  0x72   :  { %p8158_p9 = scmp.ne.s32.totalorder %s71_s18, %s8157_s2  ;;  %p8163_p11 = scmp.lt.s32.totalorder %s8157_s2, %s8157_s2 }
  0x74   :  { %p8164_p12 = por %p8163_p11, %p8162_p10 }
  0x76   :  { %p8165_p13 = pnand %p8164_p12, %p8158_p9 }
  0x78   :  { %8168 = shalt.err (!%p8165_p13)
}
  0x79   :  { %73 = dma.hbm_to_vmem [thread:$0]  %s8613_s4, 64, %s71_s18, [#allocation9]  }
  0x7a   :  { %s8169_s30 = scalar_lea.hbm %s8615_s6, 128 }
  0x7b   :  { %p8170_p0 = scmp.ne.s32.totalorder %s8615_s6, %s8169_s30  ;;  %p8173_p1 = scmp.lt.u32.totalorder %s8169_s30, %s8615_s6 }
  0x7d   :  { %p8175_p2 = pnand %p8173_p1, %p8170_p0 }
  0x7f   :  { %8178 = shalt.err (!%p8175_p2)
}
  0x80   :  { %s8179_s13 = scalar_lea.vmem %s93_s20, 128  ;;  %p8184_p4 = scmp.lt.s32.totalorder %s93_s20, %s93_s20 }
  0x81   :  { %p8180_p3 = scmp.ne.s32.totalorder %s93_s20, %s8179_s13  ;;  %p8185_p5 = scmp.lt.s32.totalorder %s8179_s13, %s8179_s13 }
  0x83   :  { %p8186_p6 = por %p8185_p5, %p8184_p4 }
  0x85   :  { %p8187_p7 = pnand %p8186_p6, %p8180_p3 }
  0x87   :  { %8190 = shalt.err (!%p8187_p7)
}
  0x88   :  { %95 = dma.hbm_to_vmem [thread:$0]  %s8615_s6, 128, %s93_s20, [#allocation12]  }
  0x89   :  { %s8263_s15 = smov [#allocation16]   ;;  %s8191_s17 = scalar_lea.hbm %s8617_s8, 112 }
  0x8a   :  { %s114_s5 = sshll.u32 %s8263_s15, 4  ;;  %p8192_p8 = scmp.ne.s32.totalorder %s8617_s8, %s8191_s17  ;;  %s115_s5 = int_to_ptr.vmem [resolvable:$true] %s114_s5 }
  0x8b   :  { %p8195_p9 = scmp.lt.u32.totalorder %s8191_s17, %s8617_s8 }
  0x8d   :  { %p8197_p10 = pnand %p8195_p9, %p8192_p8 }
  0x8f   :  { %8200 = shalt.err (!%p8197_p10)
}
  0x90   :  { %s8201_s25 = scalar_lea.vmem %s115_s5, 112  ;;  %s8205_s6 = scalar_lea.vmem %s115_s5, 128 }
  0x91   :  { %p8202_p11 = scmp.ne.s32.totalorder %s115_s5, %s8201_s25  ;;  %p8206_p12 = scmp.lt.s32.totalorder %s115_s5, %s115_s5 }
  0x92   :  { %p8207_p13 = scmp.lt.s32.totalorder %s8205_s6, %s8201_s25 }
  0x94   :  { %p8208_p0 = por %p8207_p13, %p8206_p12 }
  0x96   :  { %p8209_p1 = pnand %p8208_p0, %p8202_p11 }
  0x98   :  { %8212 = shalt.err (!%p8209_p1)
}
  0x99   :  { %117 = dma.hbm_to_vmem [thread:$0]  %s8617_s8, 112, %s115_s5, [#allocation15]  }
  0x9a   :  { %8235 = dma.done.wait [#allocation3], 64  }
  0x9b   :  { %8236 = vsyncadd [#allocation3], 4294967232 }
  0x9c   :  { %8237 = dma.done.wait [#allocation6], 2080  }
  0x9d   :  { %8238 = vsyncadd [#allocation6], 4294965216 }
  0x9e   :  { %8239 = dma.done.wait [#allocation9], 8256  }
  0x9f   :  { %8240 = vsyncadd [#allocation9], 4294959040 }
  0xa0   :  { %8241 = dma.done.wait [#allocation12], 32896  }
  0xa1   :  { %8242 = vsyncadd [#allocation12], 4294934400 }
  0xa2   :  { %8243 = dma.done.wait [#allocation15], 57456  }
  0xa3   :  { %8244 = vsyncadd [#allocation15], 4294909840  ;;  %v8264_v0 = vmov 0   ;;  %v7241_v1 = vld [vmem:[#allocation5 + $0x4] ss:$8 sps:$4 sm:$0xff]   ;;  %s8265_s8 = smov [#allocation17]  }
  0xa4   :  { %287 = vmatprep.mubr.bf16.mxu0 %v8264_v0  ;;  %v7243_v2 = vld [vmem:[#allocation5] ss:$8 sps:$4 sm:$0xff]   ;;  %255 = vmatprep.subr.bf16.mxu0 %v7241_v1  ;;  %v7244_v3 = vld [vmem:[#allocation5 + $0x14] ss:$8 sps:$4 sm:$0xff]   ;;  %v7246_v4 = vld [vmem:[#allocation5 + $0x10] ss:$8 sps:$4 sm:$0xff]  }
  0xa5   :  { %256 = vmatpush1.bf16.msra.mxu0 %v7243_v2  ;;  %v7247_v5 = vld [vmem:[#allocation5 + $0x24] ss:$8 sps:$4 sm:$0xff]   ;;  %v7249_v6 = vld [vmem:[#allocation5 + $0x20] ss:$8 sps:$4 sm:$0xff]   ;;  %v7250_v7 = vld [vmem:[#allocation5 + $0x34] ss:$8 sps:$4 sm:$0xff]  }
  0xa6   :  { %257 = vmatprep.subr.bf16.mxu0 %v7244_v3  ;;  %v7252_v8 = vld [vmem:[#allocation5 + $0x30] ss:$8 sps:$4 sm:$0xff]   ;;  %v7253_v9 = vld [vmem:[#allocation5 + $0x44] ss:$8 sps:$4 sm:$0xff]   ;;  %v7255_v10 = vld [vmem:[#allocation5 + $0x40] ss:$8 sps:$4 sm:$0xff]  }
  0xa7   :  { %v7256_v11 = vld [vmem:[#allocation5 + $0x54] ss:$8 sps:$4 sm:$0xff]   ;;  %v7258_v12 = vld [vmem:[#allocation5 + $0x50] ss:$8 sps:$4 sm:$0xff]   ;;  %v7259_v13 = vld [vmem:[#allocation5 + $0x64] ss:$8 sps:$4 sm:$0xff]  }
  0xa8   :  { %v7261_v14 = vld [vmem:[#allocation5 + $0x60] ss:$8 sps:$4 sm:$0xff]   ;;  %v7262_v15 = vld [vmem:[#allocation5 + $0x74] ss:$8 sps:$4 sm:$0xff]   ;;  %v7264_v16 = vld [vmem:[#allocation5 + $0x70] ss:$8 sps:$4 sm:$0xff]  }
  0xa9   :  { %258 = vmatpush1.bf16.msra.mxu0 %v7246_v4  ;;  %v7267_v17 = vld [vmem:[#allocation8 + $0x4] ss:$16 sps:$4 sm:$0xff]   ;;  %v146_v18 = vld [vmem:[#allocation2] sm:$0xf]  ;;  %v7265_v19 = vld [vmem:[#allocation8] ss:$16 sps:$4 sm:$0xff]  }
  0xaa   :  { %259 = vmatprep.subr.bf16.mxu0 %v7247_v5  ;;  %v7270_v20 = vld [vmem:[#allocation8 + $0x24] ss:$16 sps:$4 sm:$0xff]   ;;  %v7268_v21 = vld [vmem:[#allocation8 + $0x20] ss:$16 sps:$4 sm:$0xff]   ;;  %v7315_v50 = vld [vmem:[#allocation8 + $0xc] ss:$16 sps:$4 sm:$0xff]  }
  0xab   :  { %v7273_v22 = vld [vmem:[#allocation8 + $0x44] ss:$16 sps:$4 sm:$0xff]   ;;  %v7271_v23 = vld [vmem:[#allocation8 + $0x40] ss:$16 sps:$4 sm:$0xff]   ;;  %s6271_s24 = sshll.u32 %s8265_s8, 4  ;;  %s6272_s24 = int_to_ptr.vmem [resolvable:$true] %s6271_s24 }
  0xac   :  { %v7276_v24 = vld [vmem:[#allocation8 + $0x64] ss:$16 sps:$4 sm:$0xff]   ;;  %v7274_v25 = vld [vmem:[#allocation8 + $0x60] ss:$16 sps:$4 sm:$0xff]   ;;  %s8213_s26 = scalar_lea.vmem %s6272_s24, 896  ;;  %p8218_p3 = scmp.lt.s32.totalorder %s6272_s24, %s6272_s24 }
  0xad   :  { %260 = vmatpush1.bf16.msra.mxu0 %v7249_v6  ;;  %v7279_v26 = vld [vmem:[#allocation8 + $0x84] ss:$16 sps:$4 sm:$0xff]   ;;  %v7277_v27 = vld [vmem:[#allocation8 + $0x80] ss:$16 sps:$4 sm:$0xff]   ;;  %p8214_p2 = scmp.ne.s32.totalorder %s6272_s24, %s8213_s26  ;;  %p8219_p4 = scmp.lt.s32.totalorder %s8213_s26, %s8213_s26 }
  0xae   :  { %261 = vmatprep.subr.bf16.mxu0 %v7250_v7  ;;  %v7282_v28 = vld [vmem:[#allocation8 + $0xa4] ss:$16 sps:$4 sm:$0xff]   ;;  %v7280_v29 = vld [vmem:[#allocation8 + $0xa0] ss:$16 sps:$4 sm:$0xff]  }
  0xaf   :  { %v7285_v30 = vld [vmem:[#allocation8 + $0xc4] ss:$16 sps:$4 sm:$0xff]   ;;  %v7283_v31 = vld [vmem:[#allocation8 + $0xc0] ss:$16 sps:$4 sm:$0xff]   ;;  %p8220_p5 = por %p8219_p4, %p8218_p3 }
  0xb0   :  { %v7288_v32 = vld [vmem:[#allocation8 + $0xe4] ss:$16 sps:$4 sm:$0xff]   ;;  %v7286_v33 = vld [vmem:[#allocation8 + $0xe0] ss:$16 sps:$4 sm:$0xff]  }
  0xb1   :  { %262 = vmatpush1.bf16.msra.mxu0 %v7252_v8  ;;  %v7291_v34 = vld [vmem:[#allocation8 + $0x104] ss:$16 sps:$4 sm:$0xff]   ;;  %v7289_v35 = vld [vmem:[#allocation8 + $0x100] ss:$16 sps:$4 sm:$0xff]   ;;  %p8221_p6 = pnand %p8220_p5, %p8214_p2 }
  0xb2   :  { %263 = vmatprep.subr.bf16.mxu0 %v7253_v9  ;;  %v7294_v36 = vld [vmem:[#allocation8 + $0x124] ss:$16 sps:$4 sm:$0xff]   ;;  %v7292_v37 = vld [vmem:[#allocation8 + $0x120] ss:$16 sps:$4 sm:$0xff]  }
  0xb3   :  { %v7297_v38 = vld [vmem:[#allocation8 + $0x144] ss:$16 sps:$4 sm:$0xff]   ;;  %v7295_v39 = vld [vmem:[#allocation8 + $0x140] ss:$16 sps:$4 sm:$0xff]  }
  0xb4   :  { %v7300_v40 = vld [vmem:[#allocation8 + $0x164] ss:$16 sps:$4 sm:$0xff]   ;;  %v7298_v41 = vld [vmem:[#allocation8 + $0x160] ss:$16 sps:$4 sm:$0xff]  }
  0xb5   :  { %264 = vmatpush1.bf16.msra.mxu0 %v7255_v10  ;;  %v7303_v42 = vld [vmem:[#allocation8 + $0x184] ss:$16 sps:$4 sm:$0xff]   ;;  %v7301_v43 = vld [vmem:[#allocation8 + $0x180] ss:$16 sps:$4 sm:$0xff]  }
  0xb6   :  { %265 = vmatprep.subr.bf16.mxu0 %v7256_v11  ;;  %v7306_v44 = vld [vmem:[#allocation8 + $0x1a4] ss:$16 sps:$4 sm:$0xff]   ;;  %v7304_v45 = vld [vmem:[#allocation8 + $0x1a0] ss:$16 sps:$4 sm:$0xff]  }
  0xb7   :  { %v7309_v46 = vld [vmem:[#allocation8 + $0x1c4] ss:$16 sps:$4 sm:$0xff]   ;;  %v7307_v47 = vld [vmem:[#allocation8 + $0x1c0] ss:$16 sps:$4 sm:$0xff]  }
  0xb8   :  { %v7312_v48 = vld [vmem:[#allocation8 + $0x1e4] ss:$16 sps:$4 sm:$0xff]   ;;  %v7310_v49 = vld [vmem:[#allocation8 + $0x1e0] ss:$16 sps:$4 sm:$0xff]  }
  0xb9   :  { %266 = vmatpush1.bf16.msra.mxu0 %v7258_v12  ;;  %v808_v51 = vld [vmem:[#allocation11] sm:$0xff] }
  0xba   :  { %267 = vmatprep.subr.bf16.mxu0 %v7259_v13  ;;  %v812_v52 = vld [vmem:[#allocation11 + $0x20] sm:$0xff] }
  0xbb   :  { %v6365_v53 = vcombine.high %v808_v51, %v812_v52  ;;  %v6364_v54 = vcombine.low %v808_v51, %v812_v52  ;;  %v816_v55 = vld [vmem:[#allocation11 + $0x40] sm:$0xff] }
  0xbc   :  { %v820_v56 = vld [vmem:[#allocation11 + $0x60] sm:$0xff] }
  0xbd   :  { %268 = vmatpush1.bf16.msra.mxu0 %v7261_v14  ;;  %v6373_v57 = vcombine.high %v816_v55, %v820_v56  ;;  %2386 = vmatprep.subr.bf16.mxu1 %v6365_v53  ;;  %v6372_v58 = vcombine.low %v816_v55, %v820_v56  ;;  %v824_v59 = vld [vmem:[#allocation11 + $0x80] sm:$0xff] }
  0xbe   :  { %269 = vmatprep.subr.bf16.mxu0 %v7262_v15  ;;  %2387 = vmatpush1.bf16.msra.mxu1 %v6364_v54  ;;  %v828_v60 = vld [vmem:[#allocation11 + $0xa0] sm:$0xff] }
  0xbf   :  { %2388 = vmatprep.subr.bf16.mxu1 %v6373_v57  ;;  %v6381_v61 = vcombine.high %v824_v59, %v828_v60  ;;  %v6380_v62 = vcombine.low %v824_v59, %v828_v60  ;;  %v832_v63 = vld [vmem:[#allocation11 + $0xc0] sm:$0xff] }
  0xc0   :  { %v836_v0 = vld [vmem:[#allocation11 + $0xe0] sm:$0xff] }
  0xc1   :  { %270 = vmatpush1.bf16.msra.mxu0 %v7264_v16  ;;  %v6389_v1 = vcombine.high %v832_v63, %v836_v0  ;;  %v6388_v2 = vcombine.low %v832_v63, %v836_v0  ;;  %v840_v3 = vld [vmem:[#allocation11 + $0x100] sm:$0xff]  ;;  %v7318_v63 = vld [vmem:[#allocation8 + $0x2c] ss:$16 sps:$4 sm:$0xff]  }
  0xc2   :  { %710 = vmatprep.subr.bf16.mxu0 %v7267_v17  ;;  %2389 = vmatpush1.bf16.msra.mxu1 %v6372_v58  ;;  %v844_v4 = vld [vmem:[#allocation11 + $0x120] sm:$0xff] }
  0xc3   :  { %2390 = vmatprep.subr.bf16.mxu1 %v6381_v61  ;;  %v6397_v5 = vcombine.high %v840_v3, %v844_v4  ;;  %v6396_v6 = vcombine.low %v840_v3, %v844_v4  ;;  %v848_v7 = vld [vmem:[#allocation11 + $0x140] sm:$0xff]  ;;  %v7324_v3 = vld [vmem:[#allocation8 + $0x6c] ss:$16 sps:$4 sm:$0xff]  }
  0xc4   :  { %288 = vmatmul.mubr.bf16.vlgmr.msra.gmra.mrb[0].mxu0 %v146_v18  ;;  %v852_v8 = vld [vmem:[#allocation11 + $0x160] sm:$0xff] }
  0xc5   :  { %711 = vmatpush1.bf16.msra.mxu0 %v7265_v19  ;;  %v6405_v9 = vcombine.high %v848_v7, %v852_v8  ;;  %v6404_v10 = vcombine.low %v848_v7, %v852_v8  ;;  %v856_v11 = vld [vmem:[#allocation11 + $0x180] sm:$0xff]  ;;  %v7330_v7 = vld [vmem:[#allocation8 + $0xac] ss:$16 sps:$4 sm:$0xff]  }
  0xc6   :  { %712 = vmatprep.subr.bf16.mxu0 %v7270_v20  ;;  %2391 = vmatpush1.bf16.msra.mxu1 %v6380_v62  ;;  %v860_v12 = vld [vmem:[#allocation11 + $0x1a0] sm:$0xff] }
  0xc7   :  { %2392 = vmatprep.subr.bf16.mxu1 %v6389_v1  ;;  %v6413_v13 = vcombine.high %v856_v11, %v860_v12  ;;  %v6412_v14 = vcombine.low %v856_v11, %v860_v12  ;;  %v864_v15 = vld [vmem:[#allocation11 + $0x1c0] sm:$0xff]  ;;  %v7321_v1 = vld [vmem:[#allocation8 + $0x4c] ss:$16 sps:$4 sm:$0xff]  }
  0xc8   :  { %v868_v16 = vld [vmem:[#allocation11 + $0x1e0] sm:$0xff]  ;;  %v7336_v11 = vld [vmem:[#allocation8 + $0xec] ss:$16 sps:$4 sm:$0xff]  }
  0xc9   :  { %713 = vmatpush1.bf16.msra.mxu0 %v7268_v21  ;;  %v6421_v17 = vcombine.high %v864_v15, %v868_v16  ;;  %v6420_v18 = vcombine.low %v864_v15, %v868_v16  ;;  %v872_v19 = vld [vmem:[#allocation11 + $0x200] sm:$0xff]  ;;  %v7342_v15 = vld [vmem:[#allocation8 + $0x12c] ss:$16 sps:$4 sm:$0xff]  }
  0xca   :  { %714 = vmatprep.subr.bf16.mxu0 %v7273_v22  ;;  %2393 = vmatpush1.bf16.msra.mxu1 %v6388_v2  ;;  %v876_v20 = vld [vmem:[#allocation11 + $0x220] sm:$0xff] }
  0xcb   :  { %2394 = vmatprep.subr.bf16.mxu1 %v6397_v5  ;;  %v6429_v21 = vcombine.high %v872_v19, %v876_v20  ;;  %v6428_v22 = vcombine.low %v872_v19, %v876_v20  ;;  %v7313_v61 = vld [vmem:[#allocation8 + $0x8] ss:$16 sps:$4 sm:$0xff]   ;;  %v7327_v5 = vld [vmem:[#allocation8 + $0x8c] ss:$16 sps:$4 sm:$0xff]  }
  0xcc   :  { %v7316_v0 = vld [vmem:[#allocation8 + $0x28] ss:$16 sps:$4 sm:$0xff]   ;;  %v7348_v19 = vld [vmem:[#allocation8 + $0x16c] ss:$16 sps:$4 sm:$0xff]  }
  0xcd   :  { %715 = vmatpush1.bf16.msra.mxu0 %v7271_v23  ;;  %v880_v23 = vld [vmem:[#allocation11 + $0x240] sm:$0xff] }
  0xce   :  { %716 = vmatprep.subr.bf16.mxu0 %v7276_v24  ;;  %2395 = vmatpush1.bf16.msra.mxu1 %v6396_v6  ;;  %v884_v24 = vld [vmem:[#allocation11 + $0x260] sm:$0xff] }
  0xcf   :  { %2396 = vmatprep.subr.bf16.mxu1 %v6405_v9  ;;  %v7319_v2 = vld [vmem:[#allocation8 + $0x48] ss:$16 sps:$4 sm:$0xff]   ;;  %v7333_v9 = vld [vmem:[#allocation8 + $0xcc] ss:$16 sps:$4 sm:$0xff]  }
  0xd0   :  { %v7322_v4 = vld [vmem:[#allocation8 + $0x68] ss:$16 sps:$4 sm:$0xff]  }
  0xd1   :  { %717 = vmatpush1.bf16.msra.mxu0 %v7274_v25  ;;  %v6437_v25 = vcombine.high %v880_v23, %v884_v24  ;;  %v7325_v6 = vld [vmem:[#allocation8 + $0x88] ss:$16 sps:$4 sm:$0xff]  }
  0xd2   :  { %718 = vmatprep.subr.bf16.mxu0 %v7279_v26  ;;  %2397 = vmatpush1.bf16.msra.mxu1 %v6404_v10  ;;  %v6436_v26 = vcombine.low %v880_v23, %v884_v24  ;;  %v7328_v8 = vld [vmem:[#allocation8 + $0xa8] ss:$16 sps:$4 sm:$0xff]   ;;  %v7354_v23 = vld [vmem:[#allocation8 + $0x1ac] ss:$16 sps:$4 sm:$0xff]  }
  0xd3   :  { %2398 = vmatprep.subr.bf16.mxu1 %v6413_v13  ;;  %v7331_v10 = vld [vmem:[#allocation8 + $0xc8] ss:$16 sps:$4 sm:$0xff]   ;;  %v7339_v13 = vld [vmem:[#allocation8 + $0x10c] ss:$16 sps:$4 sm:$0xff]  }
  0xd4   :  { %v7334_v12 = vld [vmem:[#allocation8 + $0xe8] ss:$16 sps:$4 sm:$0xff]  }
  0xd5   :  { %719 = vmatpush1.bf16.msra.mxu0 %v7277_v27  ;;  %v888_v27 = vld [vmem:[#allocation11 + $0x280] sm:$0xff] }
  0xd6   :  { %720 = vmatprep.subr.bf16.mxu0 %v7282_v28  ;;  %2399 = vmatpush1.bf16.msra.mxu1 %v6412_v14  ;;  %v892_v28 = vld [vmem:[#allocation11 + $0x2a0] sm:$0xff] }
  0xd7   :  { %2400 = vmatprep.subr.bf16.mxu1 %v6421_v17  ;;  %v7337_v14 = vld [vmem:[#allocation8 + $0x108] ss:$16 sps:$4 sm:$0xff]   ;;  %v7345_v17 = vld [vmem:[#allocation8 + $0x14c] ss:$16 sps:$4 sm:$0xff]  }
  0xd8   :  { %v7340_v16 = vld [vmem:[#allocation8 + $0x128] ss:$16 sps:$4 sm:$0xff]  }
  0xd9   :  { %721 = vmatpush1.bf16.msra.mxu0 %v7280_v29  ;;  %v6445_v29 = vcombine.high %v888_v27, %v892_v28  ;;  %v7346_v20 = vld [vmem:[#allocation8 + $0x168] ss:$16 sps:$4 sm:$0xff]  }
  0xda   :  { %722 = vmatprep.subr.bf16.mxu0 %v7285_v30  ;;  %2401 = vmatpush1.bf16.msra.mxu1 %v6420_v18  ;;  %v165_v30 = vlaneseq  ;;  %v7343_v18 = vld [vmem:[#allocation8 + $0x148] ss:$16 sps:$4 sm:$0xff]  }
  0xdb   :  { %2402 = vmatprep.subr.bf16.mxu1 %v6429_v21  ;;  %v7351_v21 = vld [vmem:[#allocation8 + $0x18c] ss:$16 sps:$4 sm:$0xff]   ;;  %v7352_v24 = vld [vmem:[#allocation8 + $0x1a8] ss:$16 sps:$4 sm:$0xff]  }
  0xdd   :  { %723 = vmatpush1.bf16.msra.mxu0 %v7283_v31  ;;  %v6444_v31 = vcombine.low %v888_v27, %v892_v28  ;;  %v7360_v27 = vld [vmem:[#allocation8 + $0x1ec] ss:$16 sps:$4 sm:$0xff]  }
  0xde   :  { %724 = vmatprep.subr.bf16.mxu0 %v7288_v32  ;;  %2403 = vmatpush1.bf16.msra.mxu1 %v6428_v22  ;;  %v896_v32 = vld [vmem:[#allocation11 + $0x2c0] sm:$0xff]  ;;  %v809_v28 = vld [vmem:[#allocation11 + $0x8] sm:$0xff] }
  0xdf   :  { %2404 = vmatprep.subr.bf16.mxu1 %v6437_v25  ;;  %v7349_v22 = vld [vmem:[#allocation8 + $0x188] ss:$16 sps:$4 sm:$0xff]   ;;  %v7357_v25 = vld [vmem:[#allocation8 + $0x1cc] ss:$16 sps:$4 sm:$0xff]  }
  0xe1   :  { %725 = vmatpush1.bf16.msra.mxu0 %v7286_v33  ;;  %v900_v33 = vld [vmem:[#allocation11 + $0x2e0] sm:$0xff] }
  0xe2   :  { %726 = vmatprep.subr.bf16.mxu0 %v7291_v34  ;;  %2405 = vmatpush1.bf16.msra.mxu1 %v6436_v26  ;;  %v6453_v34 = vcombine.high %v896_v32, %v900_v33  ;;  %v7355_v26 = vld [vmem:[#allocation8 + $0x1c8] ss:$16 sps:$4 sm:$0xff]  }
  0xe3   :  { %2406 = vmatprep.subr.bf16.mxu1 %v6445_v29  ;;  %v813_v29 = vld [vmem:[#allocation11 + $0x28] sm:$0xff] }
  0xe5   :  { %727 = vmatpush1.bf16.msra.mxu0 %v7289_v35  ;;  %v8424_v35 = vshrl.u32 %v165_v30, 7  ;;  %v7358_v30 = vld [vmem:[#allocation8 + $0x1e8] ss:$16 sps:$4 sm:$0xff]  }
  0xe6   :  { %728 = vmatprep.subr.bf16.mxu0 %v7294_v36  ;;  %2407 = vmatpush1.bf16.msra.mxu1 %v6444_v31  ;;  %v6452_v36 = vcombine.low %v896_v32, %v900_v33  ;;  %v6367_v31 = vcombine.high %v809_v28, %v813_v29  ;;  %v817_v32 = vld [vmem:[#allocation11 + $0x48] sm:$0xff] }
  0xe7   :  { %2408 = vmatprep.subr.bf16.mxu1 %v6453_v34  ;;  %v821_v33 = vld [vmem:[#allocation11 + $0x68] sm:$0xff]  ;;  %v6366_v34 = vcombine.low %v809_v28, %v813_v29 }
  0xe9   :  { %729 = vmatpush1.bf16.msra.mxu0 %v7292_v37  ;;  %v904_v37 = vld [vmem:[#allocation11 + $0x300] sm:$0xff] }
  0xea   :  { %730 = vmatprep.subr.bf16.mxu0 %v7297_v38  ;;  %v908_v38 = vld [vmem:[#allocation11 + $0x320] sm:$0xff]  ;;  %2409 = vmatpush1.bf16.msra.mxu1 %v6452_v36  ;;  %v6375_v36 = vcombine.high %v817_v32, %v821_v33 }
  0xed   :  { %731 = vmatpush1.bf16.msra.mxu0 %v7295_v39  ;;  %v163_v39 = vld [vmem:[#allocation7] sm:$0x3] }
  0xee   :  { %732 = vmatprep.subr.bf16.mxu0 %v7300_v40  ;;  %v6461_v40 = vcombine.high %v904_v37, %v908_v38 }
  0xf0   :  { %2410 = vmatprep.subr.bf16.mxu1 %v6461_v40 }
  0xf1   :  { %733 = vmatpush1.bf16.msra.mxu0 %v7298_v41  ;;  %v8427_v41 = vsub.s32 0, %v8424_v35 }
  0xf2   :  { %734 = vmatprep.subr.bf16.mxu0 %v7303_v42  ;;  %v8430_v42 = vsub.s32 1, %v8424_v35 }
  0xf5   :  { %735 = vmatpush1.bf16.msra.mxu0 %v7301_v43  ;;  %v6460_v43 = vcombine.low %v904_v37, %v908_v38  ;;  %v825_v37 = vld [vmem:[#allocation11 + $0x88] sm:$0xff] }
  0xf6   :  { %736 = vmatprep.subr.bf16.mxu0 %v7306_v44  ;;  %v912_v44 = vld [vmem:[#allocation11 + $0x340] sm:$0xff]  ;;  %v829_v38 = vld [vmem:[#allocation11 + $0xa8] sm:$0xff] }
  0xf7   :  { %2411 = vmatpush1.bf16.msra.mxu1 %v6460_v43  ;;  %v6383_v40 = vcombine.high %v825_v37, %v829_v38  ;;  %v833_v43 = vld [vmem:[#allocation11 + $0xc8] sm:$0xff] }
  0xf9   :  { %737 = vmatpush1.bf16.msra.mxu0 %v7304_v45  ;;  %v916_v45 = vld [vmem:[#allocation11 + $0x360] sm:$0xff] }
  0xfa   :  { %738 = vmatprep.subr.bf16.mxu0 %v7309_v46  ;;  %v6469_v46 = vcombine.high %v912_v44, %v916_v45 }
  0xfc   :  { %2412 = vmatprep.subr.bf16.mxu1 %v6469_v46 }
  0xfd   :  { %739 = vmatpush1.bf16.msra.mxu0 %v7307_v47  ;;  %v168_v47 = vrot.slane %v163_v39, %v8427_v41 }
  0xfe   :  { %740 = vmatprep.subr.bf16.mxu0 %v7312_v48  ;;  %v172_v48 = vrot.slane %v163_v39, %v8430_v42  ;;  %v6374_v39 = vcombine.low %v817_v32, %v821_v33 }
 0x101   :  { %741 = vmatpush1.bf16.msra.mxu0 %v7310_v49  ;;  %v6468_v49 = vcombine.low %v912_v44, %v916_v45  ;;  %v837_v44 = vld [vmem:[#allocation11 + $0xe8] sm:$0xff]  ;;  %v6382_v45 = vcombine.low %v825_v37, %v829_v38 }
 0x102   :  { %751 = vmatprep.subr.bf16.mxu0 %v7315_v50  ;;  %v6391_v46 = vcombine.high %v833_v43, %v837_v44 }
 0x103   :  { %2413 = vmatpush1.bf16.msra.mxu1 %v6468_v49  ;;  %v6390_v49 = vcombine.low %v833_v43, %v837_v44 }
 0x197   :  { %v289_v50 = vpop.f32.mrb[0].mxu0 }
 0x198   :  { %v290_v51 = vadd.f32 %v289_v50, %v168_v47  ;;  %v291_v52 = vpop.f32.mrb[1].mxu0  ;;  %v841_v47 = vld [vmem:[#allocation11 + $0x108] sm:$0xff] }
 0x199   :  { %v292_v53 = vadd.f32 %v291_v52, %v172_v48  ;;  %v293_v54 = vpop.f32.mrb[2].mxu0  ;;  %v845_v48 = vld [vmem:[#allocation11 + $0x128] sm:$0xff] }
 0x19a   :  { %vm296_vm0 = vcmp.gt.f32.partialorder %v290_v51, 0.0  ;;  %v298_v55 = vmul.f32 0.2, %v290_v51  ;;  %v294_v56 = vpop.f32.mrb[3].mxu0  ;;  %v6399_v50 = vcombine.high %v841_v47, %v845_v48  ;;  %v853_v52 = vld [vmem:[#allocation11 + $0x168] sm:$0xff] }
 0x19b   :  { %vm297_vm1 = vcmp.gt.f32.partialorder %v292_v53, 0.0  ;;  %v299_v57 = vmul.f32 0.2, %v292_v53  ;;  %v861_v56 = vld [vmem:[#allocation11 + $0x1a8] sm:$0xff] }
 0x19c   :  { %v300_v58 = vsel %vm296_vm0, %v290_v51, %v298_v55  ;;  %v849_v51 = vld [vmem:[#allocation11 + $0x148] sm:$0xff] }
 0x19d   :  { %v301_v59 = vsel %vm297_vm1, %v292_v53, %v299_v57  ;;  %v8434_v62 = vpack.c.bf16 %v300_v58, %v300_v58  ;;  %v6398_v53 = vcombine.low %v841_v47, %v845_v48  ;;  %v6407_v54 = vcombine.high %v849_v51, %v853_v52  ;;  %v857_v55 = vld [vmem:[#allocation11 + $0x188] sm:$0xff] }
 0x19e   :  { %v303_v60 = vpack.c.bf16 %v301_v59, %v301_v59  ;;  %v6406_v57 = vcombine.low %v849_v51, %v853_v52  ;;  %v6415_v58 = vcombine.high %v857_v55, %v861_v56  ;;  %v920_v59 = vld [vmem:[#allocation11 + $0x380] sm:$0xff]  ;;  %v8454_v51 = vld [vmem:[#allocation10] sm:$0xf] }
 0x19f   :  { %v373_v52 = vrot.slane %v8454_v51, %v8427_v41 }
 0x1a0   :  { %742 = vmatprep.mubr.bf16.mxu0 %v303_v60 }
 0x1a1   :  { %743 = vmatmul.mubr.bf16.vlgmr.msra.gmra.mrb[4].mxu0 %v8434_v62 }
 0x1a2   :  { %752 = vmatpush1.bf16.msra.mxu0 %v7313_v61  ;;  %783 = vmatprep.mubr.bf16.mxu0 %v303_v60  ;;  %v924_v60 = vld [vmem:[#allocation11 + $0x3a0] sm:$0xff]  ;;  %v865_v61 = vld [vmem:[#allocation11 + $0x1c8] sm:$0xff] }
 0x1a3   :  { %753 = vmatprep.subr.bf16.mxu0 %v7318_v63  ;;  %v6477_v63 = vcombine.high %v920_v59, %v924_v60 }
 0x1a5   :  { %2414 = vmatprep.subr.bf16.mxu1 %v6477_v63 }
 0x1a6   :  { %754 = vmatpush1.bf16.msra.mxu0 %v7316_v0  ;;  %v6476_v0 = vcombine.low %v920_v59, %v924_v60 }
 0x1a7   :  { %755 = vmatprep.subr.bf16.mxu0 %v7321_v1  ;;  %v6414_v1 = vcombine.low %v857_v55, %v861_v56 }
 0x1a8   :  { %2415 = vmatpush1.bf16.msra.mxu1 %v6476_v0  ;;  %v948_v0 = vld [vmem:[#allocation11 + $0x460] sm:$0xff] }
 0x1aa   :  { %756 = vmatpush1.bf16.msra.mxu0 %v7319_v2 }
 0x1ab   :  { %757 = vmatprep.subr.bf16.mxu0 %v7324_v3  ;;  %v928_v3 = vld [vmem:[#allocation11 + $0x3c0] sm:$0xff] }
 0x1ae   :  { %758 = vmatpush1.bf16.msra.mxu0 %v7322_v4  ;;  %v932_v4 = vld [vmem:[#allocation11 + $0x3e0] sm:$0xff] }
 0x1af   :  { %759 = vmatprep.subr.bf16.mxu0 %v7327_v5  ;;  %v873_v5 = vld [vmem:[#allocation11 + $0x208] sm:$0xff] }
 0x1b2   :  { %760 = vmatpush1.bf16.msra.mxu0 %v7325_v6  ;;  %v877_v6 = vld [vmem:[#allocation11 + $0x228] sm:$0xff] }
 0x1b3   :  { %761 = vmatprep.subr.bf16.mxu0 %v7330_v7  ;;  %v6485_v7 = vcombine.high %v928_v3, %v932_v4 }
 0x1b5   :  { %2416 = vmatprep.subr.bf16.mxu1 %v6485_v7 }
 0x1b6   :  { %762 = vmatpush1.bf16.msra.mxu0 %v7328_v8  ;;  %v6484_v8 = vcombine.low %v928_v3, %v932_v4 }
 0x1b7   :  { %763 = vmatprep.subr.bf16.mxu0 %v7333_v9 }
 0x1b8   :  { %2417 = vmatpush1.bf16.msra.mxu1 %v6484_v8  ;;  %v952_v8 = vld [vmem:[#allocation11 + $0x480] sm:$0xff] }
 0x1ba   :  { %764 = vmatpush1.bf16.msra.mxu0 %v7331_v10  ;;  %v6431_v10 = vcombine.high %v873_v5, %v877_v6 }
 0x1bb   :  { %765 = vmatprep.subr.bf16.mxu0 %v7336_v11  ;;  %v8438_v11 = vld [vmem:[#allocation11 + $0x400] sm:$0xff] }
 0x1be   :  { %766 = vmatpush1.bf16.msra.mxu0 %v7334_v12  ;;  %v8440_v12 = vld [vmem:[#allocation11 + $0x420] sm:$0xff] }
 0x1bf   :  { %767 = vmatprep.subr.bf16.mxu0 %v7339_v13  ;;  %v8442_v13 = vld [vmem:[#allocation11 + $0x408] sm:$0xff] }
 0x1c2   :  { %768 = vmatpush1.bf16.msra.mxu0 %v7337_v14  ;;  %v881_v14 = vld [vmem:[#allocation11 + $0x248] sm:$0xff] }
 0x1c3   :  { %769 = vmatprep.subr.bf16.mxu0 %v7342_v15  ;;  %v885_v15 = vld [vmem:[#allocation11 + $0x268] sm:$0xff] }
 0x1c6   :  { %770 = vmatpush1.bf16.msra.mxu0 %v7340_v16  ;;  %v6493_v16 = vcombine.high %v8438_v11, %v8440_v12 }
 0x1c7   :  { %771 = vmatprep.subr.bf16.mxu0 %v7345_v17  ;;  %v8446_v17 = vld [vmem:[#allocation11 + $0x428] sm:$0xff] }
 0x1c8   :  { %2427 = vmatprep.subr.bf16.mxu1 %v6493_v16 }
 0x1ca   :  { %772 = vmatpush1.bf16.msra.mxu0 %v7343_v18  ;;  %v6492_v18 = vcombine.low %v8438_v11, %v8440_v12 }
 0x1cb   :  { %773 = vmatprep.subr.bf16.mxu0 %v7348_v19  ;;  %v6494_v19 = vcombine.low %v8442_v13, %v8446_v17 }
 0x1ce   :  { %774 = vmatpush1.bf16.msra.mxu0 %v7346_v20  ;;  %v6430_v20 = vcombine.low %v873_v5, %v877_v6 }
 0x1cf   :  { %775 = vmatprep.subr.bf16.mxu0 %v7351_v21  ;;  %v6439_v21 = vcombine.high %v881_v14, %v885_v15 }
 0x1d2   :  { %776 = vmatpush1.bf16.msra.mxu0 %v7349_v22  ;;  %v889_v22 = vld [vmem:[#allocation11 + $0x288] sm:$0xff] }
 0x1d3   :  { %777 = vmatprep.subr.bf16.mxu0 %v7354_v23  ;;  %v893_v23 = vld [vmem:[#allocation11 + $0x2a8] sm:$0xff] }
 0x1d4   :  { %v6446_v28 = vcombine.low %v889_v22, %v893_v23 }
 0x1d6   :  { %778 = vmatpush1.bf16.msra.mxu0 %v7352_v24  ;;  %v6438_v24 = vcombine.low %v881_v14, %v885_v15  ;;  %v957_v14 = vld [vmem:[#allocation11 + $0x4a8] sm:$0xff] }
 0x1d7   :  { %779 = vmatprep.subr.bf16.mxu0 %v7357_v25  ;;  %v6447_v25 = vcombine.high %v889_v22, %v893_v23  ;;  %v960_v22 = vld [vmem:[#allocation11 + $0x4c0] sm:$0xff] }
 0x1d8   :  { %v964_v23 = vld [vmem:[#allocation11 + $0x4e0] sm:$0xff] }
 0x1d9   :  { %v6517_v11 = vcombine.high %v960_v22, %v964_v23 }
 0x1da   :  { %780 = vmatpush1.bf16.msra.mxu0 %v7355_v26  ;;  %v897_v26 = vld [vmem:[#allocation11 + $0x2c8] sm:$0xff] }
 0x1db   :  { %781 = vmatprep.subr.bf16.mxu0 %v7360_v27  ;;  %v901_v27 = vld [vmem:[#allocation11 + $0x2e8] sm:$0xff] }
 0x1dc   :  { %v6455_v29 = vcombine.high %v897_v26, %v901_v27  ;;  %v6454_v32 = vcombine.low %v897_v26, %v901_v27 }
 0x1de   :  { %782 = vmatpush1.bf16.msra.mxu0 %v7358_v30  ;;  %v905_v30 = vld [vmem:[#allocation11 + $0x308] sm:$0xff] }
 0x1df   :  { %2468 = vmatprep.subr.bf16.mxu0 %v6367_v31  ;;  %v909_v31 = vld [vmem:[#allocation11 + $0x328] sm:$0xff] }
 0x1e0   :  { %v6463_v33 = vcombine.high %v905_v30, %v909_v31  ;;  %v6462_v37 = vcombine.low %v905_v30, %v909_v31 }
 0x1e1   :  { %784 = vmatmul.mubr.bf16.vlgmr.msra.gmra.mrb[8].mxu0 %v8434_v62  ;;  %v869_v62 = vld [vmem:[#allocation11 + $0x1e8] sm:$0xff] }
 0x1e2   :  { %2469 = vmatpush1.bf16.msra.mxu0 %v6366_v34  ;;  %v6423_v2 = vcombine.high %v865_v61, %v869_v62  ;;  %v6422_v9 = vcombine.low %v865_v61, %v869_v62  ;;  %v913_v34 = vld [vmem:[#allocation11 + $0x348] sm:$0xff]  ;;  %v944_v62 = vld [vmem:[#allocation11 + $0x440] sm:$0xff] }
 0x1e3   :  { %2470 = vmatprep.subr.bf16.mxu0 %v6375_v36  ;;  %v917_v36 = vld [vmem:[#allocation11 + $0x368] sm:$0xff]  ;;  %v6501_v6 = vcombine.high %v944_v62, %v948_v0  ;;  %v6500_v15 = vcombine.low %v944_v62, %v948_v0 }
 0x1e4   :  { %v6471_v38 = vcombine.high %v913_v34, %v917_v36  ;;  %v6470_v43 = vcombine.low %v913_v34, %v917_v36  ;;  %v977_v34 = vld [vmem:[#allocation11 + $0x548] sm:$0xff] }
 0x1e5   :  { %v981_v36 = vld [vmem:[#allocation11 + $0x568] sm:$0xff] }
 0x1e6   :  { %2471 = vmatpush1.bf16.msra.mxu0 %v6374_v39  ;;  %v921_v39 = vld [vmem:[#allocation11 + $0x388] sm:$0xff] }
 0x1e7   :  { %2472 = vmatprep.subr.bf16.mxu0 %v6383_v40  ;;  %v925_v40 = vld [vmem:[#allocation11 + $0x3a8] sm:$0xff] }
 0x1e8   :  { %v6479_v44 = vcombine.high %v921_v39, %v925_v40  ;;  %v6478_v47 = vcombine.low %v921_v39, %v925_v40  ;;  %v6535_v40 = vcombine.high %v977_v34, %v981_v36  ;;  %v1001_v62 = vld [vmem:[#allocation11 + $0x608] sm:$0xff] }
 0x1ea   :  { %2473 = vmatpush1.bf16.msra.mxu0 %v6382_v45  ;;  %v929_v45 = vld [vmem:[#allocation11 + $0x3c8] sm:$0xff] }
 0x1eb   :  { %2474 = vmatprep.subr.bf16.mxu0 %v6391_v46  ;;  %v933_v46 = vld [vmem:[#allocation11 + $0x3e8] sm:$0xff] }
 0x1ec   :  { %v6487_v48 = vcombine.high %v929_v45, %v933_v46 }
 0x1ee   :  { %2475 = vmatpush1.bf16.msra.mxu0 %v6390_v49  ;;  %v6486_v49 = vcombine.low %v929_v45, %v933_v46  ;;  %v985_v45 = vld [vmem:[#allocation11 + $0x588] sm:$0xff] }
 0x1ef   :  { %2476 = vmatprep.subr.bf16.mxu0 %v6399_v50  ;;  %v6495_v50 = vcombine.high %v8442_v13, %v8446_v17  ;;  %v968_v13 = vld [vmem:[#allocation11 + $0x500] sm:$0xff]  ;;  %v989_v46 = vld [vmem:[#allocation11 + $0x5a8] sm:$0xff] }
 0x1f0   :  { %v972_v17 = vld [vmem:[#allocation11 + $0x520] sm:$0xff] }
 0x1f1   :  { %v6525_v30 = vcombine.high %v968_v13, %v972_v17 }
 0x1f2   :  { %2477 = vmatpush1.bf16.msra.mxu0 %v6398_v53  ;;  %v377_v53 = vrot.slane %v8454_v51, %v8430_v42 }
 0x1f3   :  { %2478 = vmatprep.subr.bf16.mxu0 %v6407_v54 }
 0x1f6   :  { %2479 = vmatpush1.bf16.msra.mxu0 %v6406_v57 }
 0x1f7   :  { %2480 = vmatprep.subr.bf16.mxu0 %v6415_v58 }
 0x1fa   :  { %2481 = vmatpush1.bf16.msra.mxu0 %v6414_v1  ;;  %v945_v1 = vld [vmem:[#allocation11 + $0x448] sm:$0xff] }
 0x1fb   :  { %2482 = vmatprep.subr.bf16.mxu0 %v6423_v2  ;;  %v949_v2 = vld [vmem:[#allocation11 + $0x468] sm:$0xff] }
 0x1fc   :  { %v6503_v7 = vcombine.high %v945_v1, %v949_v2  ;;  %v6502_v16 = vcombine.low %v945_v1, %v949_v2 }
 0x1fe   :  { %2483 = vmatpush1.bf16.msra.mxu0 %v6422_v9  ;;  %v956_v9 = vld [vmem:[#allocation11 + $0x4a0] sm:$0xff] }
 0x1ff   :  { %2484 = vmatprep.subr.bf16.mxu0 %v6431_v10  ;;  %v953_v10 = vld [vmem:[#allocation11 + $0x488] sm:$0xff]  ;;  %v6508_v26 = vcombine.low %v952_v8, %v956_v9 }
 0x200   :  { %v6510_v27 = vcombine.low %v953_v10, %v957_v14 }
 0x202   :  { %2485 = vmatpush1.bf16.msra.mxu0 %v6430_v20  ;;  %v6509_v20 = vcombine.high %v952_v8, %v956_v9  ;;  %v1009_v8 = vld [vmem:[#allocation11 + $0x648] sm:$0xff] }
 0x203   :  { %2486 = vmatprep.subr.bf16.mxu0 %v6439_v21  ;;  %v6511_v21 = vcombine.high %v953_v10, %v957_v14  ;;  %v1013_v9 = vld [vmem:[#allocation11 + $0x668] sm:$0xff] }
 0x206   :  { %2487 = vmatpush1.bf16.msra.mxu0 %v6438_v24  ;;  %v961_v24 = vld [vmem:[#allocation11 + $0x4c8] sm:$0xff] }
 0x207   :  { %2488 = vmatprep.subr.bf16.mxu0 %v6447_v25  ;;  %v965_v25 = vld [vmem:[#allocation11 + $0x4e8] sm:$0xff] }
 0x208   :  { %v6519_v12 = vcombine.high %v961_v24, %v965_v25 }
 0x20a   :  { %2489 = vmatpush1.bf16.msra.mxu0 %v6446_v28  ;;  %v6516_v28 = vcombine.low %v960_v22, %v964_v23  ;;  %v1017_v22 = vld [vmem:[#allocation11 + $0x688] sm:$0xff] }
 0x20b   :  { %2490 = vmatprep.subr.bf16.mxu0 %v6455_v29  ;;  %v6518_v29 = vcombine.low %v961_v24, %v965_v25  ;;  %v1021_v23 = vld [vmem:[#allocation11 + $0x6a8] sm:$0xff]  ;;  %v6566_v25 = vcombine.low %v1009_v8, %v1013_v9 }
 0x20e   :  { %2491 = vmatpush1.bf16.msra.mxu0 %v6454_v32  ;;  %v976_v32 = vld [vmem:[#allocation11 + $0x540] sm:$0xff] }
 0x20f   :  { %2492 = vmatprep.subr.bf16.mxu0 %v6463_v33  ;;  %v980_v33 = vld [vmem:[#allocation11 + $0x560] sm:$0xff] }
 0x210   :  { %v6533_v39 = vcombine.high %v976_v32, %v980_v33 }
 0x212   :  { %2493 = vmatpush1.bf16.msra.mxu0 %v6462_v37  ;;  %v6524_v37 = vcombine.low %v968_v13, %v972_v17  ;;  %v1025_v13 = vld [vmem:[#allocation11 + $0x6c8] sm:$0xff] }
 0x213   :  { %2494 = vmatprep.subr.bf16.mxu0 %v6471_v38  ;;  %v1029_v17 = vld [vmem:[#allocation11 + $0x6e8] sm:$0xff] }
 0x216   :  { %2495 = vmatpush1.bf16.msra.mxu0 %v6470_v43  ;;  %v984_v43 = vld [vmem:[#allocation11 + $0x580] sm:$0xff] }
 0x217   :  { %2496 = vmatprep.subr.bf16.mxu0 %v6479_v44  ;;  %v988_v44 = vld [vmem:[#allocation11 + $0x5a0] sm:$0xff] }
 0x21a   :  { %2497 = vmatpush1.bf16.msra.mxu0 %v6478_v47  ;;  %v6532_v47 = vcombine.low %v976_v32, %v980_v33  ;;  %v1033_v32 = vld [vmem:[#allocation11 + $0x708] sm:$0xff] }
 0x21b   :  { %2498 = vmatprep.subr.bf16.mxu0 %v6487_v48  ;;  %v6534_v48 = vcombine.low %v977_v34, %v981_v36  ;;  %v1037_v33 = vld [vmem:[#allocation11 + $0x728] sm:$0xff]  ;;  %v6582_v36 = vcombine.low %v1025_v13, %v1029_v17 }
 0x21e   :  { %2499 = vmatpush1.bf16.msra.mxu0 %v6486_v49  ;;  %v6541_v49 = vcombine.high %v984_v43, %v988_v44 }
 0x21f   :  { %2509 = vmatprep.subr.bf16.mxu0 %v6495_v50  ;;  %v6543_v50 = vcombine.high %v985_v45, %v989_v46 }
 0x274   :  { %v744_v54 = vpop.f32.mrb[4].mxu0 }
 0x275   :  { %v745_v55 = vadd.f32 %v744_v54, %v373_v52  ;;  %v746_v56 = vpop.f32.mrb[5].mxu0  ;;  %v992_v52 = vld [vmem:[#allocation11 + $0x5c0] sm:$0xff]  ;;  %v993_v54 = vld [vmem:[#allocation11 + $0x5c8] sm:$0xff] }
 0x276   :  { %v747_v57 = vadd.f32 %v746_v56, %v377_v53  ;;  %v748_v58 = vpop.f32.mrb[6].mxu0  ;;  %v996_v53 = vld [vmem:[#allocation11 + $0x5e0] sm:$0xff]  ;;  %v6540_v56 = vcombine.low %v984_v43, %v988_v44  ;;  %v1041_v43 = vld [vmem:[#allocation11 + $0x748] sm:$0xff] }
 0x277   :  { %vm792_vm2 = vcmp.gt.f32.partialorder %v745_v55, 0.0  ;;  %v796_v59 = vmul.f32 0.2, %v745_v55  ;;  %v749_v60 = vpop.f32.mrb[7].mxu0  ;;  %v6549_v58 = vcombine.high %v992_v52, %v996_v53  ;;  %v6548_v0 = vcombine.low %v992_v52, %v996_v53  ;;  %v1045_v44 = vld [vmem:[#allocation11 + $0x768] sm:$0xff]  ;;  %v1052_v52 = vld [vmem:[#allocation11 + $0x7a0] sm:$0xff] }
 0x278   :  { %vm793_vm3 = vcmp.gt.f32.partialorder %v747_v57, 0.0  ;;  %v797_v61 = vmul.f32 0.2, %v747_v57  ;;  %v1000_v60 = vld [vmem:[#allocation11 + $0x600] sm:$0xff]  ;;  %v1049_v53 = vld [vmem:[#allocation11 + $0x788] sm:$0xff] }
 0x279   :  { %v800_v63 = vsel %vm792_vm2, %v745_v55, %v796_v59  ;;  %v997_v55 = vld [vmem:[#allocation11 + $0x5e8] sm:$0xff] }
 0x27a   :  { %v801_v3 = vsel %vm793_vm3, %v747_v57, %v797_v61  ;;  %v8462_v5 = vpack.c.bf16 %v800_v63, %v800_v63  ;;  %v6542_v57 = vcombine.low %v985_v45, %v989_v46  ;;  %v6551_v59 = vcombine.high %v993_v54, %v997_v55  ;;  %v1004_v61 = vld [vmem:[#allocation11 + $0x620] sm:$0xff]  ;;  %v1005_v63 = vld [vmem:[#allocation11 + $0x628] sm:$0xff] }
 0x27b   :  { %v8460_v4 = vpack.c.bf16 %v801_v3, %v801_v3  ;;  %v6550_v1 = vcombine.low %v993_v54, %v997_v55  ;;  %v6557_v2 = vcombine.high %v1000_v60, %v1004_v61  ;;  %v6559_v3 = vcombine.high %v1001_v62, %v1005_v63  ;;  %v1053_v54 = vld [vmem:[#allocation11 + $0x7a8] sm:$0xff] }
 0x27c   :  { %v6556_v10 = vcombine.low %v1000_v60, %v1004_v61  ;;  %v6558_v14 = vcombine.low %v1001_v62, %v1005_v63  ;;  %v6590_v46 = vcombine.low %v1033_v32, %v1037_v33  ;;  %v8478_v55 = vsub.s32 3, %v8424_v35  ;;  %v1056_v60 = vld [vmem:[#allocation11 + $0x7c0] sm:$0xff]  ;;  %v1057_v63 = vld [vmem:[#allocation11 + $0x7c8] sm:$0xff] }
 0x27d   :  { %2418 = vmatprep.mubr.bf16.mxu1 %v8460_v4  ;;  %2500 = vmatprep.mubr.bf16.mxu0 %v8460_v4  ;;  %v1060_v62 = vld [vmem:[#allocation11 + $0x7e0] sm:$0xff] }
 0x27e   :  { %2419 = vmatmul.mubr.bf16.vlgmr.msra.gmra.mrb[0].mxu1 %v8462_v5  ;;  %2501 = vmatmul.mubr.bf16.vlgmr.msra.gmra.mrb[12].mxu0 %v8462_v5 }
 0x27f   :  { %2428 = vmatpush1.bf16.msra.mxu1 %v6492_v18  ;;  %2510 = vmatpush1.bf16.msra.mxu0 %v6494_v19  ;;  %v969_v18 = vld [vmem:[#allocation11 + $0x508] sm:$0xff] }
 0x280   :  { %2429 = vmatprep.subr.bf16.mxu1 %v6501_v6  ;;  %2511 = vmatprep.subr.bf16.mxu0 %v6503_v7  ;;  %v973_v19 = vld [vmem:[#allocation11 + $0x528] sm:$0xff]  ;;  %v1008_v6 = vld [vmem:[#allocation11 + $0x640] sm:$0xff] }
 0x281   :  { %v6527_v31 = vcombine.high %v969_v18, %v973_v19  ;;  %v6526_v38 = vcombine.low %v969_v18, %v973_v19  ;;  %v1012_v7 = vld [vmem:[#allocation11 + $0x660] sm:$0xff]  ;;  %v6574_v19 = vcombine.low %v1017_v22, %v1021_v23 }
 0x282   :  { %v6564_v24 = vcombine.low %v1008_v6, %v1012_v7 }
 0x283   :  { %2430 = vmatpush1.bf16.msra.mxu1 %v6500_v15  ;;  %2512 = vmatpush1.bf16.msra.mxu0 %v6502_v16  ;;  %v6565_v15 = vcombine.high %v1008_v6, %v1012_v7  ;;  %v6567_v16 = vcombine.high %v1009_v8, %v1013_v9  ;;  %v6613_v7 = vcombine.high %v1056_v60, %v1060_v62  ;;  %v810_v9 = vld [vmem:[#allocation11 + $0x10] sm:$0xff] }
 0x284   :  { %2431 = vmatprep.subr.bf16.mxu1 %v6509_v20  ;;  %2513 = vmatprep.subr.bf16.mxu0 %v6511_v21  ;;  %v1016_v20 = vld [vmem:[#allocation11 + $0x680] sm:$0xff] }
 0x285   :  { %v1020_v21 = vld [vmem:[#allocation11 + $0x6a0] sm:$0xff] }
 0x286   :  { %v6572_v18 = vcombine.low %v1016_v20, %v1020_v21 }
 0x287   :  { %2432 = vmatpush1.bf16.msra.mxu1 %v6508_v26  ;;  %2514 = vmatpush1.bf16.msra.mxu0 %v6510_v27  ;;  %v6573_v26 = vcombine.high %v1016_v20, %v1020_v21  ;;  %v6575_v27 = vcombine.high %v1017_v22, %v1021_v23  ;;  %v815_v20 = vld [vmem:[#allocation11 + $0x38] sm:$0xff] }
 0x288   :  { %2433 = vmatprep.subr.bf16.mxu1 %v6517_v11  ;;  %2515 = vmatprep.subr.bf16.mxu0 %v6519_v12  ;;  %v1024_v11 = vld [vmem:[#allocation11 + $0x6c0] sm:$0xff] }
 0x289   :  { %v1028_v12 = vld [vmem:[#allocation11 + $0x6e0] sm:$0xff] }
 0x28a   :  { %v6580_v34 = vcombine.low %v1024_v11, %v1028_v12 }
 0x28b   :  { %2434 = vmatpush1.bf16.msra.mxu1 %v6516_v28  ;;  %2516 = vmatpush1.bf16.msra.mxu0 %v6518_v29  ;;  %v6581_v28 = vcombine.high %v1024_v11, %v1028_v12  ;;  %v6583_v29 = vcombine.high %v1025_v13, %v1029_v17  ;;  %v818_v13 = vld [vmem:[#allocation11 + $0x50] sm:$0xff] }
 0x28c   :  { %2435 = vmatprep.subr.bf16.mxu1 %v6525_v30  ;;  %2517 = vmatprep.subr.bf16.mxu0 %v6527_v31  ;;  %v1032_v30 = vld [vmem:[#allocation11 + $0x700] sm:$0xff] }
 0x28d   :  { %v1036_v31 = vld [vmem:[#allocation11 + $0x720] sm:$0xff] }
 0x28e   :  { %v6588_v45 = vcombine.low %v1032_v30, %v1036_v31 }
 0x28f   :  { %2436 = vmatpush1.bf16.msra.mxu1 %v6524_v37  ;;  %2518 = vmatpush1.bf16.msra.mxu0 %v6526_v38  ;;  %v6589_v37 = vcombine.high %v1032_v30, %v1036_v31  ;;  %v6591_v38 = vcombine.high %v1033_v32, %v1037_v33 }
 0x290   :  { %2437 = vmatprep.subr.bf16.mxu1 %v6533_v39  ;;  %2519 = vmatprep.subr.bf16.mxu0 %v6535_v40  ;;  %v1040_v39 = vld [vmem:[#allocation11 + $0x740] sm:$0xff] }
 0x291   :  { %v1044_v40 = vld [vmem:[#allocation11 + $0x760] sm:$0xff] }
 0x293   :  { %2438 = vmatpush1.bf16.msra.mxu1 %v6532_v47  ;;  %2520 = vmatpush1.bf16.msra.mxu0 %v6534_v48  ;;  %v6597_v47 = vcombine.high %v1040_v39, %v1044_v40  ;;  %v6599_v48 = vcombine.high %v1041_v43, %v1045_v44 }
 0x294   :  { %2439 = vmatprep.subr.bf16.mxu1 %v6541_v49  ;;  %2521 = vmatprep.subr.bf16.mxu0 %v6543_v50  ;;  %v1048_v49 = vld [vmem:[#allocation11 + $0x780] sm:$0xff]  ;;  %v8475_v50 = vsub.s32 2, %v8424_v35 }
 0x296   :  { %v381_v61 = vrot.slane %v8454_v51, %v8475_v50 }
 0x297   :  { %2440 = vmatpush1.bf16.msra.mxu1 %v6540_v56  ;;  %2522 = vmatpush1.bf16.msra.mxu0 %v6542_v57  ;;  %v6596_v56 = vcombine.low %v1040_v39, %v1044_v40  ;;  %v6598_v57 = vcombine.low %v1041_v43, %v1045_v44  ;;  %v831_v39 = vld [vmem:[#allocation11 + $0xb8] sm:$0xff] }
 0x298   :  { %2441 = vmatprep.subr.bf16.mxu1 %v6549_v58  ;;  %2523 = vmatprep.subr.bf16.mxu0 %v6551_v59  ;;  %v6605_v58 = vcombine.high %v1048_v49, %v1052_v52  ;;  %v6607_v59 = vcombine.high %v1049_v53, %v1053_v54 }
 0x29b   :  { %2442 = vmatpush1.bf16.msra.mxu1 %v6548_v0  ;;  %2524 = vmatpush1.bf16.msra.mxu0 %v6550_v1  ;;  %v1061_v0 = vld [vmem:[#allocation11 + $0x7e8] sm:$0xff]  ;;  %v385_v1 = vrot.slane %v8454_v51, %v8478_v55 }
 0x29c   :  { %2443 = vmatprep.subr.bf16.mxu1 %v6557_v2  ;;  %2525 = vmatprep.subr.bf16.mxu0 %v6559_v3  ;;  %v6604_v2 = vcombine.low %v1048_v49, %v1052_v52  ;;  %v6606_v3 = vcombine.low %v1049_v53, %v1053_v54  ;;  %v6615_v8 = vcombine.high %v1057_v63, %v1061_v0  ;;  %v839_v49 = vld [vmem:[#allocation11 + $0xf8] sm:$0xff] }
 0x29f   :  { %2444 = vmatpush1.bf16.msra.mxu1 %v6556_v10  ;;  %2526 = vmatpush1.bf16.msra.mxu0 %v6558_v14 }
 0x2a0   :  { %2445 = vmatprep.subr.bf16.mxu1 %v6565_v15  ;;  %2527 = vmatprep.subr.bf16.mxu0 %v6567_v16  ;;  %v814_v15 = vld [vmem:[#allocation11 + $0x30] sm:$0xff]  ;;  %v811_v16 = vld [vmem:[#allocation11 + $0x18] sm:$0xff] }
 0x2a1   :  { %v6371_v11 = vcombine.high %v811_v16, %v815_v20  ;;  %v6368_v30 = vcombine.low %v810_v9, %v814_v15  ;;  %v6370_v32 = vcombine.low %v811_v16, %v815_v20  ;;  %v863_v16 = vld [vmem:[#allocation11 + $0x1b8] sm:$0xff] }
 0x2a3   :  { %2446 = vmatpush1.bf16.msra.mxu1 %v6564_v24  ;;  %2528 = vmatpush1.bf16.msra.mxu0 %v6566_v25  ;;  %v6612_v24 = vcombine.low %v1056_v60, %v1060_v62  ;;  %v6614_v25 = vcombine.low %v1057_v63, %v1061_v0  ;;  %v850_v0 = vld [vmem:[#allocation11 + $0x150] sm:$0xff] }
 0x2a4   :  { %2447 = vmatprep.subr.bf16.mxu1 %v6573_v26  ;;  %2529 = vmatprep.subr.bf16.mxu0 %v6575_v27  ;;  %v6369_v27 = vcombine.high %v810_v9, %v814_v15  ;;  %v859_v15 = vld [vmem:[#allocation11 + $0x198] sm:$0xff] }
 0x2a7   :  { %2448 = vmatpush1.bf16.msra.mxu1 %v6572_v18  ;;  %2530 = vmatpush1.bf16.msra.mxu0 %v6574_v19  ;;  %v822_v18 = vld [vmem:[#allocation11 + $0x70] sm:$0xff]  ;;  %v819_v19 = vld [vmem:[#allocation11 + $0x58] sm:$0xff] }
 0x2a8   :  { %2449 = vmatprep.subr.bf16.mxu1 %v6581_v28  ;;  %2531 = vmatprep.subr.bf16.mxu0 %v6583_v29  ;;  %v823_v28 = vld [vmem:[#allocation11 + $0x78] sm:$0xff]  ;;  %v6377_v33 = vcombine.high %v818_v13, %v822_v18  ;;  %v6376_v40 = vcombine.low %v818_v13, %v822_v18  ;;  %v878_v18 = vld [vmem:[#allocation11 + $0x230] sm:$0xff] }
 0x2a9   :  { %v6378_v43 = vcombine.low %v819_v19, %v823_v28 }
 0x2ab   :  { %2450 = vmatpush1.bf16.msra.mxu1 %v6580_v34  ;;  %2532 = vmatpush1.bf16.msra.mxu0 %v6582_v36  ;;  %v6379_v34 = vcombine.high %v819_v19, %v823_v28  ;;  %v826_v36 = vld [vmem:[#allocation11 + $0x90] sm:$0xff]  ;;  %v875_v19 = vld [vmem:[#allocation11 + $0x218] sm:$0xff] }
 0x2ac   :  { %2451 = vmatprep.subr.bf16.mxu1 %v6589_v37  ;;  %2533 = vmatprep.subr.bf16.mxu0 %v6591_v38  ;;  %v830_v37 = vld [vmem:[#allocation11 + $0xb0] sm:$0xff]  ;;  %v827_v38 = vld [vmem:[#allocation11 + $0x98] sm:$0xff] }
 0x2ad   :  { %v6385_v44 = vcombine.high %v826_v36, %v830_v37  ;;  %v6384_v52 = vcombine.low %v826_v36, %v830_v37  ;;  %v6386_v53 = vcombine.low %v827_v38, %v831_v39  ;;  %v879_v28 = vld [vmem:[#allocation11 + $0x238] sm:$0xff]  ;;  %v882_v36 = vld [vmem:[#allocation11 + $0x250] sm:$0xff] }
 0x2ae   :  { %v886_v37 = vld [vmem:[#allocation11 + $0x270] sm:$0xff] }
 0x2af   :  { %2452 = vmatpush1.bf16.msra.mxu1 %v6588_v45  ;;  %2534 = vmatpush1.bf16.msra.mxu0 %v6590_v46  ;;  %v6387_v45 = vcombine.high %v827_v38, %v831_v39  ;;  %v834_v46 = vld [vmem:[#allocation11 + $0xd0] sm:$0xff]  ;;  %v883_v38 = vld [vmem:[#allocation11 + $0x258] sm:$0xff] }
 0x2b0   :  { %2453 = vmatprep.subr.bf16.mxu1 %v6597_v47  ;;  %2535 = vmatprep.subr.bf16.mxu0 %v6599_v48  ;;  %v838_v47 = vld [vmem:[#allocation11 + $0xf0] sm:$0xff]  ;;  %v835_v48 = vld [vmem:[#allocation11 + $0xd8] sm:$0xff] }
 0x2b1   :  { %v6393_v54 = vcombine.high %v834_v46, %v838_v47  ;;  %v6392_v60 = vcombine.low %v834_v46, %v838_v47  ;;  %v887_v39 = vld [vmem:[#allocation11 + $0x278] sm:$0xff]  ;;  %v890_v46 = vld [vmem:[#allocation11 + $0x290] sm:$0xff] }
 0x2b2   :  { %v894_v47 = vld [vmem:[#allocation11 + $0x2b0] sm:$0xff] }
 0x2b3   :  { %2454 = vmatpush1.bf16.msra.mxu1 %v6596_v56  ;;  %2536 = vmatpush1.bf16.msra.mxu0 %v6598_v57  ;;  %v6395_v56 = vcombine.high %v835_v48, %v839_v49  ;;  %v842_v57 = vld [vmem:[#allocation11 + $0x110] sm:$0xff] }
 0x2b4   :  { %v785_v6 = vpop.f32.mrb[8].mxu0  ;;  %2455 = vmatprep.subr.bf16.mxu1 %v6605_v58  ;;  %2537 = vmatprep.subr.bf16.mxu0 %v6607_v59  ;;  %v846_v58 = vld [vmem:[#allocation11 + $0x130] sm:$0xff]  ;;  %v847_v59 = vld [vmem:[#allocation11 + $0x138] sm:$0xff] }
 0x2b5   :  { %v786_v10 = vadd.f32 %v785_v6, %v381_v61  ;;  %v787_v14 = vpop.f32.mrb[9].mxu0  ;;  %v6394_v61 = vcombine.low %v835_v48, %v839_v49  ;;  %v6401_v62 = vcombine.high %v842_v57, %v846_v58  ;;  %v6400_v6 = vcombine.low %v842_v57, %v846_v58  ;;  %v891_v48 = vld [vmem:[#allocation11 + $0x298] sm:$0xff]  ;;  %v898_v57 = vld [vmem:[#allocation11 + $0x2d0] sm:$0xff] }
 0x2b6   :  { %v788_v21 = vadd.f32 %v787_v14, %v385_v1  ;;  %v789_v22 = vpop.f32.mrb[10].mxu0  ;;  %v854_v1 = vld [vmem:[#allocation11 + $0x170] sm:$0xff]  ;;  %v895_v49 = vld [vmem:[#allocation11 + $0x2b8] sm:$0xff] }
 0x2b7   :  { %vm794_vm4 = vcmp.gt.f32.partialorder %v786_v10, 0.0  ;;  %v798_v23 = vmul.f32 0.2, %v786_v10  ;;  %v790_v51 = vpop.f32.mrb[11].mxu0  ;;  %2456 = vmatpush1.bf16.msra.mxu1 %v6604_v2  ;;  %2538 = vmatpush1.bf16.msra.mxu0 %v6606_v3  ;;  %v851_v2 = vld [vmem:[#allocation11 + $0x158] sm:$0xff]  ;;  %v862_v14 = vld [vmem:[#allocation11 + $0x1b0] sm:$0xff]  ;;  %v6408_v20 = vcombine.low %v850_v0, %v854_v1 }
 0x2b8   :  { %vm795_vm5 = vcmp.gt.f32.partialorder %v788_v21, 0.0  ;;  %v799_v26 = vmul.f32 0.2, %v788_v21  ;;  %2457 = vmatprep.subr.bf16.mxu1 %v6613_v7  ;;  %2539 = vmatprep.subr.bf16.mxu0 %v6615_v8  ;;  %v855_v3 = vld [vmem:[#allocation11 + $0x178] sm:$0xff]  ;;  %v6409_v8 = vcombine.high %v850_v0, %v854_v1  ;;  %v866_v51 = vld [vmem:[#allocation11 + $0x1d0] sm:$0xff] }
 0x2b9   :  { %v802_v12 = vsel %vm794_vm4, %v786_v10, %v798_v23  ;;  %v6411_v9 = vcombine.high %v851_v2, %v855_v3  ;;  %v858_v10 = vld [vmem:[#allocation11 + $0x190] sm:$0xff]  ;;  %v6419_v23 = vcombine.high %v859_v15, %v863_v16 }
 0x2ba   :  { %v803_v17 = vsel %vm795_vm5, %v788_v21, %v799_v26  ;;  %v8486_v31 = vpack.c.bf16 %v802_v12, %v802_v12  ;;  %v6410_v21 = vcombine.low %v851_v2, %v855_v3  ;;  %v6417_v22 = vcombine.high %v858_v10, %v862_v14  ;;  %v871_v26 = vld [vmem:[#allocation11 + $0x1f8] sm:$0xff]  ;;  %v902_v58 = vld [vmem:[#allocation11 + $0x2f0] sm:$0xff] }
 0x2bb   :  { %v8484_v29 = vpack.c.bf16 %v803_v17, %v803_v17  ;;  %2458 = vmatpush1.bf16.msra.mxu1 %v6612_v24  ;;  %2540 = vmatpush1.bf16.msra.mxu0 %v6614_v25  ;;  %v870_v24 = vld [vmem:[#allocation11 + $0x1f0] sm:$0xff]  ;;  %v867_v25 = vld [vmem:[#allocation11 + $0x1d8] sm:$0xff] }
 0x2bc   :  { %2550 = vmatprep.subr.bf16.mxu1 %v6369_v27  ;;  %2632 = vmatprep.subr.bf16.mxu0 %v6371_v11  ;;  %v6416_v27 = vcombine.low %v858_v10, %v862_v14  ;;  %v6418_v11 = vcombine.low %v859_v15, %v863_v16  ;;  %v6425_v12 = vcombine.high %v866_v51, %v870_v24  ;;  %v874_v17 = vld [vmem:[#allocation11 + $0x210] sm:$0xff]  ;;  %v907_v2 = vld [vmem:[#allocation11 + $0x318] sm:$0xff] }
 0x2bd   :  { %2459 = vmatprep.mubr.bf16.mxu1 %v8484_v29  ;;  %2541 = vmatprep.mubr.bf16.mxu0 %v8484_v29  ;;  %v6427_v13 = vcombine.high %v867_v25, %v871_v26  ;;  %v906_v0 = vld [vmem:[#allocation11 + $0x310] sm:$0xff]  ;;  %v911_v3 = vld [vmem:[#allocation11 + $0x338] sm:$0xff] }
 0x2be   :  { %2460 = vmatmul.mubr.bf16.vlgmr.msra.gmra.mrb[0].mxu1 %v8486_v31  ;;  %2542 = vmatmul.mubr.bf16.vlgmr.msra.gmra.mrb[12].mxu0 %v8486_v31  ;;  %v910_v1 = vld [vmem:[#allocation11 + $0x330] sm:$0xff]  ;;  %v915_v15 = vld [vmem:[#allocation11 + $0x358] sm:$0xff] }
 0x2bf   :  { %2551 = vmatpush1.bf16.msra.mxu1 %v6368_v30  ;;  %2582 = vmatprep.mubr.bf16.mxu1 %v8460_v4  ;;  %v6424_v30 = vcombine.low %v866_v51, %v870_v24  ;;  %v914_v10 = vld [vmem:[#allocation11 + $0x350] sm:$0xff]  ;;  %v919_v16 = vld [vmem:[#allocation11 + $0x378] sm:$0xff] }
 0x2c0   :  { %2633 = vmatpush1.bf16.msra.mxu0 %v6370_v32  ;;  %2664 = vmatprep.mubr.bf16.mxu0 %v8460_v4  ;;  %v843_v4 = vld [vmem:[#allocation11 + $0x118] sm:$0xff]  ;;  %v6426_v32 = vcombine.low %v867_v25, %v871_v26  ;;  %v918_v14 = vld [vmem:[#allocation11 + $0x370] sm:$0xff] }
 0x2c1   :  { %2552 = vmatprep.subr.bf16.mxu1 %v6377_v33  ;;  %2634 = vmatprep.subr.bf16.mxu0 %v6379_v34  ;;  %v6403_v63 = vcombine.high %v843_v4, %v847_v59  ;;  %v6402_v7 = vcombine.low %v843_v4, %v847_v59  ;;  %v6433_v33 = vcombine.high %v874_v17, %v878_v18  ;;  %v899_v4 = vld [vmem:[#allocation11 + $0x2d8] sm:$0xff]  ;;  %v922_v51 = vld [vmem:[#allocation11 + $0x390] sm:$0xff] }
 0x2c2   :  { %v6435_v34 = vcombine.high %v875_v19, %v879_v28  ;;  %v903_v59 = vld [vmem:[#allocation11 + $0x2f8] sm:$0xff]  ;;  %v926_v24 = vld [vmem:[#allocation11 + $0x3b0] sm:$0xff] }
 0x2c3   :  { %2553 = vmatpush1.bf16.msra.mxu1 %v6376_v40  ;;  %v6432_v40 = vcombine.low %v874_v17, %v878_v18  ;;  %v923_v25 = vld [vmem:[#allocation11 + $0x398] sm:$0xff]  ;;  %v930_v17 = vld [vmem:[#allocation11 + $0x3d0] sm:$0xff] }
 0x2c4   :  { %2635 = vmatpush1.bf16.msra.mxu0 %v6378_v43  ;;  %2554 = vmatprep.subr.bf16.mxu1 %v6385_v44  ;;  %v6434_v43 = vcombine.low %v875_v19, %v879_v28  ;;  %v6441_v44 = vcombine.high %v882_v36, %v886_v37  ;;  %v927_v26 = vld [vmem:[#allocation11 + $0x3b8] sm:$0xff]  ;;  %v934_v18 = vld [vmem:[#allocation11 + $0x3f0] sm:$0xff] }
 0x2c5   :  { %2636 = vmatprep.subr.bf16.mxu0 %v6387_v45  ;;  %v6443_v45 = vcombine.high %v883_v38, %v887_v39  ;;  %v931_v19 = vld [vmem:[#allocation11 + $0x3d8] sm:$0xff] }
 0x2c6   :  { %v935_v28 = vld [vmem:[#allocation11 + $0x3f8] sm:$0xff] }
 0x2c7   :  { %2555 = vmatpush1.bf16.msra.mxu1 %v6384_v52  ;;  %v6440_v52 = vcombine.low %v882_v36, %v886_v37  ;;  %v938_v36 = vld [vmem:[#allocation11 + $0x410] sm:$0xff] }
 0x2c8   :  { %2637 = vmatpush1.bf16.msra.mxu0 %v6386_v53  ;;  %2556 = vmatprep.subr.bf16.mxu1 %v6393_v54  ;;  %v6442_v53 = vcombine.low %v883_v38, %v887_v39  ;;  %v6449_v54 = vcombine.high %v890_v46, %v894_v47  ;;  %v942_v37 = vld [vmem:[#allocation11 + $0x430] sm:$0xff]  ;;  %v939_v38 = vld [vmem:[#allocation11 + $0x418] sm:$0xff] }
 0x2c9   :  { %2638 = vmatprep.subr.bf16.mxu0 %v6395_v56  ;;  %v6451_v56 = vcombine.high %v891_v48, %v895_v49  ;;  %v943_v39 = vld [vmem:[#allocation11 + $0x438] sm:$0xff] }
 0x2cb   :  { %2557 = vmatpush1.bf16.msra.mxu1 %v6392_v60  ;;  %v6448_v60 = vcombine.low %v890_v46, %v894_v47  ;;  %v946_v46 = vld [vmem:[#allocation11 + $0x450] sm:$0xff] }
 0x2cc   :  { %2639 = vmatpush1.bf16.msra.mxu0 %v6394_v61  ;;  %2558 = vmatprep.subr.bf16.mxu1 %v6401_v62  ;;  %v6450_v61 = vcombine.low %v891_v48, %v895_v49  ;;  %v6457_v62 = vcombine.high %v898_v57, %v902_v58  ;;  %v950_v47 = vld [vmem:[#allocation11 + $0x470] sm:$0xff]  ;;  %v6496_v48 = vcombine.low %v938_v36, %v942_v37  ;;  %v947_v49 = vld [vmem:[#allocation11 + $0x458] sm:$0xff] }
 0x2cd   :  { %2640 = vmatprep.subr.bf16.mxu0 %v6403_v63  ;;  %v6459_v63 = vcombine.high %v899_v4, %v903_v59 }
 0x2cf   :  { %2559 = vmatpush1.bf16.msra.mxu1 %v6400_v6  ;;  %v6456_v6 = vcombine.low %v898_v57, %v902_v58  ;;  %v958_v57 = vld [vmem:[#allocation11 + $0x4b0] sm:$0xff] }
 0x2d0   :  { %2641 = vmatpush1.bf16.msra.mxu0 %v6402_v7  ;;  %2560 = vmatprep.subr.bf16.mxu1 %v6409_v8  ;;  %v6458_v7 = vcombine.low %v899_v4, %v903_v59  ;;  %v6465_v8 = vcombine.high %v906_v0, %v910_v1  ;;  %v955_v4 = vld [vmem:[#allocation11 + $0x498] sm:$0xff] }
 0x2d1   :  { %2642 = vmatprep.subr.bf16.mxu0 %v6411_v9  ;;  %v6467_v9 = vcombine.high %v907_v2, %v911_v3  ;;  %v959_v59 = vld [vmem:[#allocation11 + $0x4b8] sm:$0xff] }
 0x2d3   :  { %2561 = vmatpush1.bf16.msra.mxu1 %v6408_v20  ;;  %v6464_v20 = vcombine.low %v906_v0, %v910_v1  ;;  %v962_v0 = vld [vmem:[#allocation11 + $0x4d0] sm:$0xff] }
 0x2d4   :  { %2643 = vmatpush1.bf16.msra.mxu0 %v6410_v21  ;;  %2562 = vmatprep.subr.bf16.mxu1 %v6417_v22  ;;  %v6466_v21 = vcombine.low %v907_v2, %v911_v3  ;;  %v6473_v22 = vcombine.high %v914_v10, %v918_v14  ;;  %v966_v1 = vld [vmem:[#allocation11 + $0x4f0] sm:$0xff]  ;;  %v963_v2 = vld [vmem:[#allocation11 + $0x4d8] sm:$0xff] }
 0x2d5   :  { %2644 = vmatprep.subr.bf16.mxu0 %v6419_v23  ;;  %v6475_v23 = vcombine.high %v915_v15, %v919_v16  ;;  %v967_v3 = vld [vmem:[#allocation11 + $0x4f8] sm:$0xff] }
 0x2d7   :  { %2563 = vmatpush1.bf16.msra.mxu1 %v6416_v27  ;;  %v6472_v27 = vcombine.low %v914_v10, %v918_v14  ;;  %v974_v10 = vld [vmem:[#allocation11 + $0x530] sm:$0xff]  ;;  %v971_v14 = vld [vmem:[#allocation11 + $0x518] sm:$0xff] }
 0x2d8   :  { %2645 = vmatpush1.bf16.msra.mxu0 %v6418_v11  ;;  %2564 = vmatprep.subr.bf16.mxu1 %v6425_v12  ;;  %v6474_v11 = vcombine.low %v915_v15, %v919_v16  ;;  %v6481_v12 = vcombine.high %v922_v51, %v926_v24  ;;  %v975_v15 = vld [vmem:[#allocation11 + $0x538] sm:$0xff]  ;;  %v6522_v16 = vcombine.low %v963_v2, %v967_v3 }
 0x2d9   :  { %2646 = vmatprep.subr.bf16.mxu0 %v6427_v13  ;;  %v6483_v13 = vcombine.high %v923_v25, %v927_v26 }
 0x2db   :  { %2565 = vmatpush1.bf16.msra.mxu1 %v6424_v30  ;;  %v6480_v30 = vcombine.low %v922_v51, %v926_v24  ;;  %v979_v51 = vld [vmem:[#allocation11 + $0x558] sm:$0xff] }
 0x2dc   :  { %2647 = vmatpush1.bf16.msra.mxu0 %v6426_v32  ;;  %2566 = vmatprep.subr.bf16.mxu1 %v6433_v33  ;;  %v6482_v32 = vcombine.low %v923_v25, %v927_v26  ;;  %v6489_v33 = vcombine.high %v930_v17, %v934_v18  ;;  %v983_v24 = vld [vmem:[#allocation11 + $0x578] sm:$0xff]  ;;  %v6530_v26 = vcombine.low %v971_v14, %v975_v15 }
 0x2dd   :  { %2648 = vmatprep.subr.bf16.mxu0 %v6435_v34  ;;  %v6491_v34 = vcombine.high %v931_v19, %v935_v28 }
 0x2df   :  { %2567 = vmatpush1.bf16.msra.mxu1 %v6432_v40  ;;  %v6488_v40 = vcombine.low %v930_v17, %v934_v18  ;;  %v987_v17 = vld [vmem:[#allocation11 + $0x598] sm:$0xff] }
 0x2e0   :  { %2649 = vmatpush1.bf16.msra.mxu0 %v6434_v43  ;;  %2568 = vmatprep.subr.bf16.mxu1 %v6441_v44  ;;  %v6490_v43 = vcombine.low %v931_v19, %v935_v28  ;;  %v6497_v44 = vcombine.high %v938_v36, %v942_v37  ;;  %v991_v18 = vld [vmem:[#allocation11 + $0x5b8] sm:$0xff]  ;;  %v6538_v28 = vcombine.low %v979_v51, %v983_v24 }
 0x2e1   :  { %2650 = vmatprep.subr.bf16.mxu0 %v6443_v45  ;;  %v6499_v45 = vcombine.high %v939_v38, %v943_v39  ;;  %v995_v36 = vld [vmem:[#allocation11 + $0x5d8] sm:$0xff] }
 0x2e2   :  { %v999_v37 = vld [vmem:[#allocation11 + $0x5f8] sm:$0xff] }
 0x2e3   :  { %2569 = vmatpush1.bf16.msra.mxu1 %v6440_v52  ;;  %v951_v52 = vld [vmem:[#allocation11 + $0x478] sm:$0xff] }
 0x2e4   :  { %2651 = vmatpush1.bf16.msra.mxu0 %v6442_v53  ;;  %2570 = vmatprep.subr.bf16.mxu1 %v6449_v54  ;;  %v6498_v53 = vcombine.low %v939_v38, %v943_v39  ;;  %v6505_v54 = vcombine.high %v946_v46, %v950_v47  ;;  %v6507_v58 = vcombine.high %v947_v49, %v951_v52 }
 0x2e5   :  { %2652 = vmatprep.subr.bf16.mxu0 %v6451_v56  ;;  %v954_v56 = vld [vmem:[#allocation11 + $0x490] sm:$0xff]  ;;  %v6546_v39 = vcombine.low %v987_v17, %v991_v18 }
 0x2e7   :  { %2571 = vmatpush1.bf16.msra.mxu1 %v6448_v60  ;;  %v6504_v60 = vcombine.low %v946_v46, %v950_v47  ;;  %v1003_v46 = vld [vmem:[#allocation11 + $0x618] sm:$0xff] }
 0x2e8   :  { %2653 = vmatpush1.bf16.msra.mxu0 %v6450_v61  ;;  %2572 = vmatprep.subr.bf16.mxu1 %v6457_v62  ;;  %v6506_v61 = vcombine.low %v947_v49, %v951_v52  ;;  %v6513_v62 = vcombine.high %v954_v56, %v958_v57  ;;  %v1007_v47 = vld [vmem:[#allocation11 + $0x638] sm:$0xff]  ;;  %v6554_v49 = vcombine.low %v995_v36, %v999_v37 }
 0x2e9   :  { %2654 = vmatprep.subr.bf16.mxu0 %v6459_v63  ;;  %v6515_v63 = vcombine.high %v955_v4, %v959_v59 }
 0x2eb   :  { %2573 = vmatpush1.bf16.msra.mxu1 %v6456_v6  ;;  %v6512_v6 = vcombine.low %v954_v56, %v958_v57  ;;  %v1014_v56 = vld [vmem:[#allocation11 + $0x670] sm:$0xff]  ;;  %v1011_v57 = vld [vmem:[#allocation11 + $0x658] sm:$0xff] }
 0x2ec   :  { %2655 = vmatpush1.bf16.msra.mxu0 %v6458_v7  ;;  %2574 = vmatprep.subr.bf16.mxu1 %v6465_v8  ;;  %v6521_v7 = vcombine.high %v962_v0, %v966_v1  ;;  %v6523_v8 = vcombine.high %v963_v2, %v967_v3 }
 0x2ed   :  { %2656 = vmatprep.subr.bf16.mxu0 %v6467_v9  ;;  %v970_v9 = vld [vmem:[#allocation11 + $0x510] sm:$0xff] }
 0x2ee   :  { %v6528_v25 = vcombine.low %v970_v9, %v974_v10 }
 0x2ef   :  { %2575 = vmatpush1.bf16.msra.mxu1 %v6464_v20  ;;  %v6529_v20 = vcombine.high %v970_v9, %v974_v10  ;;  %v1027_v9 = vld [vmem:[#allocation11 + $0x6d8] sm:$0xff] }
 0x2f0   :  { %2657 = vmatpush1.bf16.msra.mxu0 %v6466_v21  ;;  %2576 = vmatprep.subr.bf16.mxu1 %v6473_v22  ;;  %v6531_v21 = vcombine.high %v971_v14, %v975_v15  ;;  %v978_v22 = vld [vmem:[#allocation11 + $0x550] sm:$0xff]  ;;  %v1031_v10 = vld [vmem:[#allocation11 + $0x6f8] sm:$0xff] }
 0x2f1   :  { %2658 = vmatprep.subr.bf16.mxu0 %v6475_v23  ;;  %v982_v23 = vld [vmem:[#allocation11 + $0x570] sm:$0xff] }
 0x2f2   :  { %v6536_v19 = vcombine.low %v978_v22, %v982_v23 }
 0x2f3   :  { %2577 = vmatpush1.bf16.msra.mxu1 %v6472_v27  ;;  %v6537_v27 = vcombine.high %v978_v22, %v982_v23  ;;  %v1035_v22 = vld [vmem:[#allocation11 + $0x718] sm:$0xff] }
 0x2f4   :  { %2659 = vmatpush1.bf16.msra.mxu0 %v6474_v11  ;;  %2578 = vmatprep.subr.bf16.mxu1 %v6481_v12  ;;  %v6539_v11 = vcombine.high %v979_v51, %v983_v24  ;;  %v986_v12 = vld [vmem:[#allocation11 + $0x590] sm:$0xff]  ;;  %v1039_v23 = vld [vmem:[#allocation11 + $0x738] sm:$0xff]  ;;  %v6586_v24 = vcombine.low %v1027_v9, %v1031_v10 }
 0x2f5   :  { %2660 = vmatprep.subr.bf16.mxu0 %v6483_v13  ;;  %v990_v13 = vld [vmem:[#allocation11 + $0x5b0] sm:$0xff] }
 0x2f6   :  { %v6544_v38 = vcombine.low %v986_v12, %v990_v13 }
 0x2f7   :  { %2579 = vmatpush1.bf16.msra.mxu1 %v6480_v30  ;;  %v6545_v30 = vcombine.high %v986_v12, %v990_v13  ;;  %v1043_v12 = vld [vmem:[#allocation11 + $0x758] sm:$0xff] }
 0x2f8   :  { %2661 = vmatpush1.bf16.msra.mxu0 %v6482_v32  ;;  %2580 = vmatprep.subr.bf16.mxu1 %v6489_v33  ;;  %v6547_v32 = vcombine.high %v987_v17, %v991_v18  ;;  %v994_v33 = vld [vmem:[#allocation11 + $0x5d0] sm:$0xff]  ;;  %v1047_v13 = vld [vmem:[#allocation11 + $0x778] sm:$0xff]  ;;  %v6594_v18 = vcombine.low %v1035_v22, %v1039_v23 }
 0x2f9   :  { %2662 = vmatprep.subr.bf16.mxu0 %v6491_v34  ;;  %v998_v34 = vld [vmem:[#allocation11 + $0x5f0] sm:$0xff] }
 0x2fb   :  { %2581 = vmatpush1.bf16.msra.mxu1 %v6488_v40  ;;  %v6553_v40 = vcombine.high %v994_v33, %v998_v34 }
 0x2fc   :  { %2663 = vmatpush1.bf16.msra.mxu0 %v6490_v43  ;;  %2591 = vmatprep.subr.bf16.mxu1 %v6497_v44  ;;  %v6555_v43 = vcombine.high %v995_v36, %v999_v37  ;;  %v1002_v44 = vld [vmem:[#allocation11 + $0x610] sm:$0xff]  ;;  %v6602_v37 = vcombine.low %v1043_v12, %v1047_v13 }
 0x2fd   :  { %2673 = vmatprep.subr.bf16.mxu0 %v6499_v45  ;;  %v1006_v45 = vld [vmem:[#allocation11 + $0x630] sm:$0xff] }
 0x2fe   :  { %2583 = vmatmul.mubr.bf16.vlgmr.msra.gmra.mrb[4].mxu1 %v8462_v5  ;;  %v6561_v52 = vcombine.high %v1002_v44, %v1006_v45 }
 0x2ff   :  { %2665 = vmatmul.mubr.bf16.vlgmr.msra.gmra.mrb[16].mxu0 %v8462_v5  ;;  %2592 = vmatpush1.bf16.msra.mxu1 %v6496_v48  ;;  %v6514_v5 = vcombine.low %v955_v4, %v959_v59  ;;  %v6552_v48 = vcombine.low %v994_v33, %v998_v34  ;;  %v6560_v4 = vcombine.low %v1002_v44, %v1006_v45  ;;  %v1051_v33 = vld [vmem:[#allocation11 + $0x798] sm:$0xff] }
 0x300   :  { %2623 = vmatprep.mubr.bf16.mxu1 %v8484_v29  ;;  %2674 = vmatpush1.bf16.msra.mxu0 %v6498_v53  ;;  %v6563_v53 = vcombine.high %v1003_v46, %v1007_v47  ;;  %v6562_v59 = vcombine.low %v1003_v46, %v1007_v47  ;;  %v1055_v34 = vld [vmem:[#allocation11 + $0x7b8] sm:$0xff] }
 0x301   :  { %2705 = vmatprep.mubr.bf16.mxu0 %v8484_v29  ;;  %2593 = vmatprep.subr.bf16.mxu1 %v6505_v54  ;;  %v6520_v29 = vcombine.low %v962_v0, %v966_v1  ;;  %v1010_v54 = vld [vmem:[#allocation11 + $0x650] sm:$0xff]  ;;  %v1019_v0 = vld [vmem:[#allocation11 + $0x698] sm:$0xff]  ;;  %v6610_v47 = vcombine.low %v1051_v33, %v1055_v34 }
 0x302   :  { %2675 = vmatprep.subr.bf16.mxu0 %v6507_v58  ;;  %v1015_v58 = vld [vmem:[#allocation11 + $0x678] sm:$0xff]  ;;  %v6568_v2 = vcombine.low %v1010_v54, %v1014_v56 }
 0x303   :  { %2594 = vmatpush1.bf16.msra.mxu1 %v6504_v60  ;;  %v6569_v60 = vcombine.high %v1010_v54, %v1014_v56  ;;  %v1023_v1 = vld [vmem:[#allocation11 + $0x6b8] sm:$0xff]  ;;  %v6570_v3 = vcombine.low %v1011_v57, %v1015_v58  ;;  %v7363_v54 = vld [vmem:[#allocation14 + $0x4] ss:$28 sps:$4 sm:$0xff]   ;;  %v7366_v56 = vld [vmem:[#allocation14 + $0xc] ss:$28 sps:$4 sm:$0xff]  }
 0x304   :  { %2676 = vmatpush1.bf16.msra.mxu0 %v6506_v61  ;;  %2595 = vmatprep.subr.bf16.mxu1 %v6513_v62  ;;  %v6571_v61 = vcombine.high %v1011_v57, %v1015_v58  ;;  %v1018_v62 = vld [vmem:[#allocation11 + $0x690] sm:$0xff]  ;;  %v6578_v15 = vcombine.low %v1019_v0, %v1023_v1  ;;  %v1059_v44 = vld [vmem:[#allocation11 + $0x7d8] sm:$0xff]  ;;  %v7361_v57 = vld [vmem:[#allocation14] ss:$28 sps:$4 sm:$0xff]  }
 0x305   :  { %2677 = vmatprep.subr.bf16.mxu0 %v6515_v63  ;;  %v1022_v63 = vld [vmem:[#allocation11 + $0x6b0] sm:$0xff]  ;;  %v1063_v45 = vld [vmem:[#allocation11 + $0x7f8] sm:$0xff] }
 0x306   :  { %v6576_v14 = vcombine.low %v1018_v62, %v1022_v63  ;;  %v7364_v58 = vld [vmem:[#allocation14 + $0x8] ss:$28 sps:$4 sm:$0xff]  }
 0x307   :  { %2596 = vmatpush1.bf16.msra.mxu1 %v6512_v6  ;;  %v6577_v6 = vcombine.high %v1018_v62, %v1022_v63  ;;  %v7375_v62 = vld [vmem:[#allocation14 + $0x74] ss:$28 sps:$4 sm:$0xff]   ;;  %v7378_v63 = vld [vmem:[#allocation14 + $0x7c] ss:$28 sps:$4 sm:$0xff]  }
 0x308   :  { %2678 = vmatpush1.bf16.msra.mxu0 %v6514_v5  ;;  %2597 = vmatprep.subr.bf16.mxu1 %v6521_v7  ;;  %v6579_v5 = vcombine.high %v1019_v0, %v1023_v1  ;;  %v1026_v7 = vld [vmem:[#allocation11 + $0x6d0] sm:$0xff]  ;;  %v7376_v1 = vld [vmem:[#allocation14 + $0x78] ss:$28 sps:$4 sm:$0xff]  }
 0x309   :  { %2679 = vmatprep.subr.bf16.mxu0 %v6523_v8  ;;  %v1030_v8 = vld [vmem:[#allocation11 + $0x6f0] sm:$0xff] }
 0x30a   :  { %v6584_v51 = vcombine.low %v1026_v7, %v1030_v8  ;;  %v7373_v0 = vld [vmem:[#allocation14 + $0x70] ss:$28 sps:$4 sm:$0xff]  }
 0x30b   :  { %2598 = vmatpush1.bf16.msra.mxu1 %v6520_v29  ;;  %v6585_v29 = vcombine.high %v1026_v7, %v1030_v8  ;;  %v7390_v7 = vld [vmem:[#allocation14 + $0xec] ss:$28 sps:$4 sm:$0xff]   ;;  %v7385_v8 = vld [vmem:[#allocation14 + $0xe0] ss:$28 sps:$4 sm:$0xff]  }
 0x30c   :  { %2680 = vmatpush1.bf16.msra.mxu0 %v6522_v16  ;;  %2599 = vmatprep.subr.bf16.mxu1 %v6529_v20  ;;  %v6587_v16 = vcombine.high %v1027_v9, %v1031_v10  ;;  %v1034_v20 = vld [vmem:[#allocation11 + $0x710] sm:$0xff]  ;;  %v7393_v10 = vld [vmem:[#allocation14 + $0x11c] ss:$28 sps:$4 sm:$0xff]  }
 0x30d   :  { %2681 = vmatprep.subr.bf16.mxu0 %v6531_v21  ;;  %v1038_v21 = vld [vmem:[#allocation11 + $0x730] sm:$0xff] }
 0x30e   :  { %v6592_v17 = vcombine.low %v1034_v20, %v1038_v21  ;;  %v7388_v9 = vld [vmem:[#allocation14 + $0xe8] ss:$28 sps:$4 sm:$0xff]  }
 0x30f   :  { %2600 = vmatpush1.bf16.msra.mxu1 %v6528_v25  ;;  %v6593_v25 = vcombine.high %v1034_v20, %v1038_v21  ;;  %v7402_v20 = vld [vmem:[#allocation14 + $0x15c] ss:$28 sps:$4 sm:$0xff]   ;;  %v7397_v21 = vld [vmem:[#allocation14 + $0x150] ss:$28 sps:$4 sm:$0xff]  }
 0x310   :  { %2682 = vmatpush1.bf16.msra.mxu0 %v6530_v26  ;;  %2601 = vmatprep.subr.bf16.mxu1 %v6537_v27  ;;  %v6595_v26 = vcombine.high %v1035_v22, %v1039_v23  ;;  %v1042_v27 = vld [vmem:[#allocation11 + $0x750] sm:$0xff]  ;;  %v7400_v22 = vld [vmem:[#allocation14 + $0x158] ss:$28 sps:$4 sm:$0xff]  }
 0x311   :  { %2683 = vmatprep.subr.bf16.mxu0 %v6539_v11  ;;  %v1046_v11 = vld [vmem:[#allocation11 + $0x770] sm:$0xff] }
 0x312   :  { %v6600_v36 = vcombine.low %v1042_v27, %v1046_v11  ;;  %v7405_v23 = vld [vmem:[#allocation14 + $0x18c] ss:$28 sps:$4 sm:$0xff]  }
 0x313   :  { %2602 = vmatpush1.bf16.msra.mxu1 %v6536_v19  ;;  %v6601_v19 = vcombine.high %v1042_v27, %v1046_v11  ;;  %v7414_v27 = vld [vmem:[#allocation14 + $0x1cc] ss:$28 sps:$4 sm:$0xff]   ;;  %v7409_v11 = vld [vmem:[#allocation14 + $0x1c0] ss:$28 sps:$4 sm:$0xff]  }
 0x314   :  { %2684 = vmatpush1.bf16.msra.mxu0 %v6538_v28  ;;  %2603 = vmatprep.subr.bf16.mxu1 %v6545_v30  ;;  %v6603_v28 = vcombine.high %v1043_v12, %v1047_v13  ;;  %v1050_v30 = vld [vmem:[#allocation11 + $0x790] sm:$0xff]  ;;  %v7417_v13 = vld [vmem:[#allocation14 + $0x1fc] ss:$28 sps:$4 sm:$0xff]  }
 0x315   :  { %2685 = vmatprep.subr.bf16.mxu0 %v6547_v32  ;;  %v1054_v32 = vld [vmem:[#allocation11 + $0x7b0] sm:$0xff] }
 0x316   :  { %v6608_v46 = vcombine.low %v1050_v30, %v1054_v32  ;;  %v7412_v12 = vld [vmem:[#allocation14 + $0x1c8] ss:$28 sps:$4 sm:$0xff]  }
 0x317   :  { %2604 = vmatpush1.bf16.msra.mxu1 %v6544_v38  ;;  %v6609_v38 = vcombine.high %v1050_v30, %v1054_v32  ;;  %v7426_v30 = vld [vmem:[#allocation14 + $0x23c] ss:$28 sps:$4 sm:$0xff]   ;;  %v7421_v32 = vld [vmem:[#allocation14 + $0x230] ss:$28 sps:$4 sm:$0xff]  }
 0x318   :  { %2686 = vmatpush1.bf16.msra.mxu0 %v6546_v39  ;;  %2605 = vmatprep.subr.bf16.mxu1 %v6553_v40  ;;  %v6611_v39 = vcombine.high %v1051_v33, %v1055_v34  ;;  %v1058_v40 = vld [vmem:[#allocation11 + $0x7d0] sm:$0xff]  ;;  %v7424_v33 = vld [vmem:[#allocation14 + $0x238] ss:$28 sps:$4 sm:$0xff]  }
 0x319   :  { %2687 = vmatprep.subr.bf16.mxu0 %v6555_v43  ;;  %v1062_v43 = vld [vmem:[#allocation11 + $0x7f0] sm:$0xff] }
 0x31a   :  { %v7429_v34 = vld [vmem:[#allocation14 + $0x26c] ss:$28 sps:$4 sm:$0xff]  }
 0x31b   :  { %2606 = vmatpush1.bf16.msra.mxu1 %v6552_v48  ;;  %v6617_v48 = vcombine.high %v1058_v40, %v1062_v43 }
 0x31c   :  { %2688 = vmatpush1.bf16.msra.mxu0 %v6554_v49  ;;  %2607 = vmatprep.subr.bf16.mxu1 %v6561_v52  ;;  %v6619_v49 = vcombine.high %v1059_v44, %v1063_v45  ;;  %v6616_v52 = vcombine.low %v1058_v40, %v1062_v43  ;;  %v7438_v40 = vld [vmem:[#allocation14 + $0x2ac] ss:$28 sps:$4 sm:$0xff]   ;;  %v7433_v43 = vld [vmem:[#allocation14 + $0x2a0] ss:$28 sps:$4 sm:$0xff]  }
 0x31d   :  { %2689 = vmatprep.subr.bf16.mxu0 %v6563_v53  ;;  %v6618_v53 = vcombine.low %v1059_v44, %v1063_v45  ;;  %v7436_v44 = vld [vmem:[#allocation14 + $0x2a8] ss:$28 sps:$4 sm:$0xff]   ;;  %v7441_v45 = vld [vmem:[#allocation14 + $0x2dc] ss:$28 sps:$4 sm:$0xff]  }
 0x31f   :  { %2608 = vmatpush1.bf16.msra.mxu1 %v6560_v4  ;;  %v7369_v4 = vld [vmem:[#allocation14 + $0x3c] ss:$28 sps:$4 sm:$0xff]  }
 0x320   :  { %2690 = vmatpush1.bf16.msra.mxu0 %v6562_v59  ;;  %2609 = vmatprep.subr.bf16.mxu1 %v6569_v60  ;;  %v7372_v59 = vld [vmem:[#allocation14 + $0x44] ss:$28 sps:$4 sm:$0xff]   ;;  %v7367_v60 = vld [vmem:[#allocation14 + $0x38] ss:$28 sps:$4 sm:$0xff]  }
 0x321   :  { %2691 = vmatprep.subr.bf16.mxu0 %v6571_v61  ;;  %v7370_v61 = vld [vmem:[#allocation14 + $0x40] ss:$28 sps:$4 sm:$0xff]  }
 0x323   :  { %2610 = vmatpush1.bf16.msra.mxu1 %v6568_v2  ;;  %v7381_v2 = vld [vmem:[#allocation14 + $0xac] ss:$28 sps:$4 sm:$0xff]  }
 0x324   :  { %2692 = vmatpush1.bf16.msra.mxu0 %v6570_v3  ;;  %2611 = vmatprep.subr.bf16.mxu1 %v6577_v6  ;;  %v7384_v3 = vld [vmem:[#allocation14 + $0xb4] ss:$28 sps:$4 sm:$0xff]   ;;  %v7379_v6 = vld [vmem:[#allocation14 + $0xa8] ss:$28 sps:$4 sm:$0xff]  }
 0x325   :  { %2693 = vmatprep.subr.bf16.mxu0 %v6579_v5  ;;  %v7387_v5 = vld [vmem:[#allocation14 + $0xe4] ss:$28 sps:$4 sm:$0xff]  }
 0x327   :  { %2612 = vmatpush1.bf16.msra.mxu1 %v6576_v14  ;;  %v7396_v14 = vld [vmem:[#allocation14 + $0x124] ss:$28 sps:$4 sm:$0xff]  }
 0x328   :  { %2694 = vmatpush1.bf16.msra.mxu0 %v6578_v15  ;;  %2613 = vmatprep.subr.bf16.mxu1 %v6585_v29  ;;  %v7391_v15 = vld [vmem:[#allocation14 + $0x118] ss:$28 sps:$4 sm:$0xff]   ;;  %v7394_v29 = vld [vmem:[#allocation14 + $0x120] ss:$28 sps:$4 sm:$0xff]  }
 0x329   :  { %2695 = vmatprep.subr.bf16.mxu0 %v6587_v16  ;;  %v7399_v16 = vld [vmem:[#allocation14 + $0x154] ss:$28 sps:$4 sm:$0xff]  }
 0x32b   :  { %2614 = vmatpush1.bf16.msra.mxu1 %v6584_v51  ;;  %v7408_v51 = vld [vmem:[#allocation14 + $0x194] ss:$28 sps:$4 sm:$0xff]  }
 0x32c   :  { %2696 = vmatpush1.bf16.msra.mxu0 %v6586_v24  ;;  %2615 = vmatprep.subr.bf16.mxu1 %v6593_v25  ;;  %v7403_v24 = vld [vmem:[#allocation14 + $0x188] ss:$28 sps:$4 sm:$0xff]   ;;  %v7406_v25 = vld [vmem:[#allocation14 + $0x190] ss:$28 sps:$4 sm:$0xff]  }
 0x32d   :  { %2697 = vmatprep.subr.bf16.mxu0 %v6595_v26  ;;  %v7411_v26 = vld [vmem:[#allocation14 + $0x1c4] ss:$28 sps:$4 sm:$0xff]  }
 0x32f   :  { %2616 = vmatpush1.bf16.msra.mxu1 %v6592_v17  ;;  %v7420_v17 = vld [vmem:[#allocation14 + $0x204] ss:$28 sps:$4 sm:$0xff]  }
 0x330   :  { %2698 = vmatpush1.bf16.msra.mxu0 %v6594_v18  ;;  %2617 = vmatprep.subr.bf16.mxu1 %v6601_v19  ;;  %v7415_v18 = vld [vmem:[#allocation14 + $0x1f8] ss:$28 sps:$4 sm:$0xff]   ;;  %v7418_v19 = vld [vmem:[#allocation14 + $0x200] ss:$28 sps:$4 sm:$0xff]  }
 0x331   :  { %2699 = vmatprep.subr.bf16.mxu0 %v6603_v28  ;;  %v7423_v28 = vld [vmem:[#allocation14 + $0x234] ss:$28 sps:$4 sm:$0xff]  }
 0x333   :  { %2618 = vmatpush1.bf16.msra.mxu1 %v6600_v36  ;;  %v7432_v36 = vld [vmem:[#allocation14 + $0x274] ss:$28 sps:$4 sm:$0xff]  }
 0x334   :  { %2700 = vmatpush1.bf16.msra.mxu0 %v6602_v37  ;;  %2619 = vmatprep.subr.bf16.mxu1 %v6609_v38  ;;  %v7427_v37 = vld [vmem:[#allocation14 + $0x268] ss:$28 sps:$4 sm:$0xff]   ;;  %v7430_v38 = vld [vmem:[#allocation14 + $0x270] ss:$28 sps:$4 sm:$0xff]  }
 0x335   :  { %2701 = vmatprep.subr.bf16.mxu0 %v6611_v39  ;;  %v7435_v39 = vld [vmem:[#allocation14 + $0x2a4] ss:$28 sps:$4 sm:$0xff]  }
 0x337   :  { %2620 = vmatpush1.bf16.msra.mxu1 %v6608_v46  ;;  %v7444_v46 = vld [vmem:[#allocation14 + $0x2e4] ss:$28 sps:$4 sm:$0xff]  }
 0x338   :  { %2702 = vmatpush1.bf16.msra.mxu0 %v6610_v47  ;;  %2621 = vmatprep.subr.bf16.mxu1 %v6617_v48  ;;  %v7439_v47 = vld [vmem:[#allocation14 + $0x2d8] ss:$28 sps:$4 sm:$0xff]   ;;  %v7442_v48 = vld [vmem:[#allocation14 + $0x2e0] ss:$28 sps:$4 sm:$0xff]  }
 0x339   :  { %2703 = vmatprep.subr.bf16.mxu0 %v6619_v49  ;;  %v7447_v49 = vld [vmem:[#allocation14 + $0x314] ss:$28 sps:$4 sm:$0xff]  }
 0x33b   :  { %2622 = vmatpush1.bf16.msra.mxu1 %v6616_v52  ;;  %v7450_v52 = vld [vmem:[#allocation14 + $0x31c] ss:$28 sps:$4 sm:$0xff]  }
 0x33c   :  { %2704 = vmatpush1.bf16.msra.mxu0 %v6618_v53  ;;  %5599 = vmatprep.subr.bf16.mxu1 %v7363_v54  ;;  %v7445_v53 = vld [vmem:[#allocation14 + $0x310] ss:$28 sps:$4 sm:$0xff]   ;;  %v7448_v54 = vld [vmem:[#allocation14 + $0x318] ss:$28 sps:$4 sm:$0xff]  }
 0x33d   :  { %5763 = vmatprep.subr.bf16.mxu0 %v7366_v56  ;;  %v7453_v56 = vld [vmem:[#allocation14 + $0x34c] ss:$28 sps:$4 sm:$0xff]  }
 0x33e   :  { %2624 = vmatmul.mubr.bf16.vlgmr.msra.gmra.mrb[4].mxu1 %v8486_v31 }
 0x33f   :  { %2706 = vmatmul.mubr.bf16.vlgmr.msra.gmra.mrb[16].mxu0 %v8486_v31  ;;  %5600 = vmatpush1.bf16.msra.mxu1 %v7361_v57  ;;  %v7382_v31 = vld [vmem:[#allocation14 + $0xb0] ss:$28 sps:$4 sm:$0xff]  }
 0x340   :  { %5764 = vmatpush1.bf16.msra.mxu0 %v7364_v58  ;;  %5601 = vmatprep.subr.bf16.mxu1 %v7369_v4  ;;  %v7456_v57 = vld [vmem:[#allocation14 + $0x354] ss:$28 sps:$4 sm:$0xff]   ;;  %v7451_v58 = vld [vmem:[#allocation14 + $0x348] ss:$28 sps:$4 sm:$0xff]  }
 0x341   :  { %5765 = vmatprep.subr.bf16.mxu0 %v7372_v59  ;;  %v7454_v4 = vld [vmem:[#allocation14 + $0x350] ss:$28 sps:$4 sm:$0xff]   ;;  %v7459_v59 = vld [vmem:[#allocation14 + $0x384] ss:$28 sps:$4 sm:$0xff]  }
 0x343   :  { %5602 = vmatpush1.bf16.msra.mxu1 %v7367_v60  ;;  %v7462_v60 = vld [vmem:[#allocation14 + $0x38c] ss:$28 sps:$4 sm:$0xff]  }
 0x344   :  { %5766 = vmatpush1.bf16.msra.mxu0 %v7370_v61  ;;  %5603 = vmatprep.subr.bf16.mxu1 %v7375_v62  ;;  %v8500_v61 = vld [vmem:[#allocation13] sm:$0xff] }
 0x345   :  { %5767 = vmatprep.subr.bf16.mxu0 %v7378_v63  ;;  %v1069_v62 = vrot.slane %v8500_v61, %v8427_v41  ;;  %v1073_v63 = vrot.slane %v8500_v61, %v8430_v42 }
 0x347   :  { %5604 = vmatpush1.bf16.msra.mxu1 %v7373_v0  ;;  %v1081_v0 = vrot.slane %v8500_v61, %v8478_v55 }
 0x348   :  { %5768 = vmatpush1.bf16.msra.mxu0 %v7376_v1  ;;  %5605 = vmatprep.subr.bf16.mxu1 %v7381_v2 }
 0x349   :  { %5769 = vmatprep.subr.bf16.mxu0 %v7384_v3 }
 0x34b   :  { %5606 = vmatpush1.bf16.msra.mxu1 %v7379_v6 }
 0x34c   :  { %5770 = vmatpush1.bf16.msra.mxu0 %v7382_v31  ;;  %5607 = vmatprep.subr.bf16.mxu1 %v7387_v5 }
 0x34d   :  { %5771 = vmatprep.subr.bf16.mxu0 %v7390_v7 }
 0x34f   :  { %5608 = vmatpush1.bf16.msra.mxu1 %v7385_v8 }
 0x350   :  { %5772 = vmatpush1.bf16.msra.mxu0 %v7388_v9  ;;  %5609 = vmatprep.subr.bf16.mxu1 %v7393_v10 }
 0x351   :  { %5773 = vmatprep.subr.bf16.mxu0 %v7396_v14 }
 0x353   :  { %5610 = vmatpush1.bf16.msra.mxu1 %v7391_v15 }
 0x354   :  { %5774 = vmatpush1.bf16.msra.mxu0 %v7394_v29  ;;  %5611 = vmatprep.subr.bf16.mxu1 %v7399_v16 }
 0x355   :  { %5775 = vmatprep.subr.bf16.mxu0 %v7402_v20 }
 0x357   :  { %5612 = vmatpush1.bf16.msra.mxu1 %v7397_v21 }
 0x358   :  { %5776 = vmatpush1.bf16.msra.mxu0 %v7400_v22  ;;  %5613 = vmatprep.subr.bf16.mxu1 %v7405_v23 }
 0x359   :  { %5777 = vmatprep.subr.bf16.mxu0 %v7408_v51  ;;  %v7457_v51 = vld [vmem:[#allocation14 + $0x380] ss:$28 sps:$4 sm:$0xff]  }
 0x35b   :  { %5614 = vmatpush1.bf16.msra.mxu1 %v7403_v24  ;;  %v7460_v24 = vld [vmem:[#allocation14 + $0x388] ss:$28 sps:$4 sm:$0xff]  }
 0x35c   :  { %5778 = vmatpush1.bf16.msra.mxu0 %v7406_v25  ;;  %5615 = vmatprep.subr.bf16.mxu1 %v7411_v26  ;;  %v7465_v26 = vld [vmem:[#allocation14 + $0x3bc] ss:$28 sps:$4 sm:$0xff]  }
 0x35d   :  { %5779 = vmatprep.subr.bf16.mxu0 %v7414_v27  ;;  %v7468_v27 = vld [vmem:[#allocation14 + $0x3c4] ss:$28 sps:$4 sm:$0xff]  }
 0x35f   :  { %5616 = vmatpush1.bf16.msra.mxu1 %v7409_v11 }
 0x360   :  { %5780 = vmatpush1.bf16.msra.mxu0 %v7412_v12  ;;  %5617 = vmatprep.subr.bf16.mxu1 %v7417_v13  ;;  %v7463_v12 = vld [vmem:[#allocation14 + $0x3b8] ss:$28 sps:$4 sm:$0xff]   ;;  %v7466_v13 = vld [vmem:[#allocation14 + $0x3c0] ss:$28 sps:$4 sm:$0xff]  }
 0x361   :  { %5781 = vmatprep.subr.bf16.mxu0 %v7420_v17  ;;  %v7471_v17 = vld [vmem:[#allocation14 + $0x3f4] ss:$28 sps:$4 sm:$0xff]  }
 0x363   :  { %5618 = vmatpush1.bf16.msra.mxu1 %v7415_v18  ;;  %v7474_v18 = vld [vmem:[#allocation14 + $0x3fc] ss:$28 sps:$4 sm:$0xff]  }
 0x364   :  { %5782 = vmatpush1.bf16.msra.mxu0 %v7418_v19  ;;  %5619 = vmatprep.subr.bf16.mxu1 %v7423_v28  ;;  %v7469_v19 = vld [vmem:[#allocation14 + $0x3f0] ss:$28 sps:$4 sm:$0xff]   ;;  %v7472_v28 = vld [vmem:[#allocation14 + $0x3f8] ss:$28 sps:$4 sm:$0xff]  }
 0x365   :  { %5783 = vmatprep.subr.bf16.mxu0 %v7426_v30  ;;  %v7477_v30 = vld [vmem:[#allocation14 + $0x42c] ss:$28 sps:$4 sm:$0xff]  }
 0x367   :  { %5620 = vmatpush1.bf16.msra.mxu1 %v7421_v32  ;;  %v7480_v32 = vld [vmem:[#allocation14 + $0x434] ss:$28 sps:$4 sm:$0xff]  }
 0x368   :  { %5784 = vmatpush1.bf16.msra.mxu0 %v7424_v33  ;;  %5621 = vmatprep.subr.bf16.mxu1 %v7429_v34  ;;  %v7475_v33 = vld [vmem:[#allocation14 + $0x428] ss:$28 sps:$4 sm:$0xff]   ;;  %v7478_v34 = vld [vmem:[#allocation14 + $0x430] ss:$28 sps:$4 sm:$0xff]  }
 0x369   :  { %5785 = vmatprep.subr.bf16.mxu0 %v7432_v36  ;;  %v7483_v36 = vld [vmem:[#allocation14 + $0x464] ss:$28 sps:$4 sm:$0xff]  }
 0x36b   :  { %5622 = vmatpush1.bf16.msra.mxu1 %v7427_v37  ;;  %v7486_v37 = vld [vmem:[#allocation14 + $0x46c] ss:$28 sps:$4 sm:$0xff]  }
 0x36c   :  { %5786 = vmatpush1.bf16.msra.mxu0 %v7430_v38  ;;  %5623 = vmatprep.subr.bf16.mxu1 %v7435_v39  ;;  %v7481_v38 = vld [vmem:[#allocation14 + $0x460] ss:$28 sps:$4 sm:$0xff]   ;;  %v7484_v39 = vld [vmem:[#allocation14 + $0x468] ss:$28 sps:$4 sm:$0xff]  }
 0x36d   :  { %5787 = vmatprep.subr.bf16.mxu0 %v7438_v40  ;;  %v7489_v40 = vld [vmem:[#allocation14 + $0x49c] ss:$28 sps:$4 sm:$0xff]  }
 0x36f   :  { %5624 = vmatpush1.bf16.msra.mxu1 %v7433_v43  ;;  %v7492_v43 = vld [vmem:[#allocation14 + $0x4a4] ss:$28 sps:$4 sm:$0xff]  }
 0x370   :  { %5788 = vmatpush1.bf16.msra.mxu0 %v7436_v44  ;;  %5625 = vmatprep.subr.bf16.mxu1 %v7441_v45  ;;  %v7487_v44 = vld [vmem:[#allocation14 + $0x498] ss:$28 sps:$4 sm:$0xff]   ;;  %v7490_v45 = vld [vmem:[#allocation14 + $0x4a0] ss:$28 sps:$4 sm:$0xff]  }
 0x371   :  { %5789 = vmatprep.subr.bf16.mxu0 %v7444_v46  ;;  %v7495_v46 = vld [vmem:[#allocation14 + $0x4d4] ss:$28 sps:$4 sm:$0xff]  }
 0x373   :  { %5626 = vmatpush1.bf16.msra.mxu1 %v7439_v47  ;;  %v7498_v47 = vld [vmem:[#allocation14 + $0x4dc] ss:$28 sps:$4 sm:$0xff]  }
 0x374   :  { %5790 = vmatpush1.bf16.msra.mxu0 %v7442_v48  ;;  %5627 = vmatprep.subr.bf16.mxu1 %v7447_v49  ;;  %v7493_v48 = vld [vmem:[#allocation14 + $0x4d0] ss:$28 sps:$4 sm:$0xff]   ;;  %v7496_v49 = vld [vmem:[#allocation14 + $0x4d8] ss:$28 sps:$4 sm:$0xff]  }
 0x375   :  { %5791 = vmatprep.subr.bf16.mxu0 %v7450_v52  ;;  %v7501_v52 = vld [vmem:[#allocation14 + $0x50c] ss:$28 sps:$4 sm:$0xff]  }
 0x377   :  { %5628 = vmatpush1.bf16.msra.mxu1 %v7445_v53  ;;  %v7504_v53 = vld [vmem:[#allocation14 + $0x514] ss:$28 sps:$4 sm:$0xff]  }
 0x378   :  { %5792 = vmatpush1.bf16.msra.mxu0 %v7448_v54  ;;  %5629 = vmatprep.subr.bf16.mxu1 %v7453_v56  ;;  %v7499_v54 = vld [vmem:[#allocation14 + $0x508] ss:$28 sps:$4 sm:$0xff]   ;;  %v7502_v56 = vld [vmem:[#allocation14 + $0x510] ss:$28 sps:$4 sm:$0xff]  }
 0x379   :  { %5793 = vmatprep.subr.bf16.mxu0 %v7456_v57  ;;  %v7507_v57 = vld [vmem:[#allocation14 + $0x544] ss:$28 sps:$4 sm:$0xff]  }
 0x37b   :  { %5630 = vmatpush1.bf16.msra.mxu1 %v7451_v58  ;;  %v7510_v58 = vld [vmem:[#allocation14 + $0x54c] ss:$28 sps:$4 sm:$0xff]  }
 0x37c   :  { %5794 = vmatpush1.bf16.msra.mxu0 %v7454_v4  ;;  %5640 = vmatprep.subr.bf16.mxu1 %v7459_v59  ;;  %v7505_v4 = vld [vmem:[#allocation14 + $0x540] ss:$28 sps:$4 sm:$0xff]   ;;  %v7508_v59 = vld [vmem:[#allocation14 + $0x548] ss:$28 sps:$4 sm:$0xff]  }
 0x37d   :  { %5804 = vmatprep.subr.bf16.mxu0 %v7462_v60  ;;  %v7513_v60 = vld [vmem:[#allocation14 + $0x57c] ss:$28 sps:$4 sm:$0xff]  }
 0x391   :  { %v2461_v1 = vpop.f32.mrb[0].mxu1  ;;  %v8508_v2 = vpop.f32.mrb[12].mxu0 }
 0x392   :  { %v7156_v3 = vadd.f32 %v2461_v1, %v1069_v62  ;;  %v2463_v6 = vpop.f32.mrb[1].mxu1  ;;  %v2545_v31 = vpop.f32.mrb[13].mxu0  ;;  %v7516_v62 = vld [vmem:[#allocation14 + $0x584] ss:$28 sps:$4 sm:$0xff]   ;;  %v7519_v1 = vld [vmem:[#allocation14 + $0x5b4] ss:$28 sps:$4 sm:$0xff]  }
 0x393   :  { %v7157_v5 = vadd.f32 %v2463_v6, %v1073_v63  ;;  %v7159_v7 = vadd.f32 %v2545_v31, %v1081_v0  ;;  %v2465_v8 = vpop.f32.mrb[2].mxu1  ;;  %v2547_v9 = vpop.f32.mrb[14].mxu0  ;;  %v7511_v63 = vld [vmem:[#allocation14 + $0x578] ss:$28 sps:$4 sm:$0xff]   ;;  %v7514_v0 = vld [vmem:[#allocation14 + $0x580] ss:$28 sps:$4 sm:$0xff]  }
 0x394   :  { %vm2714_vm6 = vcmp.gt.f32.partialorder %v7156_v3, 0.0  ;;  %v2722_v10 = vmul.f32 0.2, %v7156_v3  ;;  %v2466_v16 = vpop.f32.mrb[3].mxu1  ;;  %v2548_v20 = vpop.f32.mrb[15].mxu0 }
 0x395   :  { %vm2715_vm7 = vcmp.gt.f32.partialorder %v7157_v5, 0.0  ;;  %v2723_v14 = vmul.f32 0.2, %v7157_v5  ;;  %vm2717_vm8 = vcmp.gt.f32.partialorder %v7159_v7, 0.0  ;;  %v2725_v15 = vmul.f32 0.2, %v7159_v7 }
 0x396   :  { %v2730_v29 = vsel %vm2714_vm6, %v7156_v3, %v2722_v10  ;;  %v7522_v3 = vld [vmem:[#allocation14 + $0x5bc] ss:$28 sps:$4 sm:$0xff]   ;;  %v7517_v6 = vld [vmem:[#allocation14 + $0x5b0] ss:$28 sps:$4 sm:$0xff]   ;;  %v7523_v8 = vld [vmem:[#allocation14 + $0x5e8] ss:$28 sps:$4 sm:$0xff]  }
 0x397   :  { %v2731_v21 = vsel %vm2715_vm7, %v7157_v5, %v2723_v14  ;;  %v2733_v23 = vsel %vm2717_vm8, %v7159_v7, %v2725_v15  ;;  %v8512_v25 = vpack.c.bf16 %v2730_v29, %v2730_v29  ;;  %v7520_v31 = vld [vmem:[#allocation14 + $0x5b8] ss:$28 sps:$4 sm:$0xff]   ;;  %v7525_v5 = vld [vmem:[#allocation14 + $0x5ec] ss:$28 sps:$4 sm:$0xff]   ;;  %v7531_v10 = vld [vmem:[#allocation14 + $0x624] ss:$28 sps:$4 sm:$0xff]  }
 0x398   :  { %v8510_v22 = vpack.c.bf16 %v2731_v21, %v2731_v21  ;;  %v8516_v11 = vpack.c.bf16 %v2733_v23, %v2733_v23  ;;  %v7528_v7 = vld [vmem:[#allocation14 + $0x5f4] ss:$28 sps:$4 sm:$0xff]   ;;  %v7534_v14 = vld [vmem:[#allocation14 + $0x62c] ss:$28 sps:$4 sm:$0xff]   ;;  %v7529_v15 = vld [vmem:[#allocation14 + $0x620] ss:$28 sps:$4 sm:$0xff]   ;;  %v1077_v21 = vrot.slane %v8500_v61, %v8475_v50 }
 0x399   :  { %v7526_v9 = vld [vmem:[#allocation14 + $0x5f0] ss:$28 sps:$4 sm:$0xff]   ;;  %v7532_v29 = vld [vmem:[#allocation14 + $0x628] ss:$28 sps:$4 sm:$0xff]   ;;  %v7537_v16 = vld [vmem:[#allocation14 + $0x65c] ss:$28 sps:$4 sm:$0xff]  }
 0x39a   :  { %5631 = vmatprep.mubr.bf16.mxu1 %v8510_v22  ;;  %5795 = vmatprep.mubr.bf16.mxu0 %v8510_v22  ;;  %v7540_v20 = vld [vmem:[#allocation14 + $0x664] ss:$28 sps:$4 sm:$0xff]   ;;  %v7535_v23 = vld [vmem:[#allocation14 + $0x658] ss:$28 sps:$4 sm:$0xff]  }
 0x39b   :  { %5632 = vmatmul.mubr.bf16.vlgmr.msra.gmra.mrb[8].mxu1 %v8512_v25  ;;  %5796 = vmatmul.mubr.bf16.vlgmr.msra.gmra.mrb[20].mxu0 %v8512_v25 }
 0x39c   :  { %5641 = vmatpush1.bf16.msra.mxu1 %v7457_v51  ;;  %5805 = vmatpush1.bf16.msra.mxu0 %v7460_v24  ;;  %v7538_v51 = vld [vmem:[#allocation14 + $0x660] ss:$28 sps:$4 sm:$0xff]   ;;  %v7543_v24 = vld [vmem:[#allocation14 + $0x694] ss:$28 sps:$4 sm:$0xff]  }
 0x39d   :  { %5672 = vmatprep.mubr.bf16.mxu1 %v8516_v11  ;;  %5836 = vmatprep.mubr.bf16.mxu0 %v8516_v11 }
 0x39e   :  { %5642 = vmatprep.subr.bf16.mxu1 %v7465_v26  ;;  %5806 = vmatprep.subr.bf16.mxu0 %v7468_v27  ;;  %v7546_v26 = vld [vmem:[#allocation14 + $0x69c] ss:$28 sps:$4 sm:$0xff]   ;;  %v7158_v27 = vadd.f32 %v8508_v2, %v1077_v21  ;;  %v7615_v21 = vld [vmem:[#allocation14 + $0x934] ss:$28 sps:$4 sm:$0xff]  }
 0x39f   :  { %v7553_v2 = vld [vmem:[#allocation14 + $0x700] ss:$28 sps:$4 sm:$0xff]  }
 0x3a0   :  { %5643 = vmatpush1.bf16.msra.mxu1 %v7463_v12  ;;  %5807 = vmatpush1.bf16.msra.mxu0 %v7466_v13  ;;  %v7541_v12 = vld [vmem:[#allocation14 + $0x690] ss:$28 sps:$4 sm:$0xff]   ;;  %v7544_v13 = vld [vmem:[#allocation14 + $0x698] ss:$28 sps:$4 sm:$0xff]   ;;  %vm2716_vm9 = vcmp.gt.f32.partialorder %v7158_v27, 0.0 }
 0x3a1   :  { %5644 = vmatprep.subr.bf16.mxu1 %v7471_v17  ;;  %5808 = vmatprep.subr.bf16.mxu0 %v7474_v18  ;;  %v7549_v17 = vld [vmem:[#allocation14 + $0x6cc] ss:$28 sps:$4 sm:$0xff]   ;;  %v7552_v18 = vld [vmem:[#allocation14 + $0x6d4] ss:$28 sps:$4 sm:$0xff]  }
 0x3a4   :  { %5645 = vmatpush1.bf16.msra.mxu1 %v7469_v19  ;;  %5809 = vmatpush1.bf16.msra.mxu0 %v7472_v28  ;;  %v2724_v19 = vmul.f32 0.2, %v7158_v27  ;;  %v7547_v28 = vld [vmem:[#allocation14 + $0x6c8] ss:$28 sps:$4 sm:$0xff]  }
 0x3a5   :  { %5646 = vmatprep.subr.bf16.mxu1 %v7477_v30  ;;  %5810 = vmatprep.subr.bf16.mxu0 %v7480_v32  ;;  %v7550_v30 = vld [vmem:[#allocation14 + $0x6d0] ss:$28 sps:$4 sm:$0xff]   ;;  %v7555_v32 = vld [vmem:[#allocation14 + $0x704] ss:$28 sps:$4 sm:$0xff]  }
 0x3a8   :  { %5647 = vmatpush1.bf16.msra.mxu1 %v7475_v33  ;;  %5811 = vmatpush1.bf16.msra.mxu0 %v7478_v34  ;;  %v7558_v33 = vld [vmem:[#allocation14 + $0x70c] ss:$28 sps:$4 sm:$0xff]   ;;  %v2732_v34 = vsel %vm2716_vm9, %v7158_v27, %v2724_v19  ;;  %v7624_v27 = vld [vmem:[#allocation14 + $0x974] ss:$28 sps:$4 sm:$0xff]   ;;  %v7625_v19 = vld [vmem:[#allocation14 + $0x9a0] ss:$28 sps:$4 sm:$0xff]  }
 0x3a9   :  { %5648 = vmatprep.subr.bf16.mxu1 %v7483_v36  ;;  %5812 = vmatprep.subr.bf16.mxu0 %v7486_v37  ;;  %v7556_v36 = vld [vmem:[#allocation14 + $0x708] ss:$28 sps:$4 sm:$0xff]   ;;  %v8525_v37 = vpack.c.bf16 %v2732_v34, %v2732_v34  ;;  %v1088_v34 = vsub.s32 5, %v8424_v35 }
 0x3ac   :  { %5649 = vmatpush1.bf16.msra.mxu1 %v7481_v38  ;;  %5813 = vmatpush1.bf16.msra.mxu0 %v7484_v39  ;;  %v7561_v38 = vld [vmem:[#allocation14 + $0x73c] ss:$28 sps:$4 sm:$0xff]   ;;  %v7564_v39 = vld [vmem:[#allocation14 + $0x744] ss:$28 sps:$4 sm:$0xff]  }
 0x3ad   :  { %5650 = vmatprep.subr.bf16.mxu1 %v7489_v40  ;;  %5814 = vmatprep.subr.bf16.mxu0 %v7492_v43  ;;  %v7559_v40 = vld [vmem:[#allocation14 + $0x738] ss:$28 sps:$4 sm:$0xff]   ;;  %v7562_v43 = vld [vmem:[#allocation14 + $0x740] ss:$28 sps:$4 sm:$0xff]  }
 0x3b0   :  { %5651 = vmatpush1.bf16.msra.mxu1 %v7487_v44  ;;  %5815 = vmatpush1.bf16.msra.mxu0 %v7490_v45  ;;  %v7567_v44 = vld [vmem:[#allocation14 + $0x774] ss:$28 sps:$4 sm:$0xff]   ;;  %v7570_v45 = vld [vmem:[#allocation14 + $0x77c] ss:$28 sps:$4 sm:$0xff]  }
 0x3b1   :  { %5652 = vmatprep.subr.bf16.mxu1 %v7495_v46  ;;  %5816 = vmatprep.subr.bf16.mxu0 %v7498_v47  ;;  %v7565_v46 = vld [vmem:[#allocation14 + $0x770] ss:$28 sps:$4 sm:$0xff]   ;;  %v7568_v47 = vld [vmem:[#allocation14 + $0x778] ss:$28 sps:$4 sm:$0xff]  }
 0x3b4   :  { %5653 = vmatpush1.bf16.msra.mxu1 %v7493_v48  ;;  %5817 = vmatpush1.bf16.msra.mxu0 %v7496_v49  ;;  %v7573_v48 = vld [vmem:[#allocation14 + $0x7ac] ss:$28 sps:$4 sm:$0xff]   ;;  %v7576_v49 = vld [vmem:[#allocation14 + $0x7b4] ss:$28 sps:$4 sm:$0xff]  }
 0x3b5   :  { %5654 = vmatprep.subr.bf16.mxu1 %v7501_v52  ;;  %5818 = vmatprep.subr.bf16.mxu0 %v7504_v53  ;;  %v7571_v52 = vld [vmem:[#allocation14 + $0x7a8] ss:$28 sps:$4 sm:$0xff]   ;;  %v7574_v53 = vld [vmem:[#allocation14 + $0x7b0] ss:$28 sps:$4 sm:$0xff]  }
 0x3b8   :  { %5655 = vmatpush1.bf16.msra.mxu1 %v7499_v54  ;;  %5819 = vmatpush1.bf16.msra.mxu0 %v7502_v56  ;;  %v7579_v54 = vld [vmem:[#allocation14 + $0x7e4] ss:$28 sps:$4 sm:$0xff]   ;;  %v7582_v56 = vld [vmem:[#allocation14 + $0x7ec] ss:$28 sps:$4 sm:$0xff]  }
 0x3b9   :  { %5656 = vmatprep.subr.bf16.mxu1 %v7507_v57  ;;  %5820 = vmatprep.subr.bf16.mxu0 %v7510_v58  ;;  %v7577_v57 = vld [vmem:[#allocation14 + $0x7e0] ss:$28 sps:$4 sm:$0xff]   ;;  %v7580_v58 = vld [vmem:[#allocation14 + $0x7e8] ss:$28 sps:$4 sm:$0xff]  }
 0x3bc   :  { %5657 = vmatpush1.bf16.msra.mxu1 %v7505_v4  ;;  %5821 = vmatpush1.bf16.msra.mxu0 %v7508_v59  ;;  %v7585_v4 = vld [vmem:[#allocation14 + $0x81c] ss:$28 sps:$4 sm:$0xff]   ;;  %v7588_v59 = vld [vmem:[#allocation14 + $0x824] ss:$28 sps:$4 sm:$0xff]  }
 0x3bd   :  { %5658 = vmatprep.subr.bf16.mxu1 %v7513_v60  ;;  %5822 = vmatprep.subr.bf16.mxu0 %v7516_v62  ;;  %v7583_v60 = vld [vmem:[#allocation14 + $0x818] ss:$28 sps:$4 sm:$0xff]   ;;  %v7586_v62 = vld [vmem:[#allocation14 + $0x820] ss:$28 sps:$4 sm:$0xff]  }
 0x3c0   :  { %5659 = vmatpush1.bf16.msra.mxu1 %v7511_v63  ;;  %5823 = vmatpush1.bf16.msra.mxu0 %v7514_v0  ;;  %v7591_v63 = vld [vmem:[#allocation14 + $0x854] ss:$28 sps:$4 sm:$0xff]   ;;  %v7594_v0 = vld [vmem:[#allocation14 + $0x85c] ss:$28 sps:$4 sm:$0xff]  }
 0x3c1   :  { %5660 = vmatprep.subr.bf16.mxu1 %v7519_v1  ;;  %5824 = vmatprep.subr.bf16.mxu0 %v7522_v3  ;;  %v7589_v1 = vld [vmem:[#allocation14 + $0x850] ss:$28 sps:$4 sm:$0xff]   ;;  %v7592_v3 = vld [vmem:[#allocation14 + $0x858] ss:$28 sps:$4 sm:$0xff]  }
 0x3c4   :  { %5661 = vmatpush1.bf16.msra.mxu1 %v7517_v6  ;;  %5825 = vmatpush1.bf16.msra.mxu0 %v7520_v31  ;;  %v7597_v6 = vld [vmem:[#allocation14 + $0x88c] ss:$28 sps:$4 sm:$0xff]   ;;  %v7600_v31 = vld [vmem:[#allocation14 + $0x894] ss:$28 sps:$4 sm:$0xff]  }
 0x3c5   :  { %5662 = vmatprep.subr.bf16.mxu1 %v7525_v5  ;;  %5826 = vmatprep.subr.bf16.mxu0 %v7528_v7  ;;  %v7595_v5 = vld [vmem:[#allocation14 + $0x888] ss:$28 sps:$4 sm:$0xff]   ;;  %v7598_v7 = vld [vmem:[#allocation14 + $0x890] ss:$28 sps:$4 sm:$0xff]  }
 0x3c8   :  { %5663 = vmatpush1.bf16.msra.mxu1 %v7523_v8  ;;  %5827 = vmatpush1.bf16.msra.mxu0 %v7526_v9  ;;  %v7603_v8 = vld [vmem:[#allocation14 + $0x8c4] ss:$28 sps:$4 sm:$0xff]   ;;  %v7606_v9 = vld [vmem:[#allocation14 + $0x8cc] ss:$28 sps:$4 sm:$0xff]  }
 0x3c9   :  { %5664 = vmatprep.subr.bf16.mxu1 %v7531_v10  ;;  %5828 = vmatprep.subr.bf16.mxu0 %v7534_v14  ;;  %v7601_v10 = vld [vmem:[#allocation14 + $0x8c0] ss:$28 sps:$4 sm:$0xff]   ;;  %v7604_v14 = vld [vmem:[#allocation14 + $0x8c8] ss:$28 sps:$4 sm:$0xff]  }
 0x3cc   :  { %5665 = vmatpush1.bf16.msra.mxu1 %v7529_v15  ;;  %5829 = vmatpush1.bf16.msra.mxu0 %v7532_v29  ;;  %v7609_v15 = vld [vmem:[#allocation14 + $0x8fc] ss:$28 sps:$4 sm:$0xff]   ;;  %v7612_v29 = vld [vmem:[#allocation14 + $0x904] ss:$28 sps:$4 sm:$0xff]  }
 0x3cd   :  { %5666 = vmatprep.subr.bf16.mxu1 %v7537_v16  ;;  %5830 = vmatprep.subr.bf16.mxu0 %v7540_v20  ;;  %v7607_v16 = vld [vmem:[#allocation14 + $0x8f8] ss:$28 sps:$4 sm:$0xff]   ;;  %v7610_v20 = vld [vmem:[#allocation14 + $0x900] ss:$28 sps:$4 sm:$0xff]  }
 0x3d0   :  { %5667 = vmatpush1.bf16.msra.mxu1 %v7535_v23  ;;  %5831 = vmatpush1.bf16.msra.mxu0 %v7538_v51  ;;  %v7618_v23 = vld [vmem:[#allocation14 + $0x93c] ss:$28 sps:$4 sm:$0xff]   ;;  %v7613_v51 = vld [vmem:[#allocation14 + $0x930] ss:$28 sps:$4 sm:$0xff]  }
 0x3d1   :  { %5668 = vmatprep.subr.bf16.mxu1 %v7543_v24  ;;  %5832 = vmatprep.subr.bf16.mxu0 %v7546_v26  ;;  %v7616_v24 = vld [vmem:[#allocation14 + $0x938] ss:$28 sps:$4 sm:$0xff]   ;;  %v7621_v26 = vld [vmem:[#allocation14 + $0x96c] ss:$28 sps:$4 sm:$0xff]  }
 0x3d4   :  { %5669 = vmatpush1.bf16.msra.mxu1 %v7541_v12  ;;  %5833 = vmatpush1.bf16.msra.mxu0 %v7544_v13  ;;  %v7619_v12 = vld [vmem:[#allocation14 + $0x968] ss:$28 sps:$4 sm:$0xff]   ;;  %v7622_v13 = vld [vmem:[#allocation14 + $0x970] ss:$28 sps:$4 sm:$0xff]  }
 0x3d5   :  { %5670 = vmatprep.subr.bf16.mxu1 %v7549_v17  ;;  %5834 = vmatprep.subr.bf16.mxu0 %v7552_v18  ;;  %v7627_v17 = vld [vmem:[#allocation14 + $0x9a4] ss:$28 sps:$4 sm:$0xff]   ;;  %v7630_v18 = vld [vmem:[#allocation14 + $0x9ac] ss:$28 sps:$4 sm:$0xff]  }
 0x3d8   :  { %5671 = vmatpush1.bf16.msra.mxu1 %v7547_v28  ;;  %5835 = vmatpush1.bf16.msra.mxu0 %v7550_v30  ;;  %v7628_v28 = vld [vmem:[#allocation14 + $0x9a8] ss:$28 sps:$4 sm:$0xff]   ;;  %v7633_v30 = vld [vmem:[#allocation14 + $0x9dc] ss:$28 sps:$4 sm:$0xff]  }
 0x3d9   :  { %5681 = vmatprep.subr.bf16.mxu1 %v7555_v32  ;;  %5845 = vmatprep.subr.bf16.mxu0 %v7558_v33  ;;  %v7636_v32 = vld [vmem:[#allocation14 + $0x9e4] ss:$28 sps:$4 sm:$0xff]   ;;  %v1084_v33 = vsub.s32 4, %v8424_v35 }
 0x3db   :  { %5673 = vmatmul.mubr.bf16.vlgmr.msra.gmra.mrb[8].mxu1 %v8525_v37  ;;  %5837 = vmatmul.mubr.bf16.vlgmr.msra.gmra.mrb[20].mxu0 %v8525_v37 }
 0x3dc   :  { %5682 = vmatpush1.bf16.msra.mxu1 %v7553_v2  ;;  %5846 = vmatpush1.bf16.msra.mxu0 %v7556_v36  ;;  %v7631_v2 = vld [vmem:[#allocation14 + $0x9d8] ss:$28 sps:$4 sm:$0xff]   ;;  %v7634_v36 = vld [vmem:[#allocation14 + $0x9e0] ss:$28 sps:$4 sm:$0xff]  }
 0x3dd   :  { %5683 = vmatprep.subr.bf16.mxu1 %v7561_v38  ;;  %5847 = vmatprep.subr.bf16.mxu0 %v7564_v39  ;;  %v1096_v38 = vsub.s32 7, %v8424_v35  ;;  %v7639_v39 = vld [vmem:[#allocation14 + $0xa14] ss:$28 sps:$4 sm:$0xff]  }
 0x3e0   :  { %5684 = vmatpush1.bf16.msra.mxu1 %v7559_v40  ;;  %5848 = vmatpush1.bf16.msra.mxu0 %v7562_v43  ;;  %v7642_v40 = vld [vmem:[#allocation14 + $0xa1c] ss:$28 sps:$4 sm:$0xff]   ;;  %v1085_v43 = vrot.slane %v8500_v61, %v1084_v33 }
 0x3e1   :  { %5685 = vmatprep.subr.bf16.mxu1 %v7567_v44  ;;  %5849 = vmatprep.subr.bf16.mxu0 %v7570_v45  ;;  %v1089_v44 = vrot.slane %v8500_v61, %v1088_v34  ;;  %v1097_v45 = vrot.slane %v8500_v61, %v1096_v38  ;;  %v7681_v38 = vld [vmem:[#allocation14 + $0xb9c] ss:$28 sps:$4 sm:$0xff]  }
 0x3e4   :  { %5686 = vmatpush1.bf16.msra.mxu1 %v7565_v46  ;;  %5850 = vmatpush1.bf16.msra.mxu0 %v7568_v47  ;;  %v7637_v46 = vld [vmem:[#allocation14 + $0xa10] ss:$28 sps:$4 sm:$0xff]   ;;  %v7640_v47 = vld [vmem:[#allocation14 + $0xa18] ss:$28 sps:$4 sm:$0xff]  }
 0x3e5   :  { %5687 = vmatprep.subr.bf16.mxu1 %v7573_v48  ;;  %5851 = vmatprep.subr.bf16.mxu0 %v7576_v49  ;;  %v7645_v49 = vld [vmem:[#allocation14 + $0xa4c] ss:$28 sps:$4 sm:$0xff]  }
 0x3e8   :  { %5688 = vmatpush1.bf16.msra.mxu1 %v7571_v52  ;;  %5852 = vmatpush1.bf16.msra.mxu0 %v7574_v53  ;;  %v7648_v52 = vld [vmem:[#allocation14 + $0xa54] ss:$28 sps:$4 sm:$0xff]  }
 0x3e9   :  { %5689 = vmatprep.subr.bf16.mxu1 %v7579_v54  ;;  %5853 = vmatprep.subr.bf16.mxu0 %v7582_v56 }
 0x3ec   :  { %5690 = vmatpush1.bf16.msra.mxu1 %v7577_v57  ;;  %5854 = vmatpush1.bf16.msra.mxu0 %v7580_v58  ;;  %v7643_v57 = vld [vmem:[#allocation14 + $0xa48] ss:$28 sps:$4 sm:$0xff]  }
 0x3ed   :  { %5691 = vmatprep.subr.bf16.mxu1 %v7585_v4  ;;  %5855 = vmatprep.subr.bf16.mxu0 %v7588_v59 }
 0x3f0   :  { %5692 = vmatpush1.bf16.msra.mxu1 %v7583_v60  ;;  %5856 = vmatpush1.bf16.msra.mxu0 %v7586_v62  ;;  %v7646_v60 = vld [vmem:[#allocation14 + $0xa50] ss:$28 sps:$4 sm:$0xff]   ;;  %v7651_v62 = vld [vmem:[#allocation14 + $0xa84] ss:$28 sps:$4 sm:$0xff]  }
 0x3f1   :  { %5693 = vmatprep.subr.bf16.mxu1 %v7591_v63  ;;  %5857 = vmatprep.subr.bf16.mxu0 %v7594_v0 }
 0x3f4   :  { %5694 = vmatpush1.bf16.msra.mxu1 %v7589_v1  ;;  %5858 = vmatpush1.bf16.msra.mxu0 %v7592_v3 }
 0x3f5   :  { %5695 = vmatprep.subr.bf16.mxu1 %v7597_v6  ;;  %5859 = vmatprep.subr.bf16.mxu0 %v7600_v31  ;;  %v7654_v31 = vld [vmem:[#allocation14 + $0xa8c] ss:$28 sps:$4 sm:$0xff]  }
 0x3f8   :  { %5696 = vmatpush1.bf16.msra.mxu1 %v7595_v5  ;;  %5860 = vmatpush1.bf16.msra.mxu0 %v7598_v7 }
 0x3f9   :  { %5697 = vmatprep.subr.bf16.mxu1 %v7603_v8  ;;  %5861 = vmatprep.subr.bf16.mxu0 %v7606_v9 }
 0x3fc   :  { %5698 = vmatpush1.bf16.msra.mxu1 %v7601_v10  ;;  %5862 = vmatpush1.bf16.msra.mxu0 %v7604_v14 }
 0x3fd   :  { %5699 = vmatprep.subr.bf16.mxu1 %v7609_v15  ;;  %5863 = vmatprep.subr.bf16.mxu0 %v7612_v29  ;;  %v7649_v15 = vld [vmem:[#allocation14 + $0xa80] ss:$28 sps:$4 sm:$0xff]   ;;  %v7652_v29 = vld [vmem:[#allocation14 + $0xa88] ss:$28 sps:$4 sm:$0xff]  }
 0x400   :  { %5700 = vmatpush1.bf16.msra.mxu1 %v7607_v16  ;;  %5864 = vmatpush1.bf16.msra.mxu0 %v7610_v20  ;;  %v7657_v20 = vld [vmem:[#allocation14 + $0xabc] ss:$28 sps:$4 sm:$0xff]  }
 0x401   :  { %5701 = vmatprep.subr.bf16.mxu1 %v7615_v21  ;;  %5865 = vmatprep.subr.bf16.mxu0 %v7618_v23  ;;  %v7660_v21 = vld [vmem:[#allocation14 + $0xac4] ss:$28 sps:$4 sm:$0xff]  }
 0x404   :  { %5702 = vmatpush1.bf16.msra.mxu1 %v7613_v51  ;;  %5866 = vmatpush1.bf16.msra.mxu0 %v7616_v24  ;;  %v7655_v51 = vld [vmem:[#allocation14 + $0xab8] ss:$28 sps:$4 sm:$0xff]   ;;  %v7658_v24 = vld [vmem:[#allocation14 + $0xac0] ss:$28 sps:$4 sm:$0xff]  }
 0x405   :  { %5703 = vmatprep.subr.bf16.mxu1 %v7621_v26  ;;  %5867 = vmatprep.subr.bf16.mxu0 %v7624_v27  ;;  %v7663_v26 = vld [vmem:[#allocation14 + $0xaf4] ss:$28 sps:$4 sm:$0xff]   ;;  %v7666_v27 = vld [vmem:[#allocation14 + $0xafc] ss:$28 sps:$4 sm:$0xff]  }
 0x408   :  { %5704 = vmatpush1.bf16.msra.mxu1 %v7619_v12  ;;  %5868 = vmatpush1.bf16.msra.mxu0 %v7622_v13  ;;  %v7661_v12 = vld [vmem:[#allocation14 + $0xaf0] ss:$28 sps:$4 sm:$0xff]   ;;  %v7664_v13 = vld [vmem:[#allocation14 + $0xaf8] ss:$28 sps:$4 sm:$0xff]  }
 0x409   :  { %5705 = vmatprep.subr.bf16.mxu1 %v7627_v17  ;;  %5869 = vmatprep.subr.bf16.mxu0 %v7630_v18  ;;  %v7669_v17 = vld [vmem:[#allocation14 + $0xb2c] ss:$28 sps:$4 sm:$0xff]   ;;  %v7672_v18 = vld [vmem:[#allocation14 + $0xb34] ss:$28 sps:$4 sm:$0xff]  }
 0x40c   :  { %5706 = vmatpush1.bf16.msra.mxu1 %v7625_v19  ;;  %5870 = vmatpush1.bf16.msra.mxu0 %v7628_v28  ;;  %v7667_v19 = vld [vmem:[#allocation14 + $0xb28] ss:$28 sps:$4 sm:$0xff]   ;;  %v7670_v28 = vld [vmem:[#allocation14 + $0xb30] ss:$28 sps:$4 sm:$0xff]  }
 0x40d   :  { %5707 = vmatprep.subr.bf16.mxu1 %v7633_v30  ;;  %5871 = vmatprep.subr.bf16.mxu0 %v7636_v32  ;;  %v7675_v30 = vld [vmem:[#allocation14 + $0xb64] ss:$28 sps:$4 sm:$0xff]   ;;  %v7678_v32 = vld [vmem:[#allocation14 + $0xb6c] ss:$28 sps:$4 sm:$0xff]  }
 0x410   :  { %5708 = vmatpush1.bf16.msra.mxu1 %v7631_v2  ;;  %5872 = vmatpush1.bf16.msra.mxu0 %v7634_v36  ;;  %v7673_v2 = vld [vmem:[#allocation14 + $0xb60] ss:$28 sps:$4 sm:$0xff]   ;;  %v7676_v36 = vld [vmem:[#allocation14 + $0xb68] ss:$28 sps:$4 sm:$0xff]  }
 0x411   :  { %v2625_v48 = vpop.f32.mrb[4].mxu1  ;;  %5709 = vmatprep.subr.bf16.mxu1 %v7639_v39  ;;  %5873 = vmatprep.subr.bf16.mxu0 %v7642_v40  ;;  %v7684_v39 = vld [vmem:[#allocation14 + $0xba4] ss:$28 sps:$4 sm:$0xff]   ;;  %v7679_v40 = vld [vmem:[#allocation14 + $0xb98] ss:$28 sps:$4 sm:$0xff]  }
 0x412   :  { %v7160_v53 = vadd.f32 %v2625_v48, %v1085_v43  ;;  %v8539_v54 = vpop.f32.mrb[16].mxu0  ;;  %v2627_v56 = vpop.f32.mrb[5].mxu1  ;;  %v7682_v43 = vld [vmem:[#allocation14 + $0xba0] ss:$28 sps:$4 sm:$0xff]   ;;  %v7693_v48 = vld [vmem:[#allocation14 + $0xc0c] ss:$28 sps:$4 sm:$0xff]  }
 0x413   :  { %v7161_v58 = vadd.f32 %v2627_v56, %v1089_v44  ;;  %v2709_v4 = vpop.f32.mrb[17].mxu0  ;;  %v2629_v59 = vpop.f32.mrb[6].mxu1  ;;  %v7687_v44 = vld [vmem:[#allocation14 + $0xbd4] ss:$28 sps:$4 sm:$0xff]   ;;  %v7699_v56 = vld [vmem:[#allocation14 + $0xc44] ss:$28 sps:$4 sm:$0xff]  }
 0x414   :  { %vm2718_vm10 = vcmp.gt.f32.partialorder %v7160_v53, 0.0  ;;  %v2726_v63 = vmul.f32 0.2, %v7160_v53  ;;  %v7163_v0 = vadd.f32 %v2709_v4, %v1097_v45  ;;  %v2711_v1 = vpop.f32.mrb[18].mxu0  ;;  %5710 = vmatpush1.bf16.msra.mxu1 %v7637_v46  ;;  %5874 = vmatpush1.bf16.msra.mxu0 %v7640_v47  ;;  %v2630_v3 = vpop.f32.mrb[7].mxu1 }
 0x415   :  { %vm2719_vm11 = vcmp.gt.f32.partialorder %v7161_v58, 0.0  ;;  %v2727_v6 = vmul.f32 0.2, %v7161_v58  ;;  %5711 = vmatprep.subr.bf16.mxu1 %v7645_v49  ;;  %5875 = vmatprep.subr.bf16.mxu0 %v7648_v52  ;;  %v2712_v8 = vpop.f32.mrb[19].mxu0  ;;  %v7690_v45 = vld [vmem:[#allocation14 + $0xbdc] ss:$28 sps:$4 sm:$0xff]  }
 0x416   :  { %v2734_v5 = vsel %vm2718_vm10, %v7160_v53, %v2726_v63  ;;  %vm2721_vm12 = vcmp.gt.f32.partialorder %v7163_v0, 0.0  ;;  %v2729_v7 = vmul.f32 0.2, %v7163_v0  ;;  %v7685_v46 = vld [vmem:[#allocation14 + $0xbd0] ss:$28 sps:$4 sm:$0xff]  }
 0x417   :  { %v2735_v9 = vsel %vm2719_vm11, %v7161_v58, %v2727_v6  ;;  %v8543_v16 = vpack.c.bf16 %v2734_v5, %v2734_v5  ;;  %v7688_v47 = vld [vmem:[#allocation14 + $0xbd8] ss:$28 sps:$4 sm:$0xff]   ;;  %v7691_v52 = vld [vmem:[#allocation14 + $0xc08] ss:$28 sps:$4 sm:$0xff]   ;;  %v7694_v53 = vld [vmem:[#allocation14 + $0xc10] ss:$28 sps:$4 sm:$0xff]  }
 0x418   :  { %v8541_v10 = vpack.c.bf16 %v2735_v9, %v2735_v9  ;;  %v2737_v14 = vsel %vm2721_vm12, %v7163_v0, %v2729_v7  ;;  %5712 = vmatpush1.bf16.msra.mxu1 %v7643_v57  ;;  %5876 = vmatpush1.bf16.msra.mxu0 %v7646_v60  ;;  %v7696_v49 = vld [vmem:[#allocation14 + $0xc14] ss:$28 sps:$4 sm:$0xff]   ;;  %v7702_v57 = vld [vmem:[#allocation14 + $0xc4c] ss:$28 sps:$4 sm:$0xff]   ;;  %v7697_v58 = vld [vmem:[#allocation14 + $0xc40] ss:$28 sps:$4 sm:$0xff]  }
 0x419   :  { %5722 = vmatprep.subr.bf16.mxu1 %v7651_v62  ;;  %5886 = vmatprep.subr.bf16.mxu0 %v7654_v31  ;;  %v8547_v23 = vpack.c.bf16 %v2737_v14, %v2737_v14  ;;  %v7700_v4 = vld [vmem:[#allocation14 + $0xc48] ss:$28 sps:$4 sm:$0xff]   ;;  %v7705_v59 = vld [vmem:[#allocation14 + $0xc7c] ss:$28 sps:$4 sm:$0xff]   ;;  %v7711_v0 = vld [vmem:[#allocation14 + $0xcb4] ss:$28 sps:$4 sm:$0xff]  }
 0x41a   :  { %5713 = vmatprep.mubr.bf16.mxu1 %v8541_v10  ;;  %5877 = vmatprep.mubr.bf16.mxu0 %v8541_v10  ;;  %v7708_v60 = vld [vmem:[#allocation14 + $0xc84] ss:$28 sps:$4 sm:$0xff]   ;;  %v7703_v62 = vld [vmem:[#allocation14 + $0xc78] ss:$28 sps:$4 sm:$0xff]   ;;  %v7709_v3 = vld [vmem:[#allocation14 + $0xcb0] ss:$28 sps:$4 sm:$0xff]  }
 0x41b   :  { %5714 = vmatmul.mubr.bf16.vlgmr.msra.gmra.mrb[8].mxu1 %v8543_v16  ;;  %5878 = vmatmul.mubr.bf16.vlgmr.msra.gmra.mrb[20].mxu0 %v8543_v16  ;;  %v7706_v63 = vld [vmem:[#allocation14 + $0xc80] ss:$28 sps:$4 sm:$0xff]   ;;  %v7712_v6 = vld [vmem:[#allocation14 + $0xcb8] ss:$28 sps:$4 sm:$0xff]   ;;  %v7717_v31 = vld [vmem:[#allocation14 + $0xcec] ss:$28 sps:$4 sm:$0xff]  }
 0x41c   :  { %5723 = vmatpush1.bf16.msra.mxu1 %v7649_v15  ;;  %5887 = vmatpush1.bf16.msra.mxu0 %v7652_v29  ;;  %v7714_v1 = vld [vmem:[#allocation14 + $0xcbc] ss:$28 sps:$4 sm:$0xff]   ;;  %v7720_v5 = vld [vmem:[#allocation14 + $0xcf4] ss:$28 sps:$4 sm:$0xff]   ;;  %v7715_v7 = vld [vmem:[#allocation14 + $0xce8] ss:$28 sps:$4 sm:$0xff]  }
 0x41d   :  { %5754 = vmatprep.mubr.bf16.mxu1 %v8547_v23  ;;  %5918 = vmatprep.mubr.bf16.mxu0 %v8547_v23  ;;  %v7718_v8 = vld [vmem:[#allocation14 + $0xcf0] ss:$28 sps:$4 sm:$0xff]   ;;  %v7723_v9 = vld [vmem:[#allocation14 + $0xd24] ss:$28 sps:$4 sm:$0xff]   ;;  %v1092_v15 = vsub.s32 6, %v8424_v35 }
 0x41e   :  { %5724 = vmatprep.subr.bf16.mxu1 %v7657_v20  ;;  %5888 = vmatprep.subr.bf16.mxu0 %v7660_v21  ;;  %v7726_v14 = vld [vmem:[#allocation14 + $0xd2c] ss:$28 sps:$4 sm:$0xff]   ;;  %v7721_v29 = vld [vmem:[#allocation14 + $0xd20] ss:$28 sps:$4 sm:$0xff]  }
 0x41f   :  { %v7724_v20 = vld [vmem:[#allocation14 + $0xd28] ss:$28 sps:$4 sm:$0xff]   ;;  %v7729_v21 = vld [vmem:[#allocation14 + $0xd5c] ss:$28 sps:$4 sm:$0xff]  }
 0x420   :  { %5725 = vmatpush1.bf16.msra.mxu1 %v7655_v51  ;;  %5889 = vmatpush1.bf16.msra.mxu0 %v7658_v24  ;;  %v7732_v51 = vld [vmem:[#allocation14 + $0xd64] ss:$28 sps:$4 sm:$0xff]   ;;  %v1093_v24 = vrot.slane %v8500_v61, %v1092_v15 }
 0x421   :  { %5726 = vmatprep.subr.bf16.mxu1 %v7663_v26  ;;  %5890 = vmatprep.subr.bf16.mxu0 %v7666_v27  ;;  %v7727_v26 = vld [vmem:[#allocation14 + $0xd58] ss:$28 sps:$4 sm:$0xff]   ;;  %v7730_v27 = vld [vmem:[#allocation14 + $0xd60] ss:$28 sps:$4 sm:$0xff]   ;;  %v7739_v61 = vld [vmem:[#allocation14 + $0xdc8] ss:$28 sps:$4 sm:$0xff]  }
 0x424   :  { %5727 = vmatpush1.bf16.msra.mxu1 %v7661_v12  ;;  %5891 = vmatpush1.bf16.msra.mxu0 %v7664_v13  ;;  %v7735_v12 = vld [vmem:[#allocation14 + $0xd94] ss:$28 sps:$4 sm:$0xff]   ;;  %v7738_v13 = vld [vmem:[#allocation14 + $0xd9c] ss:$28 sps:$4 sm:$0xff]  }
 0x425   :  { %5728 = vmatprep.subr.bf16.mxu1 %v7669_v17  ;;  %5892 = vmatprep.subr.bf16.mxu0 %v7672_v18  ;;  %v7162_v17 = vadd.f32 %v8539_v54, %v1093_v24  ;;  %v7733_v18 = vld [vmem:[#allocation14 + $0xd90] ss:$28 sps:$4 sm:$0xff]   ;;  %v7789_v24 = vld [vmem:[#allocation14 + $0x398] ss:$28 sps:$4 sm:$0xff]  }
 0x426   :  { %v7745_v54 = vld [vmem:[#allocation14 + $0x10] ss:$28 sps:$4 sm:$0xff]  }
 0x427   :  { %vm2720_vm13 = vcmp.gt.f32.partialorder %v7162_v17, 0.0 }
 0x428   :  { %5729 = vmatpush1.bf16.msra.mxu1 %v7667_v19  ;;  %5893 = vmatpush1.bf16.msra.mxu0 %v7670_v28  ;;  %v7736_v19 = vld [vmem:[#allocation14 + $0xd98] ss:$28 sps:$4 sm:$0xff]   ;;  %v7741_v28 = vld [vmem:[#allocation14 + $0xdcc] ss:$28 sps:$4 sm:$0xff]  }
 0x429   :  { %5730 = vmatprep.subr.bf16.mxu1 %v7675_v30  ;;  %5894 = vmatprep.subr.bf16.mxu0 %v7678_v32  ;;  %v7744_v30 = vld [vmem:[#allocation14 + $0xdd4] ss:$28 sps:$4 sm:$0xff]   ;;  %v2728_v32 = vmul.f32 0.2, %v7162_v17 }
 0x42c   :  { %5731 = vmatpush1.bf16.msra.mxu1 %v7673_v2  ;;  %5895 = vmatpush1.bf16.msra.mxu0 %v7676_v36  ;;  %v7742_v2 = vld [vmem:[#allocation14 + $0xdd0] ss:$28 sps:$4 sm:$0xff]  }
 0x42d   :  { %5732 = vmatprep.subr.bf16.mxu1 %v7681_v38  ;;  %5896 = vmatprep.subr.bf16.mxu0 %v7684_v39  ;;  %v7747_v36 = vld [vmem:[#allocation14 + $0x14] ss:$28 sps:$4 sm:$0xff]   ;;  %v2736_v39 = vsel %vm2720_vm13, %v7162_v17, %v2728_v32  ;;  %v7797_v17 = vld [vmem:[#allocation14 + $0x244] ss:$28 sps:$4 sm:$0xff]  }
 0x42e   :  { %v7748_v38 = vld [vmem:[#allocation14 + $0x1d8] ss:$28 sps:$4 sm:$0xff]   ;;  %v7803_v32 = vld [vmem:[#allocation14 + $0x600] ss:$28 sps:$4 sm:$0xff]  }
 0x430   :  { %5733 = vmatpush1.bf16.msra.mxu1 %v7679_v40  ;;  %5897 = vmatpush1.bf16.msra.mxu0 %v7682_v43  ;;  %v8558_v40 = vpack.c.bf16 %v2736_v39, %v2736_v39  ;;  %v7749_v43 = vld [vmem:[#allocation14 + $0x18] ss:$28 sps:$4 sm:$0xff]   ;;  %v7805_v39 = vld [vmem:[#allocation14 + $0x2b0] ss:$28 sps:$4 sm:$0xff]  }
 0x431   :  { %5734 = vmatprep.subr.bf16.mxu1 %v7687_v44  ;;  %5898 = vmatprep.subr.bf16.mxu0 %v7690_v45  ;;  %v7752_v44 = vld [vmem:[#allocation14 + $0x4c] ss:$28 sps:$4 sm:$0xff]  }
 0x432   :  { %v7753_v45 = vld [vmem:[#allocation14 + $0x210] ss:$28 sps:$4 sm:$0xff]  }
 0x434   :  { %5735 = vmatpush1.bf16.msra.mxu1 %v7685_v46  ;;  %5899 = vmatpush1.bf16.msra.mxu0 %v7688_v47  ;;  %v7750_v46 = vld [vmem:[#allocation14 + $0x48] ss:$28 sps:$4 sm:$0xff]   ;;  %v7754_v47 = vld [vmem:[#allocation14 + $0x50] ss:$28 sps:$4 sm:$0xff]  }
 0x435   :  { %5736 = vmatprep.subr.bf16.mxu1 %v7693_v48  ;;  %5900 = vmatprep.subr.bf16.mxu0 %v7696_v49  ;;  %v7757_v48 = vld [vmem:[#allocation14 + $0x84] ss:$28 sps:$4 sm:$0xff]  }
 0x436   :  { %v7758_v49 = vld [vmem:[#allocation14 + $0x248] ss:$28 sps:$4 sm:$0xff]  }
 0x438   :  { %5737 = vmatpush1.bf16.msra.mxu1 %v7691_v52  ;;  %5901 = vmatpush1.bf16.msra.mxu0 %v7694_v53  ;;  %v7755_v52 = vld [vmem:[#allocation14 + $0x80] ss:$28 sps:$4 sm:$0xff]   ;;  %v7759_v53 = vld [vmem:[#allocation14 + $0x88] ss:$28 sps:$4 sm:$0xff]  }
 0x439   :  { %5738 = vmatprep.subr.bf16.mxu1 %v7699_v56  ;;  %5902 = vmatprep.subr.bf16.mxu0 %v7702_v57  ;;  %v7762_v56 = vld [vmem:[#allocation14 + $0xbc] ss:$28 sps:$4 sm:$0xff]  }
 0x43a   :  { %v7763_v57 = vld [vmem:[#allocation14 + $0x280] ss:$28 sps:$4 sm:$0xff]  }
 0x43c   :  { %5739 = vmatpush1.bf16.msra.mxu1 %v7697_v58  ;;  %5903 = vmatpush1.bf16.msra.mxu0 %v7700_v4  ;;  %v7760_v58 = vld [vmem:[#allocation14 + $0xb8] ss:$28 sps:$4 sm:$0xff]   ;;  %v7764_v4 = vld [vmem:[#allocation14 + $0xc0] ss:$28 sps:$4 sm:$0xff]  }
 0x43d   :  { %5740 = vmatprep.subr.bf16.mxu1 %v7705_v59  ;;  %5904 = vmatprep.subr.bf16.mxu0 %v7708_v60  ;;  %v7767_v59 = vld [vmem:[#allocation14 + $0xf4] ss:$28 sps:$4 sm:$0xff]  }
 0x43e   :  { %v7765_v60 = vld [vmem:[#allocation14 + $0xf0] ss:$28 sps:$4 sm:$0xff]  }
 0x440   :  { %5741 = vmatpush1.bf16.msra.mxu1 %v7703_v62  ;;  %5905 = vmatpush1.bf16.msra.mxu0 %v7706_v63  ;;  %v7769_v62 = vld [vmem:[#allocation14 + $0xf8] ss:$28 sps:$4 sm:$0xff]   ;;  %v7772_v63 = vld [vmem:[#allocation14 + $0x12c] ss:$28 sps:$4 sm:$0xff]  }
 0x441   :  { %5742 = vmatprep.subr.bf16.mxu1 %v7711_v0  ;;  %5906 = vmatprep.subr.bf16.mxu0 %v7714_v1  ;;  %v7773_v0 = vld [vmem:[#allocation14 + $0x2f0] ss:$28 sps:$4 sm:$0xff]   ;;  %v7770_v1 = vld [vmem:[#allocation14 + $0x128] ss:$28 sps:$4 sm:$0xff]  }
 0x444   :  { %5743 = vmatpush1.bf16.msra.mxu1 %v7709_v3  ;;  %5907 = vmatpush1.bf16.msra.mxu0 %v7712_v6  ;;  %v7774_v3 = vld [vmem:[#allocation14 + $0x130] ss:$28 sps:$4 sm:$0xff]   ;;  %v7777_v6 = vld [vmem:[#allocation14 + $0x164] ss:$28 sps:$4 sm:$0xff]  }
 0x445   :  { %5744 = vmatprep.subr.bf16.mxu1 %v7717_v31  ;;  %5908 = vmatprep.subr.bf16.mxu0 %v7720_v5  ;;  %v7778_v31 = vld [vmem:[#allocation14 + $0x328] ss:$28 sps:$4 sm:$0xff]   ;;  %v7775_v5 = vld [vmem:[#allocation14 + $0x160] ss:$28 sps:$4 sm:$0xff]  }
 0x448   :  { %5745 = vmatpush1.bf16.msra.mxu1 %v7715_v7  ;;  %5909 = vmatpush1.bf16.msra.mxu0 %v7718_v8  ;;  %v7779_v7 = vld [vmem:[#allocation14 + $0x168] ss:$28 sps:$4 sm:$0xff]   ;;  %v7782_v8 = vld [vmem:[#allocation14 + $0x19c] ss:$28 sps:$4 sm:$0xff]  }
 0x449   :  { %5746 = vmatprep.subr.bf16.mxu1 %v7723_v9  ;;  %5910 = vmatprep.subr.bf16.mxu0 %v7726_v14  ;;  %v7783_v9 = vld [vmem:[#allocation14 + $0x360] ss:$28 sps:$4 sm:$0xff]   ;;  %v7780_v14 = vld [vmem:[#allocation14 + $0x198] ss:$28 sps:$4 sm:$0xff]  }
 0x44c   :  { %5747 = vmatpush1.bf16.msra.mxu1 %v7721_v29  ;;  %5911 = vmatpush1.bf16.msra.mxu0 %v7724_v20  ;;  %v7784_v29 = vld [vmem:[#allocation14 + $0x1a0] ss:$28 sps:$4 sm:$0xff]   ;;  %v7787_v20 = vld [vmem:[#allocation14 + $0x1d4] ss:$28 sps:$4 sm:$0xff]  }
 0x44d   :  { %5748 = vmatprep.subr.bf16.mxu1 %v7729_v21  ;;  %5912 = vmatprep.subr.bf16.mxu0 %v7732_v51  ;;  %v7788_v21 = vld [vmem:[#allocation14 + $0x558] ss:$28 sps:$4 sm:$0xff]   ;;  %v7785_v51 = vld [vmem:[#allocation14 + $0x1d0] ss:$28 sps:$4 sm:$0xff]  }
 0x450   :  { %5749 = vmatpush1.bf16.msra.mxu1 %v7727_v26  ;;  %5913 = vmatpush1.bf16.msra.mxu0 %v7730_v27  ;;  %v7792_v26 = vld [vmem:[#allocation14 + $0x20c] ss:$28 sps:$4 sm:$0xff]  }
 0x451   :  { %5750 = vmatprep.subr.bf16.mxu1 %v7735_v12  ;;  %5914 = vmatprep.subr.bf16.mxu0 %v7738_v13  ;;  %v7793_v27 = vld [vmem:[#allocation14 + $0x590] ss:$28 sps:$4 sm:$0xff]   ;;  %v7790_v12 = vld [vmem:[#allocation14 + $0x208] ss:$28 sps:$4 sm:$0xff]  }
 0x452   :  { %v7794_v13 = vld [vmem:[#allocation14 + $0x3d0] ss:$28 sps:$4 sm:$0xff]  }
 0x454   :  { %5751 = vmatpush1.bf16.msra.mxu1 %v7733_v18  ;;  %5915 = vmatpush1.bf16.msra.mxu0 %v7736_v19  ;;  %v7798_v18 = vld [vmem:[#allocation14 + $0x5c8] ss:$28 sps:$4 sm:$0xff]   ;;  %v7795_v19 = vld [vmem:[#allocation14 + $0x240] ss:$28 sps:$4 sm:$0xff]  }
 0x455   :  { %5752 = vmatprep.subr.bf16.mxu1 %v7741_v28  ;;  %5916 = vmatprep.subr.bf16.mxu0 %v7744_v30  ;;  %v7799_v28 = vld [vmem:[#allocation14 + $0x408] ss:$28 sps:$4 sm:$0xff]   ;;  %v7802_v30 = vld [vmem:[#allocation14 + $0x27c] ss:$28 sps:$4 sm:$0xff]  }
 0x458   :  { %5753 = vmatpush1.bf16.msra.mxu1 %v7739_v61  ;;  %5917 = vmatpush1.bf16.msra.mxu0 %v7742_v2  ;;  %v7800_v61 = vld [vmem:[#allocation14 + $0x278] ss:$28 sps:$4 sm:$0xff]   ;;  %v7804_v2 = vld [vmem:[#allocation14 + $0x440] ss:$28 sps:$4 sm:$0xff]  }
 0x459   :  { %5927 = vmatprep.subr.bf16.mxu1 %v7747_v36  ;;  %7068 = vmatprep.subr.bf16.mxu0 %v7748_v38  ;;  %v7807_v36 = vld [vmem:[#allocation14 + $0x2b4] ss:$28 sps:$4 sm:$0xff]  }
 0x45a   :  { %v7808_v38 = vld [vmem:[#allocation14 + $0x638] ss:$28 sps:$4 sm:$0xff]  }
 0x45b   :  { %5755 = vmatmul.mubr.bf16.vlgmr.msra.gmra.mrb[8].mxu1 %v8558_v40  ;;  %5919 = vmatmul.mubr.bf16.vlgmr.msra.gmra.mrb[20].mxu0 %v8558_v40 }
 0x45c   :  { %5928 = vmatpush1.bf16.msra.mxu1 %v7745_v54  ;;  %5959 = vmatprep.mubr.bf16.mxu1 %v8510_v22  ;;  %v7809_v54 = vld [vmem:[#allocation14 + $0x478] ss:$28 sps:$4 sm:$0xff]  }
 0x45d   :  { %7069 = vmatpush3.bf16.msra.mxu0 %v7749_v43  ;;  %6123 = vmatprep.mubr.bf16.mxu0 %v8510_v22  ;;  %v7768_v22 = vld [vmem:[#allocation14 + $0x2b8] ss:$28 sps:$4 sm:$0xff]   ;;  %v7812_v43 = vld [vmem:[#allocation14 + $0x2ec] ss:$28 sps:$4 sm:$0xff]  }
 0x45e   :  { %5929 = vmatprep.subr.bf16.mxu1 %v7752_v44  ;;  %7070 = vmatprep.subr.bf16.mxu0 %v7753_v45  ;;  %v7813_v44 = vld [vmem:[#allocation14 + $0x670] ss:$28 sps:$4 sm:$0xff]   ;;  %v7810_v45 = vld [vmem:[#allocation14 + $0x2e8] ss:$28 sps:$4 sm:$0xff]  }
 0x460   :  { %5930 = vmatpush1.bf16.msra.mxu1 %v7750_v46  ;;  %v7814_v46 = vld [vmem:[#allocation14 + $0x4b0] ss:$28 sps:$4 sm:$0xff]  }
 0x461   :  { %7071 = vmatpush3.bf16.msra.mxu0 %v7754_v47  ;;  %5931 = vmatprep.subr.bf16.mxu1 %v7757_v48  ;;  %v7817_v47 = vld [vmem:[#allocation14 + $0x324] ss:$28 sps:$4 sm:$0xff]  }
 0x462   :  { %7072 = vmatprep.subr.bf16.mxu0 %v7758_v49  ;;  %v7818_v48 = vld [vmem:[#allocation14 + $0x6a8] ss:$28 sps:$4 sm:$0xff]   ;;  %v7815_v49 = vld [vmem:[#allocation14 + $0x320] ss:$28 sps:$4 sm:$0xff]  }
 0x464   :  { %5932 = vmatpush1.bf16.msra.mxu1 %v7755_v52  ;;  %v7819_v52 = vld [vmem:[#allocation14 + $0x4e8] ss:$28 sps:$4 sm:$0xff]  }
 0x465   :  { %7073 = vmatpush3.bf16.msra.mxu0 %v7759_v53  ;;  %5933 = vmatprep.subr.bf16.mxu1 %v7762_v56  ;;  %v7822_v53 = vld [vmem:[#allocation14 + $0x35c] ss:$28 sps:$4 sm:$0xff]  }
 0x466   :  { %7074 = vmatprep.subr.bf16.mxu0 %v7763_v57  ;;  %v7823_v56 = vld [vmem:[#allocation14 + $0x6e0] ss:$28 sps:$4 sm:$0xff]   ;;  %v7820_v57 = vld [vmem:[#allocation14 + $0x358] ss:$28 sps:$4 sm:$0xff]  }
 0x468   :  { %5934 = vmatpush1.bf16.msra.mxu1 %v7760_v58  ;;  %v7824_v58 = vld [vmem:[#allocation14 + $0x520] ss:$28 sps:$4 sm:$0xff]  }
 0x469   :  { %7075 = vmatpush3.bf16.msra.mxu0 %v7764_v4  ;;  %5935 = vmatprep.subr.bf16.mxu1 %v7767_v59  ;;  %v7827_v4 = vld [vmem:[#allocation14 + $0x394] ss:$28 sps:$4 sm:$0xff]  }
 0x46a   :  { %7076 = vmatprep.subr.bf16.mxu0 %v7768_v22  ;;  %v7828_v59 = vld [vmem:[#allocation14 + $0x8d8] ss:$28 sps:$4 sm:$0xff]   ;;  %v7825_v22 = vld [vmem:[#allocation14 + $0x390] ss:$28 sps:$4 sm:$0xff]  }
 0x46c   :  { %5936 = vmatpush1.bf16.msra.mxu1 %v7765_v60  ;;  %v7829_v60 = vld [vmem:[#allocation14 + $0x718] ss:$28 sps:$4 sm:$0xff]  }
 0x46d   :  { %7077 = vmatpush3.bf16.msra.mxu0 %v7769_v62  ;;  %5937 = vmatprep.subr.bf16.mxu1 %v7772_v63  ;;  %v7832_v62 = vld [vmem:[#allocation14 + $0x3cc] ss:$28 sps:$4 sm:$0xff]  }
 0x46e   :  { %7078 = vmatprep.subr.bf16.mxu0 %v7773_v0  ;;  %v7833_v63 = vld [vmem:[#allocation14 + $0x910] ss:$28 sps:$4 sm:$0xff]   ;;  %v7830_v0 = vld [vmem:[#allocation14 + $0x3c8] ss:$28 sps:$4 sm:$0xff]  }
 0x470   :  { %5938 = vmatpush1.bf16.msra.mxu1 %v7770_v1  ;;  %v7834_v1 = vld [vmem:[#allocation14 + $0x750] ss:$28 sps:$4 sm:$0xff]  }
 0x471   :  { %7079 = vmatpush3.bf16.msra.mxu0 %v7774_v3  ;;  %5939 = vmatprep.subr.bf16.mxu1 %v7777_v6  ;;  %v7837_v3 = vld [vmem:[#allocation14 + $0x404] ss:$28 sps:$4 sm:$0xff]  }
 0x472   :  { %7080 = vmatprep.subr.bf16.mxu0 %v7778_v31  ;;  %v7838_v6 = vld [vmem:[#allocation14 + $0x948] ss:$28 sps:$4 sm:$0xff]   ;;  %v7835_v31 = vld [vmem:[#allocation14 + $0x400] ss:$28 sps:$4 sm:$0xff]  }
 0x474   :  { %5940 = vmatpush1.bf16.msra.mxu1 %v7775_v5  ;;  %v7842_v5 = vld [vmem:[#allocation14 + $0x43c] ss:$28 sps:$4 sm:$0xff]  }
 0x475   :  { %7081 = vmatpush3.bf16.msra.mxu0 %v7779_v7  ;;  %5941 = vmatprep.subr.bf16.mxu1 %v7782_v8  ;;  %v7843_v7 = vld [vmem:[#allocation14 + $0x980] ss:$28 sps:$4 sm:$0xff]   ;;  %v7840_v8 = vld [vmem:[#allocation14 + $0x438] ss:$28 sps:$4 sm:$0xff]  }
 0x476   :  { %7082 = vmatprep.subr.bf16.mxu0 %v7783_v9  ;;  %v7847_v9 = vld [vmem:[#allocation14 + $0x474] ss:$28 sps:$4 sm:$0xff]  }
 0x478   :  { %5942 = vmatpush1.bf16.msra.mxu1 %v7780_v14  ;;  %v7848_v14 = vld [vmem:[#allocation14 + $0x9b8] ss:$28 sps:$4 sm:$0xff]  }
 0x479   :  { %7083 = vmatpush3.bf16.msra.mxu0 %v7784_v29  ;;  %5943 = vmatprep.subr.bf16.mxu1 %v7787_v20  ;;  %v7845_v29 = vld [vmem:[#allocation14 + $0x470] ss:$28 sps:$4 sm:$0xff]   ;;  %v7849_v20 = vld [vmem:[#allocation14 + $0x7f8] ss:$28 sps:$4 sm:$0xff]  }
 0x47a   :  { %7090 = vmatprep.subr.bf16.mxu0 %v7788_v21  ;;  %v7852_v21 = vld [vmem:[#allocation14 + $0x4ac] ss:$28 sps:$4 sm:$0xff]  }
 0x47c   :  { %6124 = vmatmul.mubr.bf16.vlgmr.msra.gmra.mrb[24].mxu0 %v8512_v25  ;;  %5944 = vmatpush1.bf16.msra.mxu1 %v7785_v51  ;;  %v7853_v51 = vld [vmem:[#allocation14 + $0x9f0] ss:$28 sps:$4 sm:$0xff]  }
 0x47d   :  { %7091 = vmatpush3.bf16.msra.mxu0 %v7789_v24  ;;  %6163 = vmatprep.mubr.bf16.mxu0 %v8516_v11  ;;  %v7850_v24 = vld [vmem:[#allocation14 + $0x4a8] ss:$28 sps:$4 sm:$0xff]  }
 0x47e   :  { %5945 = vmatprep.subr.bf16.mxu1 %v7792_v26  ;;  %7092 = vmatprep.subr.bf16.mxu0 %v7793_v27  ;;  %v7854_v26 = vld [vmem:[#allocation14 + $0x830] ss:$28 sps:$4 sm:$0xff]   ;;  %v7857_v27 = vld [vmem:[#allocation14 + $0x4e4] ss:$28 sps:$4 sm:$0xff]  }
 0x480   :  { %5946 = vmatpush1.bf16.msra.mxu1 %v7790_v12  ;;  %v7858_v12 = vld [vmem:[#allocation14 + $0xa28] ss:$28 sps:$4 sm:$0xff]  }
 0x481   :  { %7093 = vmatpush3.bf16.msra.mxu0 %v7794_v13  ;;  %5947 = vmatprep.subr.bf16.mxu1 %v7797_v17  ;;  %v7855_v13 = vld [vmem:[#allocation14 + $0x4e0] ss:$28 sps:$4 sm:$0xff]   ;;  %v7859_v17 = vld [vmem:[#allocation14 + $0x868] ss:$28 sps:$4 sm:$0xff]  }
 0x482   :  { %7094 = vmatprep.subr.bf16.mxu0 %v7798_v18  ;;  %v7862_v18 = vld [vmem:[#allocation14 + $0x51c] ss:$28 sps:$4 sm:$0xff]  }
 0x484   :  { %5948 = vmatpush1.bf16.msra.mxu1 %v7795_v19  ;;  %v7863_v19 = vld [vmem:[#allocation14 + $0xa60] ss:$28 sps:$4 sm:$0xff]  }
 0x485   :  { %7095 = vmatpush3.bf16.msra.mxu0 %v7799_v28  ;;  %5949 = vmatprep.subr.bf16.mxu1 %v7802_v30  ;;  %v7860_v28 = vld [vmem:[#allocation14 + $0x518] ss:$28 sps:$4 sm:$0xff]   ;;  %v7864_v30 = vld [vmem:[#allocation14 + $0x8a0] ss:$28 sps:$4 sm:$0xff]  }
 0x486   :  { %7096 = vmatprep.subr.bf16.mxu0 %v7803_v32  ;;  %v7867_v32 = vld [vmem:[#allocation14 + $0x554] ss:$28 sps:$4 sm:$0xff]  }
 0x488   :  { %5950 = vmatpush1.bf16.msra.mxu1 %v7800_v61  ;;  %v7868_v61 = vld [vmem:[#allocation14 + $0xc58] ss:$28 sps:$4 sm:$0xff]  }
 0x489   :  { %7097 = vmatpush3.bf16.msra.mxu0 %v7804_v2  ;;  %5951 = vmatprep.subr.bf16.mxu1 %v7807_v36  ;;  %v7865_v2 = vld [vmem:[#allocation14 + $0x550] ss:$28 sps:$4 sm:$0xff]   ;;  %v7869_v36 = vld [vmem:[#allocation14 + $0xa98] ss:$28 sps:$4 sm:$0xff]  }
 0x48a   :  { %7098 = vmatprep.subr.bf16.mxu0 %v7808_v38  ;;  %v7872_v38 = vld [vmem:[#allocation14 + $0x58c] ss:$28 sps:$4 sm:$0xff]  }
 0x48c   :  { %5952 = vmatpush1.bf16.msra.mxu1 %v7805_v39  ;;  %v7873_v39 = vld [vmem:[#allocation14 + $0xc90] ss:$28 sps:$4 sm:$0xff]  }
 0x48d   :  { %7099 = vmatpush3.bf16.msra.mxu0 %v7809_v54  ;;  %5953 = vmatprep.subr.bf16.mxu1 %v7812_v43  ;;  %v7870_v54 = vld [vmem:[#allocation14 + $0x588] ss:$28 sps:$4 sm:$0xff]   ;;  %v7874_v43 = vld [vmem:[#allocation14 + $0xad0] ss:$28 sps:$4 sm:$0xff]  }
 0x48e   :  { %7100 = vmatprep.subr.bf16.mxu0 %v7813_v44  ;;  %v7877_v44 = vld [vmem:[#allocation14 + $0x5c4] ss:$28 sps:$4 sm:$0xff]  }
 0x490   :  { %5954 = vmatpush1.bf16.msra.mxu1 %v7810_v45  ;;  %v7878_v45 = vld [vmem:[#allocation14 + $0xcc8] ss:$28 sps:$4 sm:$0xff]  }
 0x491   :  { %7101 = vmatpush3.bf16.msra.mxu0 %v7814_v46  ;;  %5955 = vmatprep.subr.bf16.mxu1 %v7817_v47  ;;  %v7875_v46 = vld [vmem:[#allocation14 + $0x5c0] ss:$28 sps:$4 sm:$0xff]   ;;  %v7879_v47 = vld [vmem:[#allocation14 + $0xb08] ss:$28 sps:$4 sm:$0xff]  }
 0x492   :  { %7102 = vmatprep.subr.bf16.mxu0 %v7818_v48  ;;  %v7882_v48 = vld [vmem:[#allocation14 + $0x5fc] ss:$28 sps:$4 sm:$0xff]  }
 0x494   :  { %5956 = vmatpush1.bf16.msra.mxu1 %v7815_v49  ;;  %v7883_v49 = vld [vmem:[#allocation14 + $0xd00] ss:$28 sps:$4 sm:$0xff]  }
 0x495   :  { %7103 = vmatpush3.bf16.msra.mxu0 %v7819_v52  ;;  %5957 = vmatprep.subr.bf16.mxu1 %v7822_v53  ;;  %v7880_v52 = vld [vmem:[#allocation14 + $0x5f8] ss:$28 sps:$4 sm:$0xff]   ;;  %v7884_v53 = vld [vmem:[#allocation14 + $0xb40] ss:$28 sps:$4 sm:$0xff]  }
 0x496   :  { %7104 = vmatprep.subr.bf16.mxu0 %v7823_v56  ;;  %v7887_v56 = vld [vmem:[#allocation14 + $0x634] ss:$28 sps:$4 sm:$0xff]  }
 0x498   :  { %5958 = vmatpush1.bf16.msra.mxu1 %v7820_v57  ;;  %v7888_v57 = vld [vmem:[#allocation14 + $0xd38] ss:$28 sps:$4 sm:$0xff]  }
 0x499   :  { %7105 = vmatpush3.bf16.msra.mxu0 %v7824_v58  ;;  %5968 = vmatprep.subr.bf16.mxu1 %v7827_v4  ;;  %v7885_v58 = vld [vmem:[#allocation14 + $0x630] ss:$28 sps:$4 sm:$0xff]   ;;  %v7889_v4 = vld [vmem:[#allocation14 + $0xb78] ss:$28 sps:$4 sm:$0xff]  }
 0x49a   :  { %7112 = vmatprep.subr.bf16.mxu0 %v7828_v59  ;;  %v7892_v59 = vld [vmem:[#allocation14 + $0x66c] ss:$28 sps:$4 sm:$0xff]  }
 0x49b   :  { %5960 = vmatmul.mubr.bf16.vlgmr.msra.gmra.mrb[12].mxu1 %v8512_v25  ;;  %v7839_v25 = vld [vmem:[#allocation14 + $0x788] ss:$28 sps:$4 sm:$0xff]  }
 0x49c   :  { %6164 = vmatmul.mubr.bf16.vlgmr.msra.gmra.mrb[28].mxu0 %v8525_v37  ;;  %5969 = vmatpush1.bf16.msra.mxu1 %v7825_v22  ;;  %v7893_v22 = vld [vmem:[#allocation14 + $0xd70] ss:$28 sps:$4 sm:$0xff]  }
 0x49d   :  { %6000 = vmatprep.mubr.bf16.mxu1 %v8516_v11  ;;  %7113 = vmatpush3.bf16.msra.mxu0 %v7829_v60  ;;  %v7844_v11 = vld [vmem:[#allocation14 + $0x7c0] ss:$28 sps:$4 sm:$0xff]   ;;  %v7890_v60 = vld [vmem:[#allocation14 + $0x668] ss:$28 sps:$4 sm:$0xff]  }
 0x49e   :  { %6203 = vmatprep.mubr.bf16.mxu0 %v8541_v10  ;;  %5970 = vmatprep.subr.bf16.mxu1 %v7832_v62  ;;  %v7894_v62 = vld [vmem:[#allocation14 + $0xbb0] ss:$28 sps:$4 sm:$0xff]  }
 0x49f   :  { %7114 = vmatprep.subr.bf16.mxu0 %v7833_v63  ;;  %v7897_v63 = vld [vmem:[#allocation14 + $0x6a4] ss:$28 sps:$4 sm:$0xff]  }
 0x4a0   :  { %5971 = vmatpush1.bf16.msra.mxu1 %v7830_v0  ;;  %v7898_v0 = vld [vmem:[#allocation14 + $0xda8] ss:$28 sps:$4 sm:$0xff]  }
 0x4a1   :  { %7115 = vmatpush3.bf16.msra.mxu0 %v7834_v1  ;;  %5972 = vmatprep.subr.bf16.mxu1 %v7837_v3  ;;  %v7895_v1 = vld [vmem:[#allocation14 + $0x6a0] ss:$28 sps:$4 sm:$0xff]   ;;  %v7899_v3 = vld [vmem:[#allocation14 + $0xbe8] ss:$28 sps:$4 sm:$0xff]  }
 0x4a2   :  { %7116 = vmatprep.subr.bf16.mxu0 %v7838_v6  ;;  %v7902_v6 = vld [vmem:[#allocation14 + $0x6dc] ss:$28 sps:$4 sm:$0xff]  }
 0x4a4   :  { %5973 = vmatpush1.bf16.msra.mxu1 %v7835_v31  ;;  %v7903_v31 = vld [vmem:[#allocation14 + $0xde0] ss:$28 sps:$4 sm:$0xff]  }
 0x4a5   :  { %7117 = vmatpush3.bf16.msra.mxu0 %v7839_v25  ;;  %5974 = vmatprep.subr.bf16.mxu1 %v7842_v5  ;;  %v7900_v25 = vld [vmem:[#allocation14 + $0x6d8] ss:$28 sps:$4 sm:$0xff]   ;;  %v7904_v5 = vld [vmem:[#allocation14 + $0xc20] ss:$28 sps:$4 sm:$0xff]  }
 0x4a6   :  { %7118 = vmatprep.subr.bf16.mxu0 %v7843_v7  ;;  %v7907_v7 = vld [vmem:[#allocation14 + $0x714] ss:$28 sps:$4 sm:$0xff]  }
 0x4a8   :  { %5975 = vmatpush1.bf16.msra.mxu1 %v7840_v8  ;;  %v7905_v8 = vld [vmem:[#allocation14 + $0x710] ss:$28 sps:$4 sm:$0xff]  }
 0x4a9   :  { %7119 = vmatpush3.bf16.msra.mxu0 %v7844_v11  ;;  %5976 = vmatprep.subr.bf16.mxu1 %v7847_v9  ;;  %v7910_v11 = vld [vmem:[#allocation14 + $0x74c] ss:$28 sps:$4 sm:$0xff]  }
 0x4aa   :  { %7120 = vmatprep.subr.bf16.mxu0 %v7848_v14  ;;  %v7908_v9 = vld [vmem:[#allocation14 + $0x748] ss:$28 sps:$4 sm:$0xff]  }
 0x4ab   :  { %v7913_v14 = vld [vmem:[#allocation14 + $0x784] ss:$28 sps:$4 sm:$0xff]  }
 0x4ac   :  { %5977 = vmatpush1.bf16.msra.mxu1 %v7845_v29  ;;  %v7911_v29 = vld [vmem:[#allocation14 + $0x780] ss:$28 sps:$4 sm:$0xff]  }
 0x4ad   :  { %7121 = vmatpush3.bf16.msra.mxu0 %v7849_v20  ;;  %5978 = vmatprep.subr.bf16.mxu1 %v7852_v21  ;;  %v7916_v20 = vld [vmem:[#allocation14 + $0x7bc] ss:$28 sps:$4 sm:$0xff]  }
 0x4ae   :  { %7122 = vmatprep.subr.bf16.mxu0 %v7853_v51  ;;  %v7914_v21 = vld [vmem:[#allocation14 + $0x7b8] ss:$28 sps:$4 sm:$0xff]  }
 0x4af   :  { %v7919_v51 = vld [vmem:[#allocation14 + $0x7f4] ss:$28 sps:$4 sm:$0xff]  }
 0x4b0   :  { %5979 = vmatpush1.bf16.msra.mxu1 %v7850_v24  ;;  %v7917_v24 = vld [vmem:[#allocation14 + $0x7f0] ss:$28 sps:$4 sm:$0xff]  }
 0x4b1   :  { %7123 = vmatpush3.bf16.msra.mxu0 %v7854_v26  ;;  %5980 = vmatprep.subr.bf16.mxu1 %v7857_v27  ;;  %v7920_v26 = vld [vmem:[#allocation14 + $0x828] ss:$28 sps:$4 sm:$0xff]  }
 0x4b2   :  { %7124 = vmatprep.subr.bf16.mxu0 %v7858_v12  ;;  %v7925_v27 = vld [vmem:[#allocation14 + $0x864] ss:$28 sps:$4 sm:$0xff]   ;;  %v7928_v12 = vld [vmem:[#allocation14 + $0x89c] ss:$28 sps:$4 sm:$0xff]  }
 0x4b4   :  { %5981 = vmatpush1.bf16.msra.mxu1 %v7855_v13  ;;  %v7926_v13 = vld [vmem:[#allocation14 + $0x898] ss:$28 sps:$4 sm:$0xff]  }
 0x4b5   :  { %7125 = vmatpush3.bf16.msra.mxu0 %v7859_v17  ;;  %5982 = vmatprep.subr.bf16.mxu1 %v7862_v18  ;;  %v7931_v17 = vld [vmem:[#allocation14 + $0x8d4] ss:$28 sps:$4 sm:$0xff]  }
 0x4b6   :  { %7126 = vmatprep.subr.bf16.mxu0 %v7863_v19  ;;  %v7929_v18 = vld [vmem:[#allocation14 + $0x8d0] ss:$28 sps:$4 sm:$0xff]  }
 0x4b7   :  { %v7934_v19 = vld [vmem:[#allocation14 + $0x90c] ss:$28 sps:$4 sm:$0xff]  }
 0x4b8   :  { %5983 = vmatpush1.bf16.msra.mxu1 %v7860_v28  ;;  %v7932_v28 = vld [vmem:[#allocation14 + $0x908] ss:$28 sps:$4 sm:$0xff]  }
 0x4b9   :  { %7127 = vmatpush3.bf16.msra.mxu0 %v7864_v30  ;;  %5984 = vmatprep.subr.bf16.mxu1 %v7867_v32  ;;  %v7937_v30 = vld [vmem:[#allocation14 + $0x944] ss:$28 sps:$4 sm:$0xff]  }
 0x4ba   :  { %7134 = vmatprep.subr.bf16.mxu0 %v7868_v61  ;;  %v7935_v32 = vld [vmem:[#allocation14 + $0x940] ss:$28 sps:$4 sm:$0xff]  }
 0x4bb   :  { %v7940_v61 = vld [vmem:[#allocation14 + $0x97c] ss:$28 sps:$4 sm:$0xff]  }
 0x4bc   :  { %6204 = vmatmul.mubr.bf16.vlgmr.msra.gmra.mrb[32].mxu0 %v8543_v16  ;;  %5985 = vmatpush1.bf16.msra.mxu1 %v7865_v2  ;;  %v7938_v2 = vld [vmem:[#allocation14 + $0x978] ss:$28 sps:$4 sm:$0xff]  }
 0x4bd   :  { %7135 = vmatpush3.bf16.msra.mxu0 %v7869_v36  ;;  %6243 = vmatprep.mubr.bf16.mxu0 %v8547_v23  ;;  %v7943_v36 = vld [vmem:[#allocation14 + $0x9b4] ss:$28 sps:$4 sm:$0xff]  }
 0x4be   :  { %5986 = vmatprep.subr.bf16.mxu1 %v7872_v38  ;;  %7136 = vmatprep.subr.bf16.mxu0 %v7873_v39  ;;  %v7941_v38 = vld [vmem:[#allocation14 + $0x9b0] ss:$28 sps:$4 sm:$0xff]  }
 0x4bf   :  { %v7946_v39 = vld [vmem:[#allocation14 + $0x9ec] ss:$28 sps:$4 sm:$0xff]  }
 0x4c0   :  { %5987 = vmatpush1.bf16.msra.mxu1 %v7870_v54  ;;  %v7944_v54 = vld [vmem:[#allocation14 + $0x9e8] ss:$28 sps:$4 sm:$0xff]  }
 0x4c1   :  { %7137 = vmatpush3.bf16.msra.mxu0 %v7874_v43  ;;  %5988 = vmatprep.subr.bf16.mxu1 %v7877_v44  ;;  %v7949_v43 = vld [vmem:[#allocation14 + $0xa24] ss:$28 sps:$4 sm:$0xff]  }
 0x4c2   :  { %7138 = vmatprep.subr.bf16.mxu0 %v7878_v45  ;;  %v7947_v44 = vld [vmem:[#allocation14 + $0xa20] ss:$28 sps:$4 sm:$0xff]  }
 0x4c3   :  { %v7952_v45 = vld [vmem:[#allocation14 + $0xa5c] ss:$28 sps:$4 sm:$0xff]  }
 0x4c4   :  { %5989 = vmatpush1.bf16.msra.mxu1 %v7875_v46  ;;  %v7950_v46 = vld [vmem:[#allocation14 + $0xa58] ss:$28 sps:$4 sm:$0xff]  }
 0x4c5   :  { %7139 = vmatpush3.bf16.msra.mxu0 %v7879_v47  ;;  %5990 = vmatprep.subr.bf16.mxu1 %v7882_v48  ;;  %v7955_v47 = vld [vmem:[#allocation14 + $0xa94] ss:$28 sps:$4 sm:$0xff]  }
 0x4c6   :  { %7140 = vmatprep.subr.bf16.mxu0 %v7883_v49  ;;  %v7953_v48 = vld [vmem:[#allocation14 + $0xa90] ss:$28 sps:$4 sm:$0xff]  }
 0x4c7   :  { %v7958_v49 = vld [vmem:[#allocation14 + $0xacc] ss:$28 sps:$4 sm:$0xff]  }
 0x4c8   :  { %5991 = vmatpush1.bf16.msra.mxu1 %v7880_v52  ;;  %v7956_v52 = vld [vmem:[#allocation14 + $0xac8] ss:$28 sps:$4 sm:$0xff]  }
 0x4c9   :  { %7141 = vmatpush3.bf16.msra.mxu0 %v7884_v53  ;;  %5992 = vmatprep.subr.bf16.mxu1 %v7887_v56  ;;  %v7961_v53 = vld [vmem:[#allocation14 + $0xb04] ss:$28 sps:$4 sm:$0xff]  }
 0x4ca   :  { %7142 = vmatprep.subr.bf16.mxu0 %v7888_v57  ;;  %v7959_v56 = vld [vmem:[#allocation14 + $0xb00] ss:$28 sps:$4 sm:$0xff]  }
 0x4cb   :  { %v7964_v57 = vld [vmem:[#allocation14 + $0xb3c] ss:$28 sps:$4 sm:$0xff]  }
 0x4cc   :  { %5993 = vmatpush1.bf16.msra.mxu1 %v7885_v58  ;;  %v7962_v58 = vld [vmem:[#allocation14 + $0xb38] ss:$28 sps:$4 sm:$0xff]  }
 0x4cd   :  { %7143 = vmatpush3.bf16.msra.mxu0 %v7889_v4  ;;  %5994 = vmatprep.subr.bf16.mxu1 %v7892_v59  ;;  %v7967_v4 = vld [vmem:[#allocation14 + $0xb74] ss:$28 sps:$4 sm:$0xff]  }
 0x4ce   :  { %7144 = vmatprep.subr.bf16.mxu0 %v7893_v22  ;;  %v7965_v59 = vld [vmem:[#allocation14 + $0xb70] ss:$28 sps:$4 sm:$0xff]   ;;  %v8577_v22 = vld [vmem:[#allocation16] sm:$0xff] }
 0x4d0   :  { %5995 = vmatpush1.bf16.msra.mxu1 %v7890_v60  ;;  %v3271_v60 = vrot.slane %v8577_v22, %v8475_v50 }
 0x4d1   :  { %7145 = vmatpush3.bf16.msra.mxu0 %v7894_v62  ;;  %5996 = vmatprep.subr.bf16.mxu1 %v7897_v63  ;;  %v3267_v62 = vrot.slane %v8577_v22, %v8430_v42  ;;  %v3275_v63 = vrot.slane %v8577_v22, %v8478_v55  ;;  %v7976_v55 = vld [vmem:[#allocation14 + $0xc1c] ss:$28 sps:$4 sm:$0xff]  }
 0x4d2   :  { %7146 = vmatprep.subr.bf16.mxu0 %v7898_v0  ;;  %v7968_v0 = vld [vmem:[#allocation14 + $0xba8] ss:$28 sps:$4 sm:$0xff]  }
 0x4d4   :  { %5997 = vmatpush1.bf16.msra.mxu1 %v7895_v1  ;;  %v7973_v1 = vld [vmem:[#allocation14 + $0xbe4] ss:$28 sps:$4 sm:$0xff]  }
 0x4d5   :  { %7147 = vmatpush3.bf16.msra.mxu0 %v7899_v3  ;;  %5998 = vmatprep.subr.bf16.mxu1 %v7902_v6 }
 0x4d6   :  { %7148 = vmatprep.subr.bf16.mxu0 %v7903_v31 }
 0x4d8   :  { %5999 = vmatpush1.bf16.msra.mxu1 %v7900_v25 }
 0x4d9   :  { %7149 = vmatpush3.bf16.msra.mxu0 %v7904_v5  ;;  %6009 = vmatprep.subr.bf16.mxu1 %v7907_v7 }
 0x4db   :  { %6001 = vmatmul.mubr.bf16.vlgmr.msra.gmra.mrb[12].mxu1 %v8525_v37  ;;  %v7922_v37 = vld [vmem:[#allocation14 + $0x82c] ss:$28 sps:$4 sm:$0xff]  }
 0x4dc   :  { %6244 = vmatmul.mubr.bf16.vlgmr.msra.gmra.mrb[36].mxu0 %v8558_v40  ;;  %6010 = vmatpush1.bf16.msra.mxu1 %v7905_v8 }
 0x4dd   :  { %6041 = vmatprep.mubr.bf16.mxu1 %v8541_v10  ;;  %6011 = vmatprep.subr.bf16.mxu1 %v7910_v11  ;;  %v7923_v10 = vld [vmem:[#allocation14 + $0x860] ss:$28 sps:$4 sm:$0xff]  }
 0x4e0   :  { %6012 = vmatpush1.bf16.msra.mxu1 %v7908_v9  ;;  %v7971_v9 = vld [vmem:[#allocation14 + $0xbe0] ss:$28 sps:$4 sm:$0xff]  }
 0x4e1   :  { %6013 = vmatprep.subr.bf16.mxu1 %v7913_v14 }
 0x4e4   :  { %6014 = vmatpush1.bf16.msra.mxu1 %v7911_v29  ;;  %v7974_v29 = vld [vmem:[#allocation14 + $0xc18] ss:$28 sps:$4 sm:$0xff]  }
 0x4e5   :  { %6015 = vmatprep.subr.bf16.mxu1 %v7916_v20  ;;  %v7979_v20 = vld [vmem:[#allocation14 + $0xc54] ss:$28 sps:$4 sm:$0xff]  }
 0x4e8   :  { %6016 = vmatpush1.bf16.msra.mxu1 %v7914_v21  ;;  %v7977_v21 = vld [vmem:[#allocation14 + $0xc50] ss:$28 sps:$4 sm:$0xff]  }
 0x4e9   :  { %6017 = vmatprep.subr.bf16.mxu1 %v7919_v51  ;;  %v7982_v51 = vld [vmem:[#allocation14 + $0xc8c] ss:$28 sps:$4 sm:$0xff]  }
 0x4ec   :  { %6018 = vmatpush1.bf16.msra.mxu1 %v7917_v24 }
 0x4ed   :  { %6019 = vmatprep.subr.bf16.mxu1 %v7922_v37 }
 0x4f0   :  { %6020 = vmatpush1.bf16.msra.mxu1 %v7920_v26  ;;  %v7980_v26 = vld [vmem:[#allocation14 + $0xc88] ss:$28 sps:$4 sm:$0xff]  }
 0x4f1   :  { %6021 = vmatprep.subr.bf16.mxu1 %v7925_v27 }
 0x4f4   :  { %6022 = vmatpush1.bf16.msra.mxu1 %v7923_v10  ;;  %v7985_v10 = vld [vmem:[#allocation14 + $0xcc4] ss:$28 sps:$4 sm:$0xff]  }
 0x4f5   :  { %6023 = vmatprep.subr.bf16.mxu1 %v7928_v12 }
 0x4f8   :  { %6024 = vmatpush1.bf16.msra.mxu1 %v7926_v13  ;;  %v7983_v13 = vld [vmem:[#allocation14 + $0xcc0] ss:$28 sps:$4 sm:$0xff]  }
 0x4f9   :  { %6025 = vmatprep.subr.bf16.mxu1 %v7931_v17  ;;  %v7988_v17 = vld [vmem:[#allocation14 + $0xcfc] ss:$28 sps:$4 sm:$0xff]  }
 0x4fc   :  { %6026 = vmatpush1.bf16.msra.mxu1 %v7929_v18  ;;  %v7986_v18 = vld [vmem:[#allocation14 + $0xcf8] ss:$28 sps:$4 sm:$0xff]  }
 0x4fd   :  { %6027 = vmatprep.subr.bf16.mxu1 %v7934_v19  ;;  %v7991_v19 = vld [vmem:[#allocation14 + $0xd34] ss:$28 sps:$4 sm:$0xff]  }
 0x500   :  { %6028 = vmatpush1.bf16.msra.mxu1 %v7932_v28  ;;  %v7989_v28 = vld [vmem:[#allocation14 + $0xd30] ss:$28 sps:$4 sm:$0xff]  }
 0x501   :  { %6029 = vmatprep.subr.bf16.mxu1 %v7937_v30  ;;  %v7994_v30 = vld [vmem:[#allocation14 + $0xd6c] ss:$28 sps:$4 sm:$0xff]  }
 0x504   :  { %6030 = vmatpush1.bf16.msra.mxu1 %v7935_v32  ;;  %v7992_v32 = vld [vmem:[#allocation14 + $0xd68] ss:$28 sps:$4 sm:$0xff]  }
 0x505   :  { %6031 = vmatprep.subr.bf16.mxu1 %v7940_v61  ;;  %v7997_v61 = vld [vmem:[#allocation14 + $0xda4] ss:$28 sps:$4 sm:$0xff]  }
 0x508   :  { %6032 = vmatpush1.bf16.msra.mxu1 %v7938_v2 }
 0x509   :  { %6033 = vmatprep.subr.bf16.mxu1 %v7943_v36 }
 0x50c   :  { %6034 = vmatpush1.bf16.msra.mxu1 %v7941_v38  ;;  %v7995_v38 = vld [vmem:[#allocation14 + $0xda0] ss:$28 sps:$4 sm:$0xff]  }
 0x50d   :  { %6035 = vmatprep.subr.bf16.mxu1 %v7946_v39 }
 0x510   :  { %6036 = vmatpush1.bf16.msra.mxu1 %v7944_v54 }
 0x511   :  { %6037 = vmatprep.subr.bf16.mxu1 %v7949_v43  ;;  %v8000_v43 = vld [vmem:[#allocation14 + $0xddc] ss:$28 sps:$4 sm:$0xff]  }
 0x514   :  { %6038 = vmatpush1.bf16.msra.mxu1 %v7947_v44 }
 0x515   :  { %6039 = vmatprep.subr.bf16.mxu1 %v7952_v45  ;;  %v7998_v45 = vld [vmem:[#allocation14 + $0xdd8] ss:$28 sps:$4 sm:$0xff]  }
 0x518   :  { %6040 = vmatpush1.bf16.msra.mxu1 %v7950_v46  ;;  %v3287_v46 = vrot.slane %v8577_v22, %v1092_v15 }
 0x519   :  { %6050 = vmatprep.subr.bf16.mxu1 %v7955_v47 }
 0x51b   :  { %6042 = vmatmul.mubr.bf16.vlgmr.msra.gmra.mrb[12].mxu1 %v8543_v16  ;;  %v7970_v16 = vld [vmem:[#allocation14 + $0xbac] ss:$28 sps:$4 sm:$0xff]  }
 0x51c   :  { %6051 = vmatpush1.bf16.msra.mxu1 %v7953_v48  ;;  %6082 = vmatprep.mubr.bf16.mxu1 %v8547_v23  ;;  %v3263_v23 = vrot.slane %v8577_v22, %v8427_v41 }
 0x51d   :  { %6052 = vmatprep.subr.bf16.mxu1 %v7958_v49 }
 0x520   :  { %6053 = vmatpush1.bf16.msra.mxu1 %v7956_v52 }
 0x521   :  { %6054 = vmatprep.subr.bf16.mxu1 %v7961_v53 }
 0x524   :  { %6055 = vmatpush1.bf16.msra.mxu1 %v7959_v56 }
 0x525   :  { %6056 = vmatprep.subr.bf16.mxu1 %v7964_v57 }
 0x528   :  { %6057 = vmatpush1.bf16.msra.mxu1 %v7962_v58 }
 0x529   :  { %6058 = vmatprep.subr.bf16.mxu1 %v7967_v4 }
 0x52c   :  { %6059 = vmatpush1.bf16.msra.mxu1 %v7965_v59 }
 0x52d   :  { %6060 = vmatprep.subr.bf16.mxu1 %v7970_v16 }
 0x52e   :  { %v5756_v3 = vpop.f32.mrb[8].mxu1  ;;  %v5920_v6 = vpop.f32.mrb[20].mxu0 }
 0x52f   :  { %v7164_v31 = vadd.f32 %v5756_v3, %v3263_v23  ;;  %v7166_v25 = vadd.f32 %v5920_v6, %v3271_v60  ;;  %v5758_v5 = vpop.f32.mrb[9].mxu1  ;;  %v5922_v7 = vpop.f32.mrb[21].mxu0  ;;  %v3279_v6 = vrot.slane %v8577_v22, %v1084_v33 }
 0x530   :  { %v7165_v41 = vadd.f32 %v5758_v5, %v3267_v62  ;;  %v7167_v8 = vadd.f32 %v5922_v7, %v3275_v63  ;;  %v5760_v11 = vpop.f32.mrb[10].mxu1  ;;  %v5924_v50 = vpop.f32.mrb[22].mxu0  ;;  %6061 = vmatpush1.bf16.msra.mxu1 %v7968_v0 }
 0x531   :  { %8001 = vtanh.f32 %v7164_v31  ;;  %v5761_v42 = vpop.f32.mrb[11].mxu1  ;;  %v5925_v14 = vpop.f32.mrb[23].mxu0  ;;  %6062 = vmatprep.subr.bf16.mxu1 %v7973_v1  ;;  %v3283_v31 = vrot.slane %v8577_v22, %v1088_v34 }
 0x532   :  { %8003 = vtanh.f32 %v7166_v25 }
 0x533   :  { %8005 = vtanh.f32 %v7165_v41 }
 0x534   :  { %8007 = vtanh.f32 %v7167_v8  ;;  %6063 = vmatpush1.bf16.msra.mxu1 %v7971_v9 }
 0x535   :  { %6064 = vmatprep.subr.bf16.mxu1 %v7976_v55 }
 0x538   :  { %6065 = vmatpush1.bf16.msra.mxu1 %v7974_v29 }
 0x539   :  { %6066 = vmatprep.subr.bf16.mxu1 %v7979_v20 }
 0x53b   :  { %v8002_v24 = vpop.eup %8001 }
 0x53c   :  { %v8004_v37 = vpop.eup %8003  ;;  %6258 = vst [vmem:[#allocation17] sm:$0xff] %v8002_v24  ;;  %6067 = vmatpush1.bf16.msra.mxu1 %v7977_v21 }
 0x53d   :  { %v8006_v27 = vpop.eup %8005  ;;  %6260 = vst [vmem:[#allocation17 + $0x10] sm:$0xff] %v8004_v37  ;;  %6068 = vmatprep.subr.bf16.mxu1 %v7982_v51 }
 0x53e   :  { %v8008_v12 = vpop.eup %8007  ;;  %6259 = vst [vmem:[#allocation17 + $0x8] sm:$0xff] %v8006_v27 }
 0x53f   :  { %6261 = vst [vmem:[#allocation17 + $0x18] sm:$0xff] %v8008_v12 }
 0x540   :  { %6069 = vmatpush1.bf16.msra.mxu1 %v7980_v26 }
 0x541   :  { %6070 = vmatprep.subr.bf16.mxu1 %v7985_v10 }
 0x544   :  { %6071 = vmatpush1.bf16.msra.mxu1 %v7983_v13 }
 0x545   :  { %6072 = vmatprep.subr.bf16.mxu1 %v7988_v17 }
 0x548   :  { %6073 = vmatpush1.bf16.msra.mxu1 %v7986_v18 }
 0x549   :  { %6074 = vmatprep.subr.bf16.mxu1 %v7991_v19 }
 0x54c   :  { %6075 = vmatpush1.bf16.msra.mxu1 %v7989_v28 }
 0x54d   :  { %6076 = vmatprep.subr.bf16.mxu1 %v7994_v30 }
 0x54f   :  { %v7084_v2 = vpop.f32.mrb[24].mxu0 }
 0x550   :  { %v7085_v36 = vpop.f32.mrb[25].mxu0  ;;  %6077 = vmatpush1.bf16.msra.mxu1 %v7992_v32 }
 0x551   :  { %v7086_v39 = vadd.f32 %v7085_v36, %v7084_v2  ;;  %v7087_v54 = vpop.f32.mrb[26].mxu0  ;;  %6078 = vmatprep.subr.bf16.mxu1 %v7997_v61 }
 0x552   :  { %v7088_v44 = vpop.f32.mrb[27].mxu0 }
 0x553   :  { %v6126_v49 = vadd.f32 %v7086_v39, %v3287_v46 }
 0x554   :  { %6079 = vmatpush1.bf16.msra.mxu1 %v7995_v38 }
 0x555   :  { %6080 = vmatprep.subr.bf16.mxu1 %v8000_v43 }
 0x558   :  { %6081 = vmatpush1.bf16.msra.mxu1 %v7998_v45 }
 0x55b   :  { %6083 = vmatmul.mubr.bf16.vlgmr.msra.gmra.mrb[12].mxu1 %v8558_v40 }
 0x56f   :  { %v7106_v47 = vpop.f32.mrb[28].mxu0 }
 0x570   :  { %v7107_v48 = vpop.f32.mrb[29].mxu0 }
 0x571   :  { %v7108_v52 = vadd.f32 %v7107_v48, %v7106_v47  ;;  %v7109_v53 = vpop.f32.mrb[30].mxu0 }
 0x572   :  { %v7110_v56 = vpop.f32.mrb[31].mxu0 }
 0x573   :  { %v6166_v57 = vadd.f32 %v7108_v52, %v6126_v49 }
 0x58f   :  { %v7128_v58 = vpop.f32.mrb[32].mxu0 }
 0x590   :  { %v7129_v4 = vpop.f32.mrb[33].mxu0 }
 0x591   :  { %v7130_v59 = vadd.f32 %v7129_v4, %v7128_v58  ;;  %v7131_v16 = vpop.f32.mrb[34].mxu0 }
 0x592   :  { %v7132_v23 = vpop.f32.mrb[35].mxu0 }
 0x593   :  { %v6206_v60 = vadd.f32 %v7130_v59, %v6166_v57 }
 0x5af   :  { %v7150_v62 = vpop.f32.mrb[36].mxu0 }
 0x5b0   :  { %v7151_v63 = vpop.f32.mrb[37].mxu0 }
 0x5b1   :  { %v7152_v40 = vadd.f32 %v7151_v63, %v7150_v62  ;;  %v7153_v0 = vpop.f32.mrb[38].mxu0 }
 0x5b2   :  { %v7154_v1 = vpop.f32.mrb[39].mxu0 }
 0x5b3   :  { %v6246_v3 = vadd.f32 %v7152_v40, %v6206_v60 }
 0x5b5   :  { %8009 = vtanh.f32 %v6246_v3 }
 0x5bf   :  { %v8010_v15 = vpop.eup %8009 }
 0x5c0   :  { %6264 = vst [vmem:[#allocation17 + $0x30] sm:$0xff] %v8010_v15 }
 0x62e   :  { %v6084_v25 = vpop.f32.mrb[12].mxu1 }
 0x62f   :  { %v7168_v5 = vadd.f32 %v6084_v25, %v3279_v6  ;;  %v6086_v7 = vpop.f32.mrb[13].mxu1 }
 0x630   :  { %v7169_v41 = vadd.f32 %v6086_v7, %v3283_v31  ;;  %v6088_v8 = vpop.f32.mrb[14].mxu1 }
 0x631   :  { %8011 = vtanh.f32 %v7168_v5  ;;  %v6089_v11 = vpop.f32.mrb[15].mxu1 }
 0x632   :  { %8013 = vtanh.f32 %v7169_v41 }
 0x63b   :  { %v8012_v50 = vpop.eup %8011 }
 0x63c   :  { %v8014_v9 = vpop.eup %8013  ;;  %6262 = vst [vmem:[#allocation17 + $0x20] sm:$0xff] %v8012_v50 }
 0x63d   :  { %6263 = vst [vmem:[#allocation17 + $0x28] sm:$0xff] %v8014_v9 }
 0x63e   :  { %8224 = shalt.err (!%p8221_p6)
}
 0x63f   :  { %s8225_s22 = scalar_lea.hbm %s8618_s9, 896 }
 0x640   :  { %p8226_p7 = scmp.ne.s32.totalorder %s8618_s9, %s8225_s22  ;;  %p8229_p8 = scmp.lt.u32.totalorder %s8225_s22, %s8618_s9 }
 0x642   :  { %p8231_p9 = pnand %p8229_p8, %p8226_p7 }
 0x644   :  { %8234 = shalt.err (!%p8231_p9)
}
 0x645   :  { %6274 = dma.vmem_to_hbm [thread:$0]  %s6272_s24, 896, %s8618_s9, [#allocation4]  }
 0x646   :  { %8245 = dma.done.wait [#allocation4], 896  }
 0x647   :  { %8246 = vsyncadd [#allocation4], 4294966400 }
 0x648   :  { %6278 = vsyncpa [#allocation3], 1 }
 0x649   :  { %6279 = vsyncpa [#allocation6], 1 }
 0x64a   :  { %6280 = vsyncpa [#allocation9], 1 }
 0x64b   :  { %6281 = vsyncpa [#allocation12], 1 }
 0x64c   :  { %6282 = vsyncpa [#allocation15], 1 }
 0x64d   :  { %6283 = vsyncpa [#allocation4], 1 }

</bundles_post_ra>
